<compile_context>
chip_gen: v6e
topology: v6e:2x2x1
jax: 0.10.0
libtpu: 0.0.40
codegen_flags: <defaults>
</compile_context>

<pallas_src>
import functools

import jax
import jax.numpy as jnp
from jax import lax
from jax.experimental import pallas as pl
from jax.experimental.pallas import tpu as pltpu


def _round_up(x, m):
    return ((x + m - 1) // m) * m


# ----------------------------- Pallas kernel -------------------------------


def _conv_bn_relu_kernel(x_ref, w_ref, shift_ref, o_ref, acc_ref, *,
                         kh, kw, stride, dilation, h_out, w_out, relu):
    # x_ref:     (TB, H_pad, W_pad, C_in)     spatially pre-padded input tile
    # w_ref:     (KH*KW, C_in, C_out_pad)     conv weight, BN scale folded in
    # shift_ref: (1, C_out_pad)               BN shift = beta - mean*scale
    # o_ref:     (TB*H_out*W_out, C_out_pad)  lane-dense output tile
    # acc_ref:   (TB*H_out*W_out, C_out_pad)  f32 accumulator scratch (VMEM)
    x = x_ref[...]
    tb, _, _, c_in = x.shape
    m_tile = tb * h_out * w_out
    h_span = stride * (h_out - 1) + 1
    w_span = stride * (w_out - 1) + 1

    acc_ref[...] = jnp.zeros_like(acc_ref)

    # In-VMEM patch construction: KH*KW shifted windows of the resident input
    # tile, each contracted against its (C_in, C_out_pad) weight slice on the
    # MXU and accumulated in f32.  No im2col ever touches HBM.
    idx = 0
    for i in range(kh):
        for j in range(kw):
            hi = i * dilation
            wj = j * dilation
            win = x[:, hi:hi + h_span:stride, wj:wj + w_span:stride, :]
            win2d = win.reshape(m_tile, c_in)
            acc_ref[...] += jnp.dot(win2d, w_ref[idx],
                                    preferred_element_type=jnp.float32)
            idx += 1

    y = acc_ref[...] + shift_ref[...]
    if relu:
        y = jnp.maximum(y, 0.0)
    o_ref[...] = y.astype(o_ref.dtype)


def _fused_conv_bn_relu(x_pad_nhwc, w3d, shift_row, *, kernel_size, stride,
                        dilation, h_out, w_out, batch_tile, relu):
    n, h_pad, w_pad, c_in = x_pad_nhwc.shape
    _, _, c_out_pad = w3d.shape
    kh = kw = kernel_size
    tb = batch_tile
    m_tile = tb * h_out * w_out

    kernel = functools.partial(
        _conv_bn_relu_kernel, kh=kh, kw=kw, stride=stride, dilation=dilation,
        h_out=h_out, w_out=w_out, relu=relu)

    out = pl.pallas_call(
        kernel,
        out_shape=jax.ShapeDtypeStruct((n * h_out * w_out, c_out_pad),
                                       jnp.float32),
        grid_spec=pltpu.PrefetchScalarGridSpec(
            num_scalar_prefetch=0,
            grid=(n // tb,),
            in_specs=[
                pl.BlockSpec((tb, h_pad, w_pad, c_in), lambda b: (b, 0, 0, 0)),
                pl.BlockSpec((kh * kw, c_in, c_out_pad), lambda b: (0, 0, 0)),
                pl.BlockSpec((1, c_out_pad), lambda b: (0, 0)),
            ],
            out_specs=pl.BlockSpec((m_tile, c_out_pad), lambda b: (b, 0)),
            scratch_shapes=[pltpu.VMEM((m_tile, c_out_pad), jnp.float32)],
        ),
        compiler_params=pltpu.CompilerParams(
            dimension_semantics=("parallel",),
            vmem_limit_bytes=32 * 1024 * 1024,
        ),
    )(x_pad_nhwc, w3d, shift_row)
    return out


# ------------------------------ JAX module ----------------------------------


class BasicConvPallas:
    """JAX/Pallas re-implementation of BasicConv (groups=1, bias=False)."""

    def __init__(self, in_planes, out_planes, kernel_size, stride=1, padding=0,
                 dilation=1, groups=1, relu=True, bn=True, bias=False, *,
                 key, compute_dtype=jnp.bfloat16):
        assert groups == 1, "only groups=1 implemented"
        assert not bias, "BasicConv default uses bias=False"
        self.in_planes = in_planes
        self.out_planes = out_planes
        self.kernel_size = kernel_size
        self.stride = stride
        self.padding = padding
        self.dilation = dilation
        self.relu = relu
        self.bn = bn
        self.eps = 1e-5
        self.compute_dtype = compute_dtype

        k_w, k_g, k_b, k_m, k_v = jax.random.split(key, 5)
        fan_in = in_planes * kernel_size * kernel_size
        self.weight = jax.random.normal(
            k_w, (out_planes, in_planes, kernel_size, kernel_size), jnp.float32
        ) * (1.0 / jnp.sqrt(fan_in))
        if bn:
            self.gamma = 1.0 + 0.1 * jax.random.normal(k_g, (out_planes,), jnp.float32)
            self.beta = 0.1 * jax.random.normal(k_b, (out_planes,), jnp.float32)
            self.running_mean = 0.1 * jax.random.normal(k_m, (out_planes,), jnp.float32)
            self.running_var = 1.0 + 0.1 * jax.random.uniform(k_v, (out_planes,), jnp.float32)
        else:
            self.gamma = self.beta = self.running_mean = self.running_var = None

    def __call__(self, x_nchw):
        ks, st, pd, dl = self.kernel_size, self.stride, self.padding, self.dilation
        c_in, c_out = self.in_planes, self.out_planes
        n, _, h, w = x_nchw.shape
        h_out = (h + 2 * pd - dl * (ks - 1) - 1) // st + 1
        w_out = (w + 2 * pd - dl * (ks - 1) - 1) // st + 1

        # NCHW -> NHWC + spatial halo pad (one small HBM pass, fused by XLA).
        # TODO(synk): keep the surrounding model NHWC end-to-end to drop the
        # two full-tensor layout transposes entirely.
        x_nhwc = jnp.transpose(x_nchw, (0, 2, 3, 1))
        x_pad = jnp.pad(x_nhwc, ((0, 0), (pd, pd), (pd, pd), (0, 0)))
        x_pad = x_pad.astype(self.compute_dtype)

        # Eval-mode BatchNorm folded into scale/shift; scale is folded into
        # the conv weight columns so the kernel epilogue is only add + ReLU.
        # TODO(synk): training-mode BN (batch statistics) is not reproduced.
        if self.bn:
            scale = self.gamma / jnp.sqrt(self.running_var + self.eps)
            shift = self.beta - self.running_mean * scale
        else:
            scale = jnp.ones((c_out,), jnp.float32)
            shift = jnp.zeros((c_out,), jnp.float32)

        # Weight (C_out, C_in, KH, KW) -> (KH*KW, C_in, C_out_pad); C_out is
        # padded to a lane multiple (128) so every output store is lane-dense.
        c_out_pad = _round_up(c_out, 128)
        w3d = jnp.transpose(self.weight, (2, 3, 1, 0)).reshape(ks * ks, c_in, c_out)
        w3d = w3d * scale[None, None, :]
        w3d = jnp.pad(w3d, ((0, 0), (0, 0), (0, c_out_pad - c_out)))
        w3d = w3d.astype(self.compute_dtype)
        shift_row = jnp.pad(shift, (0, c_out_pad - c_out)).reshape(1, c_out_pad)
        shift_row = shift_row.astype(jnp.float32)

        # Batch tile: aim for >= 512 matmul rows per grid step (amortizes the
        # ~0.35us/step pipeline overhead), keep it a divisor of N, and keep
        # the output block row count a multiple of 8.
        hw = h_out * w_out
        tb = max(1, min(n, max(1, 512 // max(hw, 1))))
        while n % tb != 0:
            tb -= 1
        if (tb * hw) % 8 != 0 and (n // tb) > 1:
            tb = n  # single block == full array, sidesteps the (8,128) rule
        # TODO(synk): for large feature maps / large C_in add an H_out
        # row-tiling grid axis (KH-row halo) and a reduction grid axis with
        # pl.when init so tiles stay inside VMEM on v7x (64 MiB).

        out2d = _fused_conv_bn_relu(
            x_pad, w3d, shift_row, kernel_size=ks, stride=st, dilation=dl,
            h_out=h_out, w_out=w_out, batch_tile=tb, relu=self.relu)

        out = out2d[:, :c_out].reshape(n, h_out, w_out, c_out)
        return jnp.transpose(out, (0, 3, 1, 2))


# ------------------------------ reference ----------------------------------


def _reference(module, x_nchw):
    y = lax.conv_general_dilated(
        x_nchw, module.weight,
        window_strides=(module.stride, module.stride),
        padding=[(module.padding, module.padding)] * 2,
        rhs_dilation=(module.dilation, module.dilation),
        dimension_numbers=("NCHW", "OIHW", "NCHW"),
        precision=lax.Precision.HIGHEST,
    )
    if module.bn:
        g = module.gamma.reshape(1, -1, 1, 1)
        b = module.beta.reshape(1, -1, 1, 1)
        m = module.running_mean.reshape(1, -1, 1, 1)
        v = module.running_var.reshape(1, -1, 1, 1)
        y = (y - m) / jnp.sqrt(v + module.eps) * g + b
    if module.relu:
        y = jnp.maximum(y, 0.0)
    return y


# -------------------------------- main --------------------------------------


if __name__ == "__main__":
    key = jax.random.PRNGKey(0)
    k_x, k_p = jax.random.split(key)

    # Small shapes consistent with a BasicConv block: 3x3, stride 1, pad 1.
    N, C_in, H, W = 2, 4, 16, 16
    C_out = 8
    x = jax.random.normal(k_x, (N, C_in, H, W), jnp.float32)

    # f32 compute path: tight check against the XLA reference.
    mod_f32 = BasicConvPallas(C_in, C_out, kernel_size=3, stride=1, padding=1,
                              relu=True, bn=True, bias=False, key=k_p,
                              compute_dtype=jnp.float32)
    out_f32 = jax.block_until_ready(mod_f32(x))
    ref = _reference(mod_f32, x)
    assert out_f32.shape == ref.shape == (N, C_out, H, W)
    err32 = float(jnp.max(jnp.abs(out_f32 - ref)))
    assert jnp.allclose(out_f32, ref, atol=1e-4, rtol=1e-4), err32

    # bf16 matmul inputs with f32 accumulation (default fast path): looser
    # tolerance vs the f32 reference, consistent with bf16 rounding.
    mod_bf16 = BasicConvPallas(C_in, C_out, kernel_size=3, stride=1, padding=1,
                               relu=True, bn=True, bias=False, key=k_p,
                               compute_dtype=jnp.bfloat16)
    out_bf16 = jax.block_until_ready(mod_bf16(x))
    errbf = float(jnp.max(jnp.abs(out_bf16 - ref)))
    assert jnp.allclose(out_bf16, ref, atol=5e-2, rtol=5e-2), errbf

    print("KERNEL_OK")
</pallas_src>

<mosaic_0001>
module attributes {stable_mosaic.version = 11 : i64} {
  func.func @_conv_bn_relu_kernel(%arg0: i32, %arg1: memref<2x18x18x4xf32, #tpu.memory_space<vmem>>, %arg2: memref<9x4x128xf32, #tpu.memory_space<vmem>>, %arg3: memref<1x128xf32, #tpu.memory_space<vmem>>, %arg4: memref<512x128xf32, #tpu.memory_space<vmem>>, %arg5: memref<512x128xf32, #tpu.memory_space<vmem>>) attributes {dimension_semantics = [#tpu.dimension_semantics<parallel>], iteration_bounds = array<i64: 1>, scalar_prefetch = 0 : i64, scratch_operands = 1 : i64, tpu.core_type = #tpu.core_type<tc>, window_params = [{transform_indices = @transform_0, window_bounds = array<i64: 2, 18, 18, 4>}, {pipeline_mode = #tpu.pipeline_mode<synchronous>, transform_indices = @transform_1, window_bounds = array<i64: 9, 4, 128>}, {pipeline_mode = #tpu.pipeline_mode<synchronous>, transform_indices = @transform_2, window_bounds = array<i64: 1, 128>}, {transform_indices = @transform_3, window_bounds = array<i64: 512, 128>}]} {
    %c0 = arith.constant 0 : index
    %c0_0 = arith.constant 0 : index
    %c0_1 = arith.constant 0 : index
    %c0_2 = arith.constant 0 : index
    %0 = vector.load %arg1[%c0, %c0_0, %c0_1, %c0_2] : memref<2x18x18x4xf32, #tpu.memory_space<vmem>>, vector<2x18x18x4xf32>
    %cst = arith.constant 0.000000e+00 : f32
    %1 = vector.broadcast %cst : f32 to vector<512x128xf32>
    %c0_3 = arith.constant 0 : index
    %c0_4 = arith.constant 0 : index
    %2 = vector.load %arg5[%c0_3, %c0_4] : memref<512x128xf32, #tpu.memory_space<vmem>>, vector<512x128xf32>
    tpu.vector_store %arg5[%c0_3, %c0_4], %1 {strides = array<i32>} : memref<512x128xf32, #tpu.memory_space<vmem>>, vector<512x128xf32>,
    %3 = vector.extract_strided_slice %0 {offsets = [0, 0, 0, 0], sizes = [2, 16, 16, 4], strides = [1, 1, 1, 1]} : vector<2x18x18x4xf32> to vector<2x16x16x4xf32>
    %4 = vector.shape_cast %3 : vector<2x16x16x4xf32> to vector<512x4xf32>
    %c0_5 = arith.constant 0 : index
    %c0_6 = arith.constant 0 : index
    %5 = vector.load %arg5[%c0_5, %c0_6] : memref<512x128xf32, #tpu.memory_space<vmem>>, vector<512x128xf32>
    %c0_7 = arith.constant 0 : index
    %c0_8 = arith.constant 0 : index
    %c0_9 = arith.constant 0 : index
    %6 = vector.load %arg2[%c0_7, %c0_8, %c0_9] : memref<9x4x128xf32, #tpu.memory_space<vmem>>, vector<1x4x128xf32>
    %7 = vector.shape_cast %6 : vector<1x4x128xf32> to vector<4x128xf32>
    %cst_10 = arith.constant dense<0.000000e+00> : vector<512x128xf32>
    %8 = tpu.matmul %4, %7, %cst_10 {dimension_numbers = #tpu.dot_dimension_numbers<[1], [0], [0], [1], [0, 0, 1, 1], [], []>} : vector<512x4xf32>, vector<4x128xf32>, vector<512x128xf32> -> vector<512x128xf32>
    %9 = arith.addf %5, %8 : vector<512x128xf32>
    %c0_11 = arith.constant 0 : index
    %c0_12 = arith.constant 0 : index
    %10 = vector.load %arg5[%c0_11, %c0_12] : memref<512x128xf32, #tpu.memory_space<vmem>>, vector<512x128xf32>
    tpu.vector_store %arg5[%c0_11, %c0_12], %9 {strides = array<i32>} : memref<512x128xf32, #tpu.memory_space<vmem>>, vector<512x128xf32>,
    %11 = vector.extract_strided_slice %0 {offsets = [0, 0, 1, 0], sizes = [2, 16, 16, 4], strides = [1, 1, 1, 1]} : vector<2x18x18x4xf32> to vector<2x16x16x4xf32>
    %12 = vector.shape_cast %11 : vector<2x16x16x4xf32> to vector<512x4xf32>
    %c0_13 = arith.constant 0 : index
    %c0_14 = arith.constant 0 : index
    %13 = vector.load %arg5[%c0_13, %c0_14] : memref<512x128xf32, #tpu.memory_space<vmem>>, vector<512x128xf32>
    %c1 = arith.constant 1 : index
    %c0_15 = arith.constant 0 : index
    %c0_16 = arith.constant 0 : index
    %14 = vector.load %arg2[%c1, %c0_15, %c0_16] : memref<9x4x128xf32, #tpu.memory_space<vmem>>, vector<1x4x128xf32>
    %15 = vector.shape_cast %14 : vector<1x4x128xf32> to vector<4x128xf32>
    %cst_17 = arith.constant dense<0.000000e+00> : vector<512x128xf32>
    %16 = tpu.matmul %12, %15, %cst_17 {dimension_numbers = #tpu.dot_dimension_numbers<[1], [0], [0], [1], [0, 0, 1, 1], [], []>} : vector<512x4xf32>, vector<4x128xf32>, vector<512x128xf32> -> vector<512x128xf32>
    %17 = arith.addf %13, %16 : vector<512x128xf32>
    %c0_18 = arith.constant 0 : index
    %c0_19 = arith.constant 0 : index
    %18 = vector.load %arg5[%c0_18, %c0_19] : memref<512x128xf32, #tpu.memory_space<vmem>>, vector<512x128xf32>
    tpu.vector_store %arg5[%c0_18, %c0_19], %17 {strides = array<i32>} : memref<512x128xf32, #tpu.memory_space<vmem>>, vector<512x128xf32>,
    %19 = vector.extract_strided_slice %0 {offsets = [0, 0, 2, 0], sizes = [2, 16, 16, 4], strides = [1, 1, 1, 1]} : vector<2x18x18x4xf32> to vector<2x16x16x4xf32>
    %20 = vector.shape_cast %19 : vector<2x16x16x4xf32> to vector<512x4xf32>
    %c0_20 = arith.constant 0 : index
    %c0_21 = arith.constant 0 : index
    %21 = vector.load %arg5[%c0_20, %c0_21] : memref<512x128xf32, #tpu.memory_space<vmem>>, vector<512x128xf32>
    %c2 = arith.constant 2 : index
    %c0_22 = arith.constant 0 : index
    %c0_23 = arith.constant 0 : index
    %22 = vector.load %arg2[%c2, %c0_22, %c0_23] : memref<9x4x128xf32, #tpu.memory_space<vmem>>, vector<1x4x128xf32>
    %23 = vector.shape_cast %22 : vector<1x4x128xf32> to vector<4x128xf32>
    %cst_24 = arith.constant dense<0.000000e+00> : vector<512x128xf32>
    %24 = tpu.matmul %20, %23, %cst_24 {dimension_numbers = #tpu.dot_dimension_numbers<[1], [0], [0], [1], [0, 0, 1, 1], [], []>} : vector<512x4xf32>, vector<4x128xf32>, vector<512x128xf32> -> vector<512x128xf32>
    %25 = arith.addf %21, %24 : vector<512x128xf32>
    %c0_25 = arith.constant 0 : index
    %c0_26 = arith.constant 0 : index
    %26 = vector.load %arg5[%c0_25, %c0_26] : memref<512x128xf32, #tpu.memory_space<vmem>>, vector<512x128xf32>
    tpu.vector_store %arg5[%c0_25, %c0_26], %25 {strides = array<i32>} : memref<512x128xf32, #tpu.memory_space<vmem>>, vector<512x128xf32>,
    %27 = vector.extract_strided_slice %0 {offsets = [0, 1, 0, 0], sizes = [2, 16, 16, 4], strides = [1, 1, 1, 1]} : vector<2x18x18x4xf32> to vector<2x16x16x4xf32>
    %28 = vector.shape_cast %27 : vector<2x16x16x4xf32> to vector<512x4xf32>
    %c0_27 = arith.constant 0 : index
    %c0_28 = arith.constant 0 : index
    %29 = vector.load %arg5[%c0_27, %c0_28] : memref<512x128xf32, #tpu.memory_space<vmem>>, vector<512x128xf32>
    %c3 = arith.constant 3 : index
    %c0_29 = arith.constant 0 : index
    %c0_30 = arith.constant 0 : index
    %30 = vector.load %arg2[%c3, %c0_29, %c0_30] : memref<9x4x128xf32, #tpu.memory_space<vmem>>, vector<1x4x128xf32>
    %31 = vector.shape_cast %30 : vector<1x4x128xf32> to vector<4x128xf32>
    %cst_31 = arith.constant dense<0.000000e+00> : vector<512x128xf32>
    %32 = tpu.matmul %28, %31, %cst_31 {dimension_numbers = #tpu.dot_dimension_numbers<[1], [0], [0], [1], [0, 0, 1, 1], [], []>} : vector<512x4xf32>, vector<4x128xf32>, vector<512x128xf32> -> vector<512x128xf32>
    %33 = arith.addf %29, %32 : vector<512x128xf32>
    %c0_32 = arith.constant 0 : index
    %c0_33 = arith.constant 0 : index
    %34 = vector.load %arg5[%c0_32, %c0_33] : memref<512x128xf32, #tpu.memory_space<vmem>>, vector<512x128xf32>
    tpu.vector_store %arg5[%c0_32, %c0_33], %33 {strides = array<i32>} : memref<512x128xf32, #tpu.memory_space<vmem>>, vector<512x128xf32>,
    %35 = vector.extract_strided_slice %0 {offsets = [0, 1, 1, 0], sizes = [2, 16, 16, 4], strides = [1, 1, 1, 1]} : vector<2x18x18x4xf32> to vector<2x16x16x4xf32>
    %36 = vector.shape_cast %35 : vector<2x16x16x4xf32> to vector<512x4xf32>
    %c0_34 = arith.constant 0 : index
    %c0_35 = arith.constant 0 : index
    %37 = vector.load %arg5[%c0_34, %c0_35] : memref<512x128xf32, #tpu.memory_space<vmem>>, vector<512x128xf32>
    %c4 = arith.constant 4 : index
    %c0_36 = arith.constant 0 : index
    %c0_37 = arith.constant 0 : index
    %38 = vector.load %arg2[%c4, %c0_36, %c0_37] : memref<9x4x128xf32, #tpu.memory_space<vmem>>, vector<1x4x128xf32>
    %39 = vector.shape_cast %38 : vector<1x4x128xf32> to vector<4x128xf32>
    %cst_38 = arith.constant dense<0.000000e+00> : vector<512x128xf32>
    %40 = tpu.matmul %36, %39, %cst_38 {dimension_numbers = #tpu.dot_dimension_numbers<[1], [0], [0], [1], [0, 0, 1, 1], [], []>} : vector<512x4xf32>, vector<4x128xf32>, vector<512x128xf32> -> vector<512x128xf32>
    %41 = arith.addf %37, %40 : vector<512x128xf32>
    %c0_39 = arith.constant 0 : index
    %c0_40 = arith.constant 0 : index
    %42 = vector.load %arg5[%c0_39, %c0_40] : memref<512x128xf32, #tpu.memory_space<vmem>>, vector<512x128xf32>
    tpu.vector_store %arg5[%c0_39, %c0_40], %41 {strides = array<i32>} : memref<512x128xf32, #tpu.memory_space<vmem>>, vector<512x128xf32>,
    %43 = vector.extract_strided_slice %0 {offsets = [0, 1, 2, 0], sizes = [2, 16, 16, 4], strides = [1, 1, 1, 1]} : vector<2x18x18x4xf32> to vector<2x16x16x4xf32>
    %44 = vector.shape_cast %43 : vector<2x16x16x4xf32> to vector<512x4xf32>
    %c0_41 = arith.constant 0 : index
    %c0_42 = arith.constant 0 : index
    %45 = vector.load %arg5[%c0_41, %c0_42] : memref<512x128xf32, #tpu.memory_space<vmem>>, vector<512x128xf32>
    %c5 = arith.constant 5 : index
    %c0_43 = arith.constant 0 : index
    %c0_44 = arith.constant 0 : index
    %46 = vector.load %arg2[%c5, %c0_43, %c0_44] : memref<9x4x128xf32, #tpu.memory_space<vmem>>, vector<1x4x128xf32>
    %47 = vector.shape_cast %46 : vector<1x4x128xf32> to vector<4x128xf32>
    %cst_45 = arith.constant dense<0.000000e+00> : vector<512x128xf32>
    %48 = tpu.matmul %44, %47, %cst_45 {dimension_numbers = #tpu.dot_dimension_numbers<[1], [0], [0], [1], [0, 0, 1, 1], [], []>} : vector<512x4xf32>, vector<4x128xf32>, vector<512x128xf32> -> vector<512x128xf32>
    %49 = arith.addf %45, %48 : vector<512x128xf32>
    %c0_46 = arith.constant 0 : index
    %c0_47 = arith.constant 0 : index
    %50 = vector.load %arg5[%c0_46, %c0_47] : memref<512x128xf32, #tpu.memory_space<vmem>>, vector<512x128xf32>
    tpu.vector_store %arg5[%c0_46, %c0_47], %49 {strides = array<i32>} : memref<512x128xf32, #tpu.memory_space<vmem>>, vector<512x128xf32>,
    %51 = vector.extract_strided_slice %0 {offsets = [0, 2, 0, 0], sizes = [2, 16, 16, 4], strides = [1, 1, 1, 1]} : vector<2x18x18x4xf32> to vector<2x16x16x4xf32>
    %52 = vector.shape_cast %51 : vector<2x16x16x4xf32> to vector<512x4xf32>
    %c0_48 = arith.constant 0 : index
    %c0_49 = arith.constant 0 : index
    %53 = vector.load %arg5[%c0_48, %c0_49] : memref<512x128xf32, #tpu.memory_space<vmem>>, vector<512x128xf32>
    %c6 = arith.constant 6 : index
    %c0_50 = arith.constant 0 : index
    %c0_51 = arith.constant 0 : index
    %54 = vector.load %arg2[%c6, %c0_50, %c0_51] : memref<9x4x128xf32, #tpu.memory_space<vmem>>, vector<1x4x128xf32>
    %55 = vector.shape_cast %54 : vector<1x4x128xf32> to vector<4x128xf32>
    %cst_52 = arith.constant dense<0.000000e+00> : vector<512x128xf32>
    %56 = tpu.matmul %52, %55, %cst_52 {dimension_numbers = #tpu.dot_dimension_numbers<[1], [0], [0], [1], [0, 0, 1, 1], [], []>} : vector<512x4xf32>, vector<4x128xf32>, vector<512x128xf32> -> vector<512x128xf32>
    %57 = arith.addf %53, %56 : vector<512x128xf32>
    %c0_53 = arith.constant 0 : index
    %c0_54 = arith.constant 0 : index
    %58 = vector.load %arg5[%c0_53, %c0_54] : memref<512x128xf32, #tpu.memory_space<vmem>>, vector<512x128xf32>
    tpu.vector_store %arg5[%c0_53, %c0_54], %57 {strides = array<i32>} : memref<512x128xf32, #tpu.memory_space<vmem>>, vector<512x128xf32>,
    %59 = vector.extract_strided_slice %0 {offsets = [0, 2, 1, 0], sizes = [2, 16, 16, 4], strides = [1, 1, 1, 1]} : vector<2x18x18x4xf32> to vector<2x16x16x4xf32>
    %60 = vector.shape_cast %59 : vector<2x16x16x4xf32> to vector<512x4xf32>
    %c0_55 = arith.constant 0 : index
    %c0_56 = arith.constant 0 : index
    %61 = vector.load %arg5[%c0_55, %c0_56] : memref<512x128xf32, #tpu.memory_space<vmem>>, vector<512x128xf32>
    %c7 = arith.constant 7 : index
    %c0_57 = arith.constant 0 : index
    %c0_58 = arith.constant 0 : index
    %62 = vector.load %arg2[%c7, %c0_57, %c0_58] : memref<9x4x128xf32, #tpu.memory_space<vmem>>, vector<1x4x128xf32>
    %63 = vector.shape_cast %62 : vector<1x4x128xf32> to vector<4x128xf32>
    %cst_59 = arith.constant dense<0.000000e+00> : vector<512x128xf32>
    %64 = tpu.matmul %60, %63, %cst_59 {dimension_numbers = #tpu.dot_dimension_numbers<[1], [0], [0], [1], [0, 0, 1, 1], [], []>} : vector<512x4xf32>, vector<4x128xf32>, vector<512x128xf32> -> vector<512x128xf32>
    %65 = arith.addf %61, %64 : vector<512x128xf32>
    %c0_60 = arith.constant 0 : index
    %c0_61 = arith.constant 0 : index
    %66 = vector.load %arg5[%c0_60, %c0_61] : memref<512x128xf32, #tpu.memory_space<vmem>>, vector<512x128xf32>
    tpu.vector_store %arg5[%c0_60, %c0_61], %65 {strides = array<i32>} : memref<512x128xf32, #tpu.memory_space<vmem>>, vector<512x128xf32>,
    %67 = vector.extract_strided_slice %0 {offsets = [0, 2, 2, 0], sizes = [2, 16, 16, 4], strides = [1, 1, 1, 1]} : vector<2x18x18x4xf32> to vector<2x16x16x4xf32>
    %68 = vector.shape_cast %67 : vector<2x16x16x4xf32> to vector<512x4xf32>
    %c0_62 = arith.constant 0 : index
    %c0_63 = arith.constant 0 : index
    %69 = vector.load %arg5[%c0_62, %c0_63] : memref<512x128xf32, #tpu.memory_space<vmem>>, vector<512x128xf32>
    %c8 = arith.constant 8 : index
    %c0_64 = arith.constant 0 : index
    %c0_65 = arith.constant 0 : index
    %70 = vector.load %arg2[%c8, %c0_64, %c0_65] : memref<9x4x128xf32, #tpu.memory_space<vmem>>, vector<1x4x128xf32>
    %71 = vector.shape_cast %70 : vector<1x4x128xf32> to vector<4x128xf32>
    %cst_66 = arith.constant dense<0.000000e+00> : vector<512x128xf32>
    %72 = tpu.matmul %68, %71, %cst_66 {dimension_numbers = #tpu.dot_dimension_numbers<[1], [0], [0], [1], [0, 0, 1, 1], [], []>} : vector<512x4xf32>, vector<4x128xf32>, vector<512x128xf32> -> vector<512x128xf32>
    %73 = arith.addf %69, %72 : vector<512x128xf32>
    %c0_67 = arith.constant 0 : index
    %c0_68 = arith.constant 0 : index
    %74 = vector.load %arg5[%c0_67, %c0_68] : memref<512x128xf32, #tpu.memory_space<vmem>>, vector<512x128xf32>
    tpu.vector_store %arg5[%c0_67, %c0_68], %73 {strides = array<i32>} : memref<512x128xf32, #tpu.memory_space<vmem>>, vector<512x128xf32>,
    %c0_69 = arith.constant 0 : index
    %c0_70 = arith.constant 0 : index
    %75 = vector.load %arg5[%c0_69, %c0_70] : memref<512x128xf32, #tpu.memory_space<vmem>>, vector<512x128xf32>
    %c0_71 = arith.constant 0 : index
    %c0_72 = arith.constant 0 : index
    %76 = vector.load %arg3[%c0_71, %c0_72] : memref<1x128xf32, #tpu.memory_space<vmem>>, vector<1x128xf32>
    %77 = vector.broadcast %76 : vector<1x128xf32> to vector<512x128xf32>
    %78 = arith.addf %75, %77 : vector<512x128xf32>
    %cst_73 = arith.constant 0.000000e+00 : f32
    %79 = vector.broadcast %cst_73 : f32 to vector<512x128xf32>
    %80 = arith.maximumf %78, %79 : vector<512x128xf32>
    %c0_74 = arith.constant 0 : index
    %c0_75 = arith.constant 0 : index
    %81 = vector.load %arg4[%c0_74, %c0_75] : memref<512x128xf32, #tpu.memory_space<vmem>>, vector<512x128xf32>
    tpu.vector_store %arg4[%c0_74, %c0_75], %80 {strides = array<i32>} : memref<512x128xf32, #tpu.memory_space<vmem>>, vector<512x128xf32>,
    return
  }
  func.func @transform_0(%arg0: i32) -> (i32, i32, i32, i32) {
    %c0_i32 = arith.constant 0 : i32
    %c0_i32_0 = arith.constant 0 : i32
    %c0_i32_1 = arith.constant 0 : i32
    %c0_i32_2 = arith.constant 0 : i32
    return %arg0, %c0_i32, %c0_i32_0, %c0_i32_1 : i32, i32, i32, i32
  }
  func.func @transform_1(%arg0: i32) -> (i32, i32, i32) {
    %c0_i32 = arith.constant 0 : i32
    %c0_i32_0 = arith.constant 0 : i32
    %c0_i32_1 = arith.constant 0 : i32
    %c0_i32_2 = arith.constant 0 : i32
    return %c0_i32, %c0_i32_0, %c0_i32_1 : i32, i32, i32
  }
  func.func @transform_2(%arg0: i32) -> (i32, i32) {
    %c0_i32 = arith.constant 0 : i32
    %c0_i32_0 = arith.constant 0 : i32
    %c0_i32_1 = arith.constant 0 : i32
    return %c0_i32, %c0_i32_0 : i32, i32
  }
  func.func @transform_3(%arg0: i32) -> (i32, i32) {
    %c0_i32 = arith.constant 0 : i32
    %c0_i32_0 = arith.constant 0 : i32
    return %arg0, %c0_i32 : i32, i32
  }
}

</mosaic_0001>

<bundles_post_ra>
// kernel: tpu_custom_call.1
= control target key start
LH: loop header
LB: loop body
LE: loop exit
PB: predicated region body
PF: predicated region fallthrough
CT: control target
= control target key end

     0   :  { %vm445_vm0 = vcmask 1043456   ;;  %vm252_vm1 = vcmask 31744   ;;  %vm994_vm2 = vcmask 1046528   ;;  %vm1865_vm3 = vcmask 1045504   ;;  %s12147_s0 = inlined_call_operand.vmem [shape: f32[2,18,18,4], index: 0, kind: input, shape index: {}]   ;;  %s12148_s1 = inlined_call_operand.vmem [shape: f32[9,4,128], index: 1, kind: input, shape index: {}]   ;;  %s12149_s2 = inlined_call_operand.vmem [shape: f32[1,128], index: 2, kind: input, shape index: {}]   ;;  %s12150_s3 = inlined_call_operand.hbm [shape: f32[512,128], index: 3, kind: output, shape index: {}]  }
   0x1   :  { %v251_v0 = vld [vmem:[%s12148_s1] sm:$0xf]  ;;  %v8784_v1 = vld [vmem:[%s12147_s0 + $0x1b0] sm:$0xff]  ;;  %v8796_v3 = vld [vmem:[%s12147_s0 + $0x1b8] sm:$0xff] }
   0x2   :  { %v8789_v2 = vld [vmem:[%s12147_s0] sm:$0xff]  ;;  %8668 = vmatprep.subr.msk.mxu1 %vm445_vm0, %v251_v0  ;;  %7786 = vmatprep.subr.msk.mxu0 %vm445_vm0, %v251_v0  ;;  %v8807_v5 = vld [vmem:[%s12147_s0 + $0x8] sm:$0xff]  ;;  %v1075_v8 = vrot.slane %v8784_v1, 1  ;;  %v12152_v9 = vrot.slane %v8796_v3, 1  ;;  %v8828_v10 = vld [vmem:[%s12147_s0 + $0x18] sm:$0xff]  ;;  %v1946_v28 = vrot.slane %v8784_v1, 2 }
   0x3   :  { %8669 = vmatpush3.msk.msra.mxu1 %vm445_vm0, %v251_v0  ;;  %7836 = vmatprep.mubr.msk.f32.mxu1 %vm252_vm1, %v8784_v1  ;;  %v6672_v4 = vld [vmem:[%s12148_s1 + $0x4] sm:$0xf]  ;;  %v6738_v6 = vld [vmem:[%s12148_s1 + $0x8] sm:$0xf]  ;;  %v8836_v11 = vld [vmem:[%s12147_s0 + $0x1d0] sm:$0xff]  ;;  %v12151_v29 = vrot.slane %v8796_v3, 2 }
   0x4   :  { %7787 = vmatpush3.msk.msra.mxu0 %vm445_vm0, %v251_v0  ;;  %7788 = vmatprep.mubr.msk.f32.mxu0 %vm252_vm1, %v8789_v2  ;;  %v8818_v7 = vld [vmem:[%s12147_s0 + $0x1c8] sm:$0xff]  ;;  %v8844_v12 = vld [vmem:[%s12147_s0 + $0x20] sm:$0xff]  ;;  %v8857_v14 = vld [vmem:[%s12147_s0 + $0x30] sm:$0xff]  ;;  %v8864_v15 = vsel %vm994_vm2, %v1075_v8, %v12152_v9 }
   0x5   :  { %7837 = vmatmul.mubr.msk.f32.vlgmr.msra.gmra.mxu1 %vm252_vm1, %v8796_v3  ;;  %7884 = vmatprep.subr.msk.mxu1 %vm445_vm0, %v6672_v4  ;;  %v8849_v13 = vld [vmem:[%s12147_s0 + $0x1e0] sm:$0xff]  ;;  %v8873_v16 = vld [vmem:[%s12147_s0 + $0x1e8] sm:$0xff]  ;;  %v8880_v17 = vld [vmem:[%s12147_s0 + $0x38] sm:$0xff]  ;;  %v8993_v36 = vsel %vm1865_vm3, %v1946_v28, %v12151_v29 }
   0x6   :  { %7789 = vmatmul.mubr.msk.f32.vlgmr.msra.gmra.mxu0 %vm252_vm1, %v8807_v5  ;;  %7885 = vmatpush3.msk.msra.mxu1 %vm445_vm0, %v6672_v4  ;;  %v8885_v18 = vld [vmem:[%s12147_s0 + $0x1f8] sm:$0xff]  ;;  %v8890_v19 = vld [vmem:[%s12147_s0 + $0x48] sm:$0xff]  ;;  %v8901_v20 = vld [vmem:[%s12147_s0 + $0x200] sm:$0xff] }
   0x7   :  { %7982 = vmatprep.subr.msk.mxu0 %vm445_vm0, %v6738_v6  ;;  %7839 = vmatprep.mubr.msk.f32.mxu1 %vm252_vm1, %v8818_v7  ;;  %v8908_v21 = vld [vmem:[%s12147_s0 + $0x50] sm:$0xff]  ;;  %v8918_v23 = vld [vmem:[%s12147_s0 + $0x60] sm:$0xff]  ;;  %v8929_v24 = vld [vmem:[%s12147_s0 + $0x218] sm:$0xff] }
   0x8   :  { %7983 = vmatpush3.msk.msra.mxu0 %vm445_vm0, %v6738_v6  ;;  %7791 = vmatprep.mubr.msk.f32.mxu0 %vm252_vm1, %v8828_v10  ;;  %v8913_v22 = vld [vmem:[%s12147_s0 + $0x210] sm:$0xff]  ;;  %v8936_v25 = vld [vmem:[%s12147_s0 + $0x68] sm:$0xff]  ;;  %v8946_v27 = vld [vmem:[%s12147_s0 + $0x78] sm:$0xff] }
   0x9   :  { %7840 = vmatmul.mubr.msk.f32.gmra.mxu1 %vm252_vm1, %v8836_v11  ;;  %v8941_v26 = vld [vmem:[%s12147_s0 + $0x228] sm:$0xff]  ;;  %v8959_v30 = vld [vmem:[%s12147_s0 + $0x230] sm:$0xff]  ;;  %v8966_v31 = vld [vmem:[%s12147_s0 + $0x80] sm:$0xff] }
   0xa   :  { %7792 = vmatmul.mubr.msk.f32.gmra.mxu0 %vm252_vm1, %v8844_v12  ;;  %7842 = vmatprep.mubr.msk.f32.mxu1 %vm252_vm1, %v8849_v13  ;;  %v8971_v32 = vld [vmem:[%s12147_s0 + $0x240] sm:$0xff]  ;;  %v8976_v33 = vld [vmem:[%s12147_s0 + $0x90] sm:$0xff]  ;;  %v8983_v34 = vld [vmem:[%s12148_s1 + $0xc] sm:$0xf] }
   0xb   :  { %7794 = vmatprep.mubr.msk.f32.mxu0 %vm252_vm1, %v8857_v14  ;;  %v8988_v35 = vld [vmem:[%s12148_s1 + $0x10] sm:$0xf]  ;;  %v9002_v37 = vld [vmem:[%s12147_s0 + $0x248] sm:$0xff]  ;;  %v9009_v38 = vld [vmem:[%s12147_s0 + $0x98] sm:$0xff]  ;;  %8080 = vmatprep.subr.msk.mxu1 %vm445_vm0, %v8983_v34 }
   0xc   :  { %v9014_v39 = vld [vmem:[%s12147_s0 + $0x258] sm:$0xff]  ;;  %v9021_v40 = vld [vmem:[%s12147_s0 + $0xa8] sm:$0xff]  ;;  %8178 = vmatprep.subr.msk.mxu0 %vm445_vm0, %v8988_v35  ;;  %v9034_v41 = vld [vmem:[%s12147_s0 + $0x260] sm:$0xff] }
   0xd   :  { %7843 = vmatmul.mubr.msk.f32.gmra.mxu1 %vm252_vm1, %v8873_v16  ;;  %12419 = vst [vmem:[#allocation6_spill] sm:$0xff] %v9014_v39  ;;  %12420 = vst [vmem:[#allocation7_spill] sm:$0xff] %v9034_v41  ;;  %v9041_v42 = vld [vmem:[%s12147_s0 + $0xb0] sm:$0xff]  ;;  %v9051_v44 = vld [vmem:[%s12147_s0 + $0xc0] sm:$0xff] }
   0xe   :  { %7795 = vmatmul.mubr.msk.f32.gmra.mxu0 %vm252_vm1, %v8880_v17  ;;  %7845 = vmatprep.mubr.msk.f32.mxu1 %vm252_vm1, %v8885_v18  ;;  %v9046_v43 = vld [vmem:[%s12147_s0 + $0x270] sm:$0xff]  ;;  %v9062_v45 = vld [vmem:[%s12147_s0 + $0x278] sm:$0xff]  ;;  %v9069_v46 = vld [vmem:[%s12147_s0 + $0xc8] sm:$0xff] }
   0xf   :  { %7797 = vmatprep.mubr.msk.f32.mxu0 %vm252_vm1, %v8890_v19  ;;  %12421 = vst [vmem:[#allocation8_spill] sm:$0xff] %v9046_v43  ;;  %12422 = vst [vmem:[#allocation9_spill] sm:$0xff] %v9062_v45  ;;  %v9074_v47 = vld [vmem:[%s12147_s0 + $0x288] sm:$0xff]  ;;  %v9079_v48 = vld [vmem:[%s12147_s0 + $0xd8] sm:$0xff] }
  0x10   :  { %12423 = vst [vmem:[#allocation10_spill] sm:$0xff] %v9074_v47  ;;  %v9090_v49 = vld [vmem:[%s12147_s0 + $0x290] sm:$0xff] }
  0x11   :  { %7846 = vmatmul.mubr.msk.f32.gmra.mxu1 %vm252_vm1, %v8901_v20  ;;  %12424 = vst [vmem:[#allocation11_spill] sm:$0xff] %v9090_v49 }
  0x12   :  { %7798 = vmatmul.mubr.msk.f32.gmra.mxu0 %vm252_vm1, %v8908_v21  ;;  %7848 = vmatprep.mubr.msk.f32.mxu1 %vm252_vm1, %v8913_v22 }
  0x13   :  { %7800 = vmatprep.mubr.msk.f32.mxu0 %vm252_vm1, %v8918_v23 }
  0x15   :  { %7849 = vmatmul.mubr.msk.f32.gmra.mxu1 %vm252_vm1, %v8929_v24 }
  0x16   :  { %7801 = vmatmul.mubr.msk.f32.gmra.mxu0 %vm252_vm1, %v8936_v25  ;;  %7851 = vmatprep.mubr.msk.f32.mxu1 %vm252_vm1, %v8941_v26 }
  0x17   :  { %7803 = vmatprep.mubr.msk.f32.mxu0 %vm252_vm1, %v8946_v27 }
  0x19   :  { %7852 = vmatmul.mubr.msk.f32.gmra.mxu1 %vm252_vm1, %v8959_v30 }
  0x1a   :  { %7804 = vmatmul.mubr.msk.f32.gmra.mxu0 %vm252_vm1, %v8966_v31  ;;  %7854 = vmatprep.mubr.msk.f32.mxu1 %vm252_vm1, %v8971_v32 }
  0x1b   :  { %7806 = vmatprep.mubr.msk.f32.mxu0 %vm252_vm1, %v8976_v33 }
  0x1d   :  { %7855 = vmatmul.mubr.msk.f32.gmra.mxu1 %vm252_vm1, %v9002_v37 }
  0x1e   :  { %7807 = vmatmul.mubr.msk.f32.gmra.mxu0 %vm252_vm1, %v9009_v38  ;;  %7857 = vmatprep.mubr.msk.f32.mxu1 %vm252_vm1, %v9014_v39 }
  0x1f   :  { %7809 = vmatprep.mubr.msk.f32.mxu0 %vm252_vm1, %v9021_v40 }
  0x21   :  { %7858 = vmatmul.mubr.msk.f32.gmra.mxu1 %vm252_vm1, %v9034_v41 }
  0x22   :  { %7810 = vmatmul.mubr.msk.f32.gmra.mxu0 %vm252_vm1, %v9041_v42  ;;  %7860 = vmatprep.mubr.msk.f32.mxu1 %vm252_vm1, %v9046_v43 }
  0x23   :  { %7812 = vmatprep.mubr.msk.f32.mxu0 %vm252_vm1, %v9051_v44 }
  0x25   :  { %7861 = vmatmul.mubr.msk.f32.gmra.mxu1 %vm252_vm1, %v9062_v45 }
  0x26   :  { %7813 = vmatmul.mubr.msk.f32.gmra.mxu0 %vm252_vm1, %v9069_v46  ;;  %7863 = vmatprep.mubr.msk.f32.mxu1 %vm252_vm1, %v9074_v47 }
  0x27   :  { %8 = vsyncpa [#allocation4], 0  ;;  %7815 = vmatprep.mubr.msk.f32.mxu0 %vm252_vm1, %v9079_v48  ;;  %v9097_v50 = vld [vmem:[%s12147_s0 + $0xe0] sm:$0xff]  ;;  %v9107_v52 = vld [vmem:[%s12147_s0 + $0xf0] sm:$0xff]  ;;  %v995_v29 = vrot.slane %v8789_v2, 1  ;;  %v996_v9 = vrot.slane %v8807_v5, 1 }
  0x28   :  { %v9102_v51 = vld [vmem:[%s12147_s0 + $0x2a0] sm:$0xff]  ;;  %v9118_v53 = vld [vmem:[%s12147_s0 + $0x2a8] sm:$0xff]  ;;  %v9125_v54 = vld [vmem:[%s12147_s0 + $0xf8] sm:$0xff]  ;;  %v1871_v45 = vrot.slane %v8828_v10, 2  ;;  %v1872_v43 = vrot.slane %v8844_v12, 2 }
  0x29   :  { %12425 = vst [vmem:[#allocation12_spill] sm:$0xff] %v9102_v51  ;;  %7864 = vmatmul.mubr.msk.f32.gmra.mxu1 %vm252_vm1, %v9090_v49  ;;  %12426 = vst [vmem:[#allocation13_spill] sm:$0xff] %v9118_v53  ;;  %v9130_v55 = vld [vmem:[%s12147_s0 + $0x2b8] sm:$0xff]  ;;  %v9135_v56 = vld [vmem:[%s12147_s0 + $0x108] sm:$0xff]  ;;  %v1001_v49 = vrot.slane %v8844_v12, 1  ;;  %v1006_v12 = vrot.slane %v8880_v17, 1 }
  0x2a   :  { %7816 = vmatmul.mubr.msk.f32.gmra.mxu0 %vm252_vm1, %v9097_v50  ;;  %7866 = vmatprep.mubr.msk.f32.mxu1 %vm252_vm1, %v9102_v51  ;;  %12427 = vst [vmem:[#allocation14_spill] sm:$0xff] %v9130_v55  ;;  %v9146_v57 = vld [vmem:[%s12147_s0 + $0x2c0] sm:$0xff]  ;;  %v9153_v58 = vld [vmem:[%s12147_s0 + $0x110] sm:$0xff]  ;;  %v9174_v61 = vld [vmem:[%s12147_s0 + $0x2d8] sm:$0xff]  ;;  %v1000_v51 = vrot.slane %v8828_v10, 1  ;;  %v1005_v10 = vrot.slane %v8857_v14, 1 }
  0x2b   :  { %7818 = vmatprep.mubr.msk.f32.mxu0 %vm252_vm1, %v9107_v52  ;;  %12428 = vst [vmem:[#allocation15_spill] sm:$0xff] %v9146_v57  ;;  %v9158_v59 = vld [vmem:[%s12147_s0 + $0x2d0] sm:$0xff]  ;;  %v9163_v60 = vld [vmem:[%s12147_s0 + $0x120] sm:$0xff]  ;;  %12430 = vst [vmem:[#allocation17_spill] sm:$0xff] %v9174_v61 }
  0x2c   :  { %12429 = vst [vmem:[#allocation16_spill] sm:$0xff] %v9158_v59  ;;  %v9181_v62 = vld [vmem:[%s12147_s0 + $0x128] sm:$0xff]  ;;  %v9191_v0 = vld [vmem:[%s12147_s0 + $0x138] sm:$0xff]  ;;  %v9202_v1 = vld [vmem:[%s12147_s0 + $0x2f0] sm:$0xff]  ;;  %v9297_v39 = vsel %vm994_vm2, %v1000_v51, %v1001_v49 }
  0x2d   :  { %7867 = vmatmul.mubr.msk.f32.gmra.mxu1 %vm252_vm1, %v9118_v53  ;;  %v9186_v63 = vld [vmem:[%s12147_s0 + $0x2e8] sm:$0xff]  ;;  %12432 = vst [vmem:[#allocation19_spill] sm:$0xff] %v9202_v1  ;;  %v9209_v4 = vld [vmem:[%s12147_s0 + $0x140] sm:$0xff]  ;;  %v9219_v8 = vld [vmem:[%s12147_s0 + $0x150] sm:$0xff] }
  0x2e   :  { %7819 = vmatmul.mubr.msk.f32.gmra.mxu0 %vm252_vm1, %v9125_v54  ;;  %7869 = vmatprep.mubr.msk.f32.mxu1 %vm252_vm1, %v9130_v55  ;;  %12431 = vst [vmem:[#allocation18_spill] sm:$0xff] %v9186_v63  ;;  %v9214_v6 = vld [vmem:[%s12147_s0 + $0x300] sm:$0xff]  ;;  %v9230_v28 = vld [vmem:[%s12147_s0 + $0x308] sm:$0xff]  ;;  %v9272_v55 = vld [vmem:[%s12147_s0 + $0x170] sm:$0xff] }
  0x2f   :  { %7821 = vmatprep.mubr.msk.f32.mxu0 %vm252_vm1, %v9135_v56  ;;  %12433 = vst [vmem:[#allocation20_spill] sm:$0xff] %v9214_v6  ;;  %12434 = vst [vmem:[#allocation21_spill] sm:$0xff] %v9230_v28 }
  0x31   :  { %7870 = vmatmul.mubr.msk.f32.gmra.mxu1 %vm252_vm1, %v9146_v57  ;;  %v9254_v57 = vld [vmem:[%s12147_s0 + $0x168] sm:$0xff] }
  0x32   :  { %7822 = vmatmul.mubr.msk.f32.gmra.mxu0 %vm252_vm1, %v9153_v58  ;;  %7872 = vmatprep.mubr.msk.f32.mxu1 %vm252_vm1, %v9158_v59  ;;  %v1867_v59 = vrot.slane %v8807_v5, 2 }
  0x33   :  { %7824 = vmatprep.mubr.msk.f32.mxu0 %vm252_vm1, %v9163_v60 }
  0x35   :  { %7873 = vmatmul.mubr.msk.f32.gmra.mxu1 %vm252_vm1, %v9174_v61  ;;  %v1866_v61 = vrot.slane %v8789_v2, 2  ;;  %v9265_v2 = vld [vmem:[%s12147_s0 + $0x320] sm:$0xff] }
  0x36   :  { %7825 = vmatmul.mubr.msk.f32.gmra.mxu0 %vm252_vm1, %v9181_v62  ;;  %7875 = vmatprep.mubr.msk.f32.mxu1 %vm252_vm1, %v9186_v63  ;;  %v17_v63 = vld [vmem:[%s12147_s0 + $0x10] sm:$0x3]  ;;  %12436 = vst [vmem:[#allocation23_spill] sm:$0xff] %v9265_v2 }
  0x37   :  { %7827 = vmatprep.mubr.msk.f32.mxu0 %vm252_vm1, %v9191_v0  ;;  %v998_v5 = vrot.slane %v17_v63, 1  ;;  %v1869_v53 = vrot.slane %v17_v63, 2  ;;  %v1868_v47 = vsel %vm1865_vm3, %v1866_v61, %v1867_v59 }
  0x39   :  { %7876 = vmatmul.mubr.msk.f32.gmra.mxu1 %vm252_vm1, %v9202_v1  ;;  %v9239_v1 = vld [vmem:[%s12147_s0 + $0x158] sm:$0xff]  ;;  %v1870_v41 = vsel %vm1865_vm3, %v1867_v59, %v1869_v53  ;;  %v9308_v53 = vld [vmem:[%s12148_s1 + $0x14] sm:$0xf] }
  0x3a   :  { %7828 = vmatmul.mubr.msk.f32.gmra.mxu0 %vm252_vm1, %v9209_v4  ;;  %7878 = vmatprep.mubr.msk.f32.mxu1 %vm252_vm1, %v9214_v6  ;;  %v9244_v6 = vld [vmem:[%s12147_s0 + $0x318] sm:$0xff] }
  0x3b   :  { %7830 = vmatprep.mubr.msk.f32.mxu0 %vm252_vm1, %v9219_v8  ;;  %12435 = vst [vmem:[#allocation22_spill] sm:$0xff] %v9244_v6 }
  0x3d   :  { %7879 = vmatmul.mubr.msk.f32.gmra.mxu1 %vm252_vm1, %v9230_v28  ;;  %v997_v28 = vsel %vm994_vm2, %v995_v29, %v996_v9  ;;  %v999_v29 = vsel %vm994_vm2, %v996_v9, %v998_v5  ;;  %v1877_v9 = vrot.slane %v8880_v17, 2  ;;  %v1010_v17 = vrot.slane %v8890_v19, 1 }
  0x3e   :  { %7831 = vmatmul.mubr.msk.f32.gmra.mxu0 %vm252_vm1, %v9239_v1  ;;  %7881 = vmatprep.mubr.msk.f32.mxu1 %vm252_vm1, %v9244_v6  ;;  %v20_v6 = vld [vmem:[%s12147_s0 + $0x28] sm:$0x3] }
  0x3f   :  { %7833 = vmatprep.mubr.msk.f32.mxu0 %vm252_vm1, %v9254_v57  ;;  %v1003_v63 = vrot.slane %v20_v6, 1  ;;  %v1874_v61 = vrot.slane %v20_v6, 2  ;;  %v9334_v6 = vld [vmem:[%s12148_s1 + $0x18] sm:$0xf] }
  0x41   :  { %7882 = vmatmul.mubr.msk.f32.gmra.mxu1 %vm252_vm1, %v9265_v2  ;;  %v23_v2 = vld [vmem:[%s12147_s0 + $0x40] sm:$0x3]  ;;  %v9314_v51 = vsel %vm994_vm2, %v1001_v49, %v1003_v63  ;;  %v26_v49 = vld [vmem:[%s12147_s0 + $0x58] sm:$0x3] }
  0x42   :  { %7834 = vmatmul.mubr.msk.f32.gmra.mxu0 %vm252_vm1, %v9272_v55  ;;  %7886 = vmatprep.mubr.msk.f32.mxu1 %vm252_vm1, %v997_v28  ;;  %v1876_v28 = vrot.slane %v8857_v14, 2  ;;  %v1008_v14 = vrot.slane %v23_v2, 1  ;;  %v1879_v59 = vrot.slane %v23_v2, 2  ;;  %v1882_v2 = vrot.slane %v8908_v21, 2 }
  0x43   :  { %7984 = vmatprep.mubr.msk.f32.mxu0 %vm252_vm1, %v1868_v47  ;;  %v9303_v47 = vsel %vm1865_vm3, %v1871_v45, %v1872_v43  ;;  %v9322_v45 = vsel %vm1865_vm3, %v1872_v43, %v1874_v61  ;;  %v1881_v43 = vrot.slane %v8890_v19, 2  ;;  %v1013_v19 = vrot.slane %v26_v49, 1 }
  0x44   :  { %12437 = vst [vmem:[#allocation24_spill] sm:$0xff] %v9303_v47  ;;  %12438 = vst [vmem:[#allocation25_spill] sm:$0xff] %v9322_v45  ;;  %v9354_v5 = vsel %vm994_vm2, %v1006_v12, %v1008_v14  ;;  %v1884_v61 = vrot.slane %v26_v49, 2  ;;  %v1886_v14 = vrot.slane %v8918_v23, 2 }
  0x45   :  { %7887 = vmatmul.mubr.msk.f32.vlgmr.msra.gmra.mxu1 %vm252_vm1, %v999_v29  ;;  %12441 = vst [vmem:[#allocation28_spill] sm:$0xff] %v9354_v5  ;;  %v9360_v29 = vsel %vm1865_vm3, %v1877_v9, %v1879_v59  ;;  %v1020_v59 = vrot.slane %v8946_v27, 1 }
  0x46   :  { %7985 = vmatmul.mubr.msk.f32.vlgmr.msra.gmra.mxu0 %vm252_vm1, %v1870_v41  ;;  %8081 = vmatpush3.msk.msra.mxu1 %vm445_vm0, %v8983_v34  ;;  %v9325_v41 = vsel %vm994_vm2, %v1005_v10, %v1006_v12  ;;  %v1011_v34 = vrot.slane %v8908_v21, 1  ;;  %v1015_v21 = vrot.slane %v8918_v23, 1  ;;  %12442 = vst [vmem:[#allocation29_spill] sm:$0xff] %v9360_v29  ;;  %v1016_v10 = vrot.slane %v8936_v25, 1  ;;  %v29_v12 = vld [vmem:[%s12147_s0 + $0x70] sm:$0x3] }
  0x47   :  { %7889 = vmatprep.mubr.msk.f32.mxu1 %vm252_vm1, %v9297_v39  ;;  %8179 = vmatpush3.msk.msra.mxu0 %vm445_vm0, %v8988_v35  ;;  %12439 = vst [vmem:[#allocation26_spill] sm:$0xff] %v9325_v41  ;;  %v9339_v35 = vsel %vm1865_vm3, %v1876_v28, %v1877_v9  ;;  %v9370_v28 = vsel %vm1865_vm3, %v1881_v43, %v1882_v2  ;;  %v1889_v49 = vrot.slane %v29_v12, 2  ;;  %v1021_v43 = vrot.slane %v8966_v31, 1 }
  0x48   :  { %7987 = vmatprep.mubr.msk.f32.mxu0 %vm252_vm1, %v9303_v47  ;;  %12440 = vst [vmem:[#allocation27_spill] sm:$0xff] %v9339_v35  ;;  %8276 = vmatprep.subr.msk.mxu1 %vm445_vm0, %v9308_v53  ;;  %v9363_v63 = vsel %vm994_vm2, %v1010_v17, %v1011_v34  ;;  %12444 = vst [vmem:[#allocation31_spill] sm:$0xff] %v9370_v28  ;;  %v9381_v9 = vsel %vm994_vm2, %v1011_v34, %v1013_v19  ;;  %v1018_v17 = vrot.slane %v29_v12, 1  ;;  %v32_v34 = vld [vmem:[%s12147_s0 + $0x88] sm:$0x3] }
  0x49   :  { %7890 = vmatmul.mubr.msk.f32.gmra.mxu1 %vm252_vm1, %v9314_v51  ;;  %8374 = vmatprep.subr.msk.mxu0 %vm445_vm0, %v9334_v6  ;;  %12443 = vst [vmem:[#allocation30_spill] sm:$0xff] %v9363_v63  ;;  %12445 = vst [vmem:[#allocation32_spill] sm:$0xff] %v9381_v9  ;;  %v9387_v23 = vsel %vm1865_vm3, %v1882_v2, %v1884_v61  ;;  %v1025_v61 = vrot.slane %v8976_v33, 1  ;;  %v1894_v12 = vrot.slane %v32_v34, 2 }
  0x4a   :  { %7988 = vmatmul.mubr.msk.f32.gmra.mxu0 %vm252_vm1, %v9322_v45  ;;  %7892 = vmatprep.mubr.msk.f32.mxu1 %vm252_vm1, %v9325_v41  ;;  %12446 = vst [vmem:[#allocation33_spill] sm:$0xff] %v9387_v23  ;;  %v9408_v2 = vsel %vm994_vm2, %v1016_v10, %v1018_v17 }
  0x4b   :  { %7990 = vmatprep.mubr.msk.f32.mxu0 %vm252_vm1, %v9339_v35  ;;  %v1887_v35 = vrot.slane %v8936_v25, 2  ;;  %v9390_v25 = vsel %vm994_vm2, %v1015_v21, %v1016_v10  ;;  %12449 = vst [vmem:[#allocation36_spill] sm:$0xff] %v9408_v2  ;;  %v1023_v21 = vrot.slane %v32_v34, 1  ;;  %v35_v10 = vld [vmem:[%s12147_s0 + $0xa0] sm:$0x3]  ;;  %v1031_v34 = vrot.slane %v9041_v42, 1 }
  0x4c   :  { %12447 = vst [vmem:[#allocation34_spill] sm:$0xff] %v9390_v25 }
  0x4d   :  { %7893 = vmatmul.mubr.msk.f32.gmra.mxu1 %vm252_vm1, %v9354_v5  ;;  %v9397_v19 = vsel %vm1865_vm3, %v1886_v14, %v1887_v35  ;;  %v1026_v14 = vrot.slane %v9009_v38, 1 }
  0x4e   :  { %7991 = vmatmul.mubr.msk.f32.gmra.mxu0 %vm252_vm1, %v9360_v29  ;;  %7895 = vmatprep.mubr.msk.f32.mxu1 %vm252_vm1, %v9363_v63  ;;  %12448 = vst [vmem:[#allocation35_spill] sm:$0xff] %v9397_v19  ;;  %v1891_v29 = vrot.slane %v8946_v27, 2  ;;  %v9414_v27 = vsel %vm1865_vm3, %v1887_v35, %v1889_v49  ;;  %v9435_v35 = vsel %vm994_vm2, %v1021_v43, %v1023_v21  ;;  %v1899_v49 = vrot.slane %v35_v10, 2 }
  0x4f   :  { %7993 = vmatprep.mubr.msk.f32.mxu0 %vm252_vm1, %v9370_v28  ;;  %v1892_v28 = vrot.slane %v8966_v31, 2  ;;  %12450 = vst [vmem:[#allocation37_spill] sm:$0xff] %v9414_v27  ;;  %v9417_v31 = vsel %vm994_vm2, %v1020_v59, %v1021_v43  ;;  %12453 = vst [vmem:[#allocation40_spill] sm:$0xff] %v9435_v35  ;;  %v1028_v59 = vrot.slane %v35_v10, 1  ;;  %v38_v43 = vld [vmem:[%s12147_s0 + $0xb8] sm:$0x3] }
  0x50   :  { %12451 = vst [vmem:[#allocation38_spill] sm:$0xff] %v9417_v31  ;;  %v1036_v10 = vrot.slane %v9069_v46, 1 }
  0x51   :  { %7896 = vmatmul.mubr.msk.f32.gmra.mxu1 %vm252_vm1, %v9381_v9  ;;  %v9424_v17 = vsel %vm1865_vm3, %v1891_v29, %v1892_v28  ;;  %v1030_v29 = vrot.slane %v9021_v40, 1 }
  0x52   :  { %7994 = vmatmul.mubr.msk.f32.gmra.mxu0 %vm252_vm1, %v9387_v23  ;;  %7898 = vmatprep.mubr.msk.f32.mxu1 %vm252_vm1, %v9390_v25  ;;  %12452 = vst [vmem:[#allocation39_spill] sm:$0xff] %v9424_v17  ;;  %v1896_v23 = vrot.slane %v8976_v33, 2  ;;  %v9441_v33 = vsel %vm1865_vm3, %v1892_v28, %v1894_v12  ;;  %v9462_v28 = vsel %vm994_vm2, %v1026_v14, %v1028_v59  ;;  %v1904_v12 = vrot.slane %v38_v43, 2 }
  0x53   :  { %7996 = vmatprep.mubr.msk.f32.mxu0 %vm252_vm1, %v9397_v19  ;;  %v1897_v19 = vrot.slane %v9009_v38, 2  ;;  %12454 = vst [vmem:[#allocation41_spill] sm:$0xff] %v9441_v33  ;;  %v9444_v38 = vsel %vm994_vm2, %v1025_v61, %v1026_v14  ;;  %12457 = vst [vmem:[#allocation44_spill] sm:$0xff] %v9462_v28  ;;  %v1033_v61 = vrot.slane %v38_v43, 1  ;;  %v41_v14 = vld [vmem:[%s12147_s0 + $0xd0] sm:$0x3] }
  0x54   :  { %12455 = vst [vmem:[#allocation42_spill] sm:$0xff] %v9444_v38  ;;  %v1041_v43 = vrot.slane %v9097_v50, 1 }
  0x55   :  { %7899 = vmatmul.mubr.msk.f32.gmra.mxu1 %vm252_vm1, %v9408_v2  ;;  %v9451_v21 = vsel %vm1865_vm3, %v1896_v23, %v1897_v19  ;;  %v1035_v23 = vrot.slane %v9051_v44, 1 }
  0x56   :  { %7997 = vmatmul.mubr.msk.f32.gmra.mxu0 %vm252_vm1, %v9414_v27  ;;  %7901 = vmatprep.mubr.msk.f32.mxu1 %vm252_vm1, %v9417_v31  ;;  %12456 = vst [vmem:[#allocation43_spill] sm:$0xff] %v9451_v21  ;;  %v1901_v27 = vrot.slane %v9021_v40, 2  ;;  %v9468_v40 = vsel %vm1865_vm3, %v1897_v19, %v1899_v49  ;;  %v9489_v19 = vsel %vm994_vm2, %v1031_v34, %v1033_v61  ;;  %v1909_v49 = vrot.slane %v41_v14, 2 }
  0x57   :  { %7999 = vmatprep.mubr.msk.f32.mxu0 %vm252_vm1, %v9424_v17  ;;  %v1902_v17 = vrot.slane %v9041_v42, 2  ;;  %12458 = vst [vmem:[#allocation45_spill] sm:$0xff] %v9468_v40  ;;  %v9471_v42 = vsel %vm994_vm2, %v1030_v29, %v1031_v34  ;;  %12461 = vst [vmem:[#allocation48_spill] sm:$0xff] %v9489_v19  ;;  %v1038_v29 = vrot.slane %v41_v14, 1  ;;  %v44_v34 = vld [vmem:[%s12147_s0 + $0xe8] sm:$0x3] }
  0x58   :  { %12459 = vst [vmem:[#allocation46_spill] sm:$0xff] %v9471_v42  ;;  %v1046_v14 = vrot.slane %v9125_v54, 1 }
  0x59   :  { %7902 = vmatmul.mubr.msk.f32.gmra.mxu1 %vm252_vm1, %v9435_v35  ;;  %v9478_v59 = vsel %vm1865_vm3, %v1901_v27, %v1902_v17  ;;  %v1040_v27 = vrot.slane %v9079_v48, 1 }
  0x5a   :  { %8000 = vmatmul.mubr.msk.f32.gmra.mxu0 %vm252_vm1, %v9441_v33  ;;  %7904 = vmatprep.mubr.msk.f32.mxu1 %vm252_vm1, %v9444_v38  ;;  %12460 = vst [vmem:[#allocation47_spill] sm:$0xff] %v9478_v59  ;;  %v1906_v33 = vrot.slane %v9051_v44, 2  ;;  %v9495_v44 = vsel %vm1865_vm3, %v1902_v17, %v1904_v12  ;;  %v9516_v17 = vsel %vm994_vm2, %v1036_v10, %v1038_v29  ;;  %v1914_v12 = vrot.slane %v44_v34, 2 }
  0x5b   :  { %8002 = vmatprep.mubr.msk.f32.mxu0 %vm252_vm1, %v9451_v21  ;;  %v1907_v21 = vrot.slane %v9069_v46, 2  ;;  %12462 = vst [vmem:[#allocation49_spill] sm:$0xff] %v9495_v44  ;;  %v9498_v46 = vsel %vm994_vm2, %v1035_v23, %v1036_v10  ;;  %12465 = vst [vmem:[#allocation52_spill] sm:$0xff] %v9516_v17  ;;  %v1043_v23 = vrot.slane %v44_v34, 1  ;;  %v47_v10 = vld [vmem:[%s12147_s0 + $0x100] sm:$0x3] }
  0x5c   :  { %12463 = vst [vmem:[#allocation50_spill] sm:$0xff] %v9498_v46  ;;  %v1051_v34 = vrot.slane %v9153_v58, 1 }
  0x5d   :  { %7905 = vmatmul.mubr.msk.f32.gmra.mxu1 %vm252_vm1, %v9462_v28  ;;  %v9505_v61 = vsel %vm1865_vm3, %v1906_v33, %v1907_v21  ;;  %v1045_v33 = vrot.slane %v9107_v52, 1 }
  0x5e   :  { %8003 = vmatmul.mubr.msk.f32.gmra.mxu0 %vm252_vm1, %v9468_v40  ;;  %7907 = vmatprep.mubr.msk.f32.mxu1 %vm252_vm1, %v9471_v42  ;;  %12464 = vst [vmem:[#allocation51_spill] sm:$0xff] %v9505_v61  ;;  %v1911_v40 = vrot.slane %v9079_v48, 2  ;;  %v9522_v48 = vsel %vm1865_vm3, %v1907_v21, %v1909_v49  ;;  %v9543_v21 = vsel %vm994_vm2, %v1041_v43, %v1043_v23  ;;  %v1919_v49 = vrot.slane %v47_v10, 2 }
  0x5f   :  { %8005 = vmatprep.mubr.msk.f32.mxu0 %vm252_vm1, %v9478_v59  ;;  %v1912_v59 = vrot.slane %v9097_v50, 2  ;;  %12466 = vst [vmem:[#allocation53_spill] sm:$0xff] %v9522_v48  ;;  %v9525_v50 = vsel %vm994_vm2, %v1040_v27, %v1041_v43  ;;  %12469 = vst [vmem:[#allocation56_spill] sm:$0xff] %v9543_v21  ;;  %v1048_v27 = vrot.slane %v47_v10, 1  ;;  %v50_v43 = vld [vmem:[%s12147_s0 + $0x118] sm:$0x3] }
  0x60   :  { %12467 = vst [vmem:[#allocation54_spill] sm:$0xff] %v9525_v50  ;;  %v1056_v10 = vrot.slane %v9181_v62, 1 }
  0x61   :  { %7908 = vmatmul.mubr.msk.f32.gmra.mxu1 %vm252_vm1, %v9489_v19  ;;  %v9532_v29 = vsel %vm1865_vm3, %v1911_v40, %v1912_v59  ;;  %v1050_v40 = vrot.slane %v9135_v56, 1 }
  0x62   :  { %8006 = vmatmul.mubr.msk.f32.gmra.mxu0 %vm252_vm1, %v9495_v44  ;;  %7910 = vmatprep.mubr.msk.f32.mxu1 %vm252_vm1, %v9498_v46  ;;  %12468 = vst [vmem:[#allocation55_spill] sm:$0xff] %v9532_v29  ;;  %v1916_v44 = vrot.slane %v9107_v52, 2  ;;  %v9549_v52 = vsel %vm1865_vm3, %v1912_v59, %v1914_v12  ;;  %v9570_v59 = vsel %vm994_vm2, %v1046_v14, %v1048_v27  ;;  %v1924_v12 = vrot.slane %v50_v43, 2 }
  0x63   :  { %8008 = vmatprep.mubr.msk.f32.mxu0 %vm252_vm1, %v9505_v61  ;;  %v1917_v61 = vrot.slane %v9125_v54, 2  ;;  %12470 = vst [vmem:[#allocation57_spill] sm:$0xff] %v9549_v52  ;;  %v9552_v54 = vsel %vm994_vm2, %v1045_v33, %v1046_v14  ;;  %12473 = vst [vmem:[#allocation60_spill] sm:$0xff] %v9570_v59  ;;  %v1053_v33 = vrot.slane %v50_v43, 1  ;;  %v53_v14 = vld [vmem:[%s12147_s0 + $0x130] sm:$0x3] }
  0x64   :  { %12471 = vst [vmem:[#allocation58_spill] sm:$0xff] %v9552_v54  ;;  %v1061_v43 = vrot.slane %v9209_v4, 1 }
  0x65   :  { %7911 = vmatmul.mubr.msk.f32.gmra.mxu1 %vm252_vm1, %v9516_v17  ;;  %v9559_v23 = vsel %vm1865_vm3, %v1916_v44, %v1917_v61  ;;  %v1055_v44 = vrot.slane %v9163_v60, 1 }
  0x66   :  { %8009 = vmatmul.mubr.msk.f32.gmra.mxu0 %vm252_vm1, %v9522_v48  ;;  %7913 = vmatprep.mubr.msk.f32.mxu1 %vm252_vm1, %v9525_v50  ;;  %12472 = vst [vmem:[#allocation59_spill] sm:$0xff] %v9559_v23  ;;  %v1921_v48 = vrot.slane %v9135_v56, 2  ;;  %v9576_v56 = vsel %vm1865_vm3, %v1917_v61, %v1919_v49  ;;  %v9597_v61 = vsel %vm994_vm2, %v1051_v34, %v1053_v33  ;;  %v1929_v49 = vrot.slane %v53_v14, 2 }
  0x67   :  { %8011 = vmatprep.mubr.msk.f32.mxu0 %vm252_vm1, %v9532_v29  ;;  %v1922_v29 = vrot.slane %v9153_v58, 2  ;;  %12474 = vst [vmem:[#allocation61_spill] sm:$0xff] %v9576_v56  ;;  %v9579_v58 = vsel %vm994_vm2, %v1050_v40, %v1051_v34  ;;  %12477 = vst [vmem:[#allocation64_spill] sm:$0xff] %v9597_v61  ;;  %v1058_v40 = vrot.slane %v53_v14, 1  ;;  %v56_v34 = vld [vmem:[%s12147_s0 + $0x148] sm:$0x3] }
  0x68   :  { %12475 = vst [vmem:[#allocation62_spill] sm:$0xff] %v9579_v58  ;;  %v1066_v14 = vrot.slane %v9239_v1, 1 }
  0x69   :  { %7914 = vmatmul.mubr.msk.f32.gmra.mxu1 %vm252_vm1, %v9543_v21  ;;  %v9586_v27 = vsel %vm1865_vm3, %v1921_v48, %v1922_v29  ;;  %v1060_v48 = vrot.slane %v9191_v0, 1 }
  0x6a   :  { %8012 = vmatmul.mubr.msk.f32.gmra.mxu0 %vm252_vm1, %v9549_v52  ;;  %7916 = vmatprep.mubr.msk.f32.mxu1 %vm252_vm1, %v9552_v54  ;;  %12476 = vst [vmem:[#allocation63_spill] sm:$0xff] %v9586_v27  ;;  %v1926_v52 = vrot.slane %v9163_v60, 2  ;;  %v9603_v60 = vsel %vm1865_vm3, %v1922_v29, %v1924_v12  ;;  %v9624_v29 = vsel %vm994_vm2, %v1056_v10, %v1058_v40  ;;  %v1934_v12 = vrot.slane %v56_v34, 2 }
  0x6b   :  { %8014 = vmatprep.mubr.msk.f32.mxu0 %vm252_vm1, %v9559_v23  ;;  %v1927_v23 = vrot.slane %v9181_v62, 2  ;;  %12478 = vst [vmem:[#allocation65_spill] sm:$0xff] %v9603_v60  ;;  %v9606_v62 = vsel %vm994_vm2, %v1055_v44, %v1056_v10  ;;  %12481 = vst [vmem:[#allocation68_spill] sm:$0xff] %v9624_v29  ;;  %v1063_v44 = vrot.slane %v56_v34, 1  ;;  %v59_v10 = vld [vmem:[%s12147_s0 + $0x160] sm:$0x3] }
  0x6c   :  { %12479 = vst [vmem:[#allocation66_spill] sm:$0xff] %v9606_v62  ;;  %v1936_v34 = vrot.slane %v9219_v8, 2 }
  0x6d   :  { %7917 = vmatmul.mubr.msk.f32.gmra.mxu1 %vm252_vm1, %v9570_v59  ;;  %v9613_v33 = vsel %vm1865_vm3, %v1926_v52, %v1927_v23  ;;  %v1065_v52 = vrot.slane %v9219_v8, 1  ;;  %v1939_v8 = vrot.slane %v59_v10, 2 }
  0x6e   :  { %8015 = vmatmul.mubr.msk.f32.gmra.mxu0 %vm252_vm1, %v9576_v56  ;;  %7919 = vmatprep.mubr.msk.f32.mxu1 %vm252_vm1, %v9579_v58  ;;  %12480 = vst [vmem:[#allocation67_spill] sm:$0xff] %v9613_v33  ;;  %v1931_v56 = vrot.slane %v9191_v0, 2  ;;  %v9629_v0 = vsel %vm1865_vm3, %v1927_v23, %v1929_v49  ;;  %v9651_v23 = vsel %vm994_vm2, %v1061_v43, %v1063_v44  ;;  %v1070_v49 = vrot.slane %v9254_v57, 1 }
  0x6f   :  { %8017 = vmatprep.mubr.msk.f32.mxu0 %vm252_vm1, %v9586_v27  ;;  %v1932_v27 = vrot.slane %v9209_v4, 2  ;;  %12482 = vst [vmem:[#allocation69_spill] sm:$0xff] %v9629_v0  ;;  %v9632_v4 = vsel %vm994_vm2, %v1060_v48, %v1061_v43  ;;  %12485 = vst [vmem:[#allocation72_spill] sm:$0xff] %v9651_v23  ;;  %v62_v43 = vld [vmem:[%s12147_s0 + $0x178] sm:$0x3] }
  0x70   :  { %12483 = vst [vmem:[#allocation70_spill] sm:$0xff] %v9632_v4 }
  0x71   :  { %7920 = vmatmul.mubr.msk.f32.gmra.mxu1 %vm252_vm1, %v9597_v61  ;;  %v9640_v40 = vsel %vm1865_vm3, %v1931_v56, %v1932_v27  ;;  %v9654_v48 = vsel %vm1865_vm3, %v1932_v27, %v1934_v12  ;;  %v1068_v56 = vrot.slane %v59_v10, 1  ;;  %v1941_v27 = vrot.slane %v9254_v57, 2 }
  0x72   :  { %8018 = vmatmul.mubr.msk.f32.gmra.mxu0 %vm252_vm1, %v9603_v60  ;;  %7922 = vmatprep.mubr.msk.f32.mxu1 %vm252_vm1, %v9606_v62  ;;  %12484 = vst [vmem:[#allocation71_spill] sm:$0xff] %v9640_v40  ;;  %12486 = vst [vmem:[#allocation73_spill] sm:$0xff] %v9654_v48  ;;  %v1942_v12 = vrot.slane %v9272_v55, 2  ;;  %v1073_v10 = vrot.slane %v62_v43, 1 }
  0x73   :  { %8020 = vmatprep.mubr.msk.f32.mxu0 %vm252_vm1, %v9613_v33  ;;  %v1937_v33 = vrot.slane %v9239_v1, 2  ;;  %v9659_v1 = vsel %vm994_vm2, %v1065_v52, %v1066_v14  ;;  %v9678_v52 = vsel %vm994_vm2, %v1066_v14, %v1068_v56  ;;  %v1080_v56 = vrot.slane %v8818_v7, 1 }
  0x74   :  { %12487 = vst [vmem:[#allocation74_spill] sm:$0xff] %v9659_v1  ;;  %12489 = vst [vmem:[#allocation76_spill] sm:$0xff] %v9678_v52 }
  0x75   :  { %7923 = vmatmul.mubr.msk.f32.gmra.mxu1 %vm252_vm1, %v9624_v29  ;;  %v9667_v44 = vsel %vm1865_vm3, %v1936_v34, %v1937_v33  ;;  %v9683_v57 = vsel %vm1865_vm3, %v1937_v33, %v1939_v8  ;;  %v1944_v34 = vrot.slane %v62_v43, 2  ;;  %v1081_v8 = vrot.slane %v8836_v11, 1 }
  0x76   :  { %8021 = vmatmul.mubr.msk.f32.gmra.mxu0 %vm252_vm1, %v9629_v0  ;;  %7925 = vmatprep.mubr.msk.f32.mxu1 %vm252_vm1, %v9632_v4  ;;  %v1071_v0 = vrot.slane %v9272_v55, 1  ;;  %12488 = vst [vmem:[#allocation75_spill] sm:$0xff] %v9667_v44  ;;  %12490 = vst [vmem:[#allocation77_spill] sm:$0xff] %v9683_v57 }
  0x77   :  { %8023 = vmatprep.mubr.msk.f32.mxu0 %vm252_vm1, %v9640_v40  ;;  %v9692_v40 = vsel %vm1865_vm3, %v1941_v27, %v1942_v12  ;;  %v74_v27 = vld [vmem:[%s12147_s0 + $0x1d8] sm:$0x3] }
  0x78   :  { %v9686_v55 = vsel %vm994_vm2, %v1070_v49, %v1071_v0  ;;  %12492 = vst [vmem:[#allocation79_spill] sm:$0xff] %v9692_v40  ;;  %v9701_v33 = vsel %vm994_vm2, %v1071_v0, %v1073_v10  ;;  %v9708_v49 = vsel %vm1865_vm3, %v1942_v12, %v1944_v34  ;;  %v1952_v0 = vrot.slane %v8836_v11, 2 }
  0x79   :  { %7926 = vmatmul.mubr.msk.f32.gmra.mxu1 %vm252_vm1, %v9651_v23  ;;  %12491 = vst [vmem:[#allocation78_spill] sm:$0xff] %v9686_v55  ;;  %12493 = vst [vmem:[#allocation80_spill] sm:$0xff] %v9701_v33  ;;  %v12495_v12 = vrot.slane %v8796_v3, 1  ;;  %v1083_v10 = vrot.slane %v74_v27, 1  ;;  %v1954_v34 = vrot.slane %v74_v27, 2 }
  0x7a   :  { %8024 = vmatmul.mubr.msk.f32.gmra.mxu0 %vm252_vm1, %v9654_v48  ;;  %7928 = vmatprep.mubr.msk.f32.mxu1 %vm252_vm1, %v9659_v1  ;;  %v71_v48 = vld [vmem:[%s12147_s0 + $0x1c0] sm:$0x3]  ;;  %12494 = vst [vmem:[#allocation81_spill] sm:$0xff] %v9708_v49 }
  0x7b   :  { %8026 = vmatprep.mubr.msk.f32.mxu0 %vm252_vm1, %v9667_v44  ;;  %v1078_v14 = vrot.slane %v71_v48, 1  ;;  %v1949_v43 = vrot.slane %v71_v48, 2 }
  0x7d   :  { %7929 = vmatmul.mubr.msk.f32.gmra.mxu1 %vm252_vm1, %v9678_v52  ;;  %v1079_v48 = vsel %vm994_vm2, %v12495_v12, %v1078_v14  ;;  %v77_v14 = vld [vmem:[%s12147_s0 + $0x1f0] sm:$0x3] }
  0x7e   :  { %8027 = vmatmul.mubr.msk.f32.gmra.mxu0 %vm252_vm1, %v9683_v57  ;;  %7931 = vmatprep.mubr.msk.f32.mxu1 %vm252_vm1, %v9686_v55  ;;  %v1951_v57 = vrot.slane %v8818_v7, 2  ;;  %v12496_v7 = vrot.slane %v8796_v3, 2  ;;  %v1957_v3 = vrot.slane %v8873_v16, 2  ;;  %v1088_v12 = vrot.slane %v77_v14, 1 }
  0x7f   :  { %8029 = vmatprep.mubr.msk.f32.mxu0 %vm252_vm1, %v9692_v40  ;;  %v9730_v40 = vsel %vm994_vm2, %v1080_v56, %v1081_v8  ;;  %v9747_v56 = vsel %vm994_vm2, %v1081_v8, %v1083_v10  ;;  %v80_v8 = vld [vmem:[%s12147_s0 + $0x208] sm:$0x3] }
  0x80   :  { %v1950_v11 = vsel %vm1865_vm3, %v12496_v7, %v1949_v43  ;;  %v9738_v27 = vsel %vm1865_vm3, %v1951_v57, %v1952_v0  ;;  %v9750_v43 = vsel %vm1865_vm3, %v1952_v0, %v1954_v34  ;;  %v1090_v57 = vrot.slane %v8885_v18, 1 }
  0x81   :  { %7932 = vmatmul.mubr.msk.f32.gmra.mxu1 %vm252_vm1, %v9701_v33  ;;  %12497 = vst [vmem:[#allocation82_spill] sm:$0xff] %v9738_v27  ;;  %12498 = vst [vmem:[#allocation83_spill] sm:$0xff] %v9750_v43  ;;  %v1961_v0 = vrot.slane %v8885_v18, 2  ;;  %v1962_v34 = vrot.slane %v8901_v20, 2  ;;  %v1093_v7 = vrot.slane %v80_v8, 1 }
  0x82   :  { %8030 = vmatmul.mubr.msk.f32.gmra.mxu0 %vm252_vm1, %v9708_v49  ;;  %7934 = vmatprep.mubr.msk.f32.mxu1 %vm252_vm1, %v8864_v15  ;;  %v1085_v49 = vrot.slane %v8849_v13, 1  ;;  %v1086_v15 = vrot.slane %v8873_v16, 1  ;;  %v1959_v16 = vrot.slane %v77_v14, 2  ;;  %v1095_v14 = vrot.slane %v8913_v22, 1 }
  0x83   :  { %8032 = vmatprep.mubr.msk.f32.mxu0 %vm252_vm1, %v8993_v36  ;;  %v1956_v36 = vrot.slane %v8849_v13, 2 }
  0x84   :  { %v9755_v13 = vsel %vm994_vm2, %v1085_v49, %v1086_v15  ;;  %v9774_v49 = vsel %vm994_vm2, %v1086_v15, %v1088_v12  ;;  %v9779_v18 = vsel %vm1865_vm3, %v1957_v3, %v1959_v16  ;;  %v83_v15 = vld [vmem:[%s12147_s0 + $0x220] sm:$0x3]  ;;  %v9790_v12 = vsel %vm1865_vm3, %v1961_v0, %v1962_v34 }
  0x85   :  { %7935 = vmatmul.mubr.msk.f32.gmra.mxu1 %vm252_vm1, %v1079_v48  ;;  %12499 = vst [vmem:[#allocation84_spill] sm:$0xff] %v9755_v13  ;;  %v1091_v48 = vrot.slane %v8901_v20, 1  ;;  %v9763_v10 = vsel %vm1865_vm3, %v1956_v36, %v1957_v3  ;;  %12501 = vst [vmem:[#allocation86_spill] sm:$0xff] %v9774_v49  ;;  %v1096_v36 = vrot.slane %v8929_v24, 1  ;;  %v1100_v0 = vrot.slane %v8941_v26, 1 }
  0x86   :  { %8033 = vmatmul.mubr.msk.f32.gmra.mxu0 %vm252_vm1, %v1950_v11  ;;  %7937 = vmatprep.mubr.msk.f32.mxu1 %vm252_vm1, %v9730_v40  ;;  %12500 = vst [vmem:[#allocation85_spill] sm:$0xff] %v9763_v10  ;;  %v1964_v11 = vrot.slane %v80_v8, 2  ;;  %12502 = vst [vmem:[#allocation87_spill] sm:$0xff] %v9779_v18  ;;  %v1966_v8 = vrot.slane %v8913_v22, 2 }
  0x87   :  { %8035 = vmatprep.mubr.msk.f32.mxu0 %vm252_vm1, %v9738_v27  ;;  %v9782_v20 = vsel %vm994_vm2, %v1090_v57, %v1091_v48  ;;  %12504 = vst [vmem:[#allocation89_spill] sm:$0xff] %v9790_v12  ;;  %v9801_v3 = vsel %vm994_vm2, %v1091_v48, %v1093_v7  ;;  %v1098_v57 = vrot.slane %v83_v15, 1  ;;  %v9809_v22 = vsel %vm994_vm2, %v1095_v14, %v1096_v36  ;;  %v86_v48 = vld [vmem:[%s12147_s0 + $0x238] sm:$0x3] }
  0x88   :  { %12503 = vst [vmem:[#allocation88_spill] sm:$0xff] %v9782_v20  ;;  %12505 = vst [vmem:[#allocation90_spill] sm:$0xff] %v9801_v3  ;;  %v9804_v16 = vsel %vm1865_vm3, %v1962_v34, %v1964_v11  ;;  %v1971_v34 = vrot.slane %v8941_v26, 2  ;;  %v1972_v11 = vrot.slane %v8959_v30, 2 }
  0x89   :  { %7938 = vmatmul.mubr.msk.f32.gmra.mxu1 %vm252_vm1, %v9747_v56  ;;  %12506 = vst [vmem:[#allocation91_spill] sm:$0xff] %v9804_v16  ;;  %12507 = vst [vmem:[#allocation92_spill] sm:$0xff] %v9809_v22  ;;  %v9828_v14 = vsel %vm994_vm2, %v1096_v36, %v1098_v57  ;;  %v89_v36 = vld [vmem:[%s12147_s0 + $0x250] sm:$0x3] }
  0x8a   :  { %8036 = vmatmul.mubr.msk.f32.gmra.mxu0 %vm252_vm1, %v9750_v43  ;;  %7940 = vmatprep.mubr.msk.f32.mxu1 %vm252_vm1, %v9755_v13  ;;  %12509 = vst [vmem:[#allocation94_spill] sm:$0xff] %v9828_v14  ;;  %v9844_v57 = vsel %vm1865_vm3, %v1971_v34, %v1972_v11  ;;  %v12516_v34 = vld [vmem:[#allocation6_spill] sm:$0xff] }
  0x8b   :  { %8038 = vmatprep.mubr.msk.f32.mxu0 %vm252_vm1, %v9763_v10  ;;  %v1967_v10 = vrot.slane %v8929_v24, 2  ;;  %v1969_v24 = vrot.slane %v83_v15, 2  ;;  %v1103_v15 = vrot.slane %v86_v48, 1  ;;  %12512 = vst [vmem:[#allocation97_spill] sm:$0xff] %v9844_v57  ;;  %v1110_v43 = vrot.slane %v12516_v34, 1 }
  0x8d   :  { %7941 = vmatmul.mubr.msk.f32.gmra.mxu1 %vm252_vm1, %v9774_v49  ;;  %v9817_v7 = vsel %vm1865_vm3, %v1966_v8, %v1967_v10  ;;  %v9833_v26 = vsel %vm1865_vm3, %v1967_v10, %v1969_v24  ;;  %v1105_v8 = vrot.slane %v8971_v32, 1 }
  0x8e   :  { %8039 = vmatmul.mubr.msk.f32.gmra.mxu0 %vm252_vm1, %v9779_v18  ;;  %7943 = vmatprep.mubr.msk.f32.mxu1 %vm252_vm1, %v9782_v20  ;;  %v1101_v18 = vrot.slane %v8959_v30, 1  ;;  %12508 = vst [vmem:[#allocation93_spill] sm:$0xff] %v9817_v7  ;;  %12510 = vst [vmem:[#allocation95_spill] sm:$0xff] %v9833_v26 }
  0x8f   :  { %8041 = vmatprep.mubr.msk.f32.mxu0 %vm252_vm1, %v9790_v12  ;;  %v1974_v12 = vrot.slane %v86_v48, 2  ;;  %v1976_v48 = vrot.slane %v8971_v32, 2 }
  0x90   :  { %v9836_v30 = vsel %vm994_vm2, %v1100_v0, %v1101_v18  ;;  %v9855_v10 = vsel %vm994_vm2, %v1101_v18, %v1103_v15  ;;  %v1108_v0 = vrot.slane %v89_v36, 1  ;;  %v92_v18 = vld [vmem:[%s12147_s0 + $0x268] sm:$0x3] }
  0x91   :  { %7944 = vmatmul.mubr.msk.f32.gmra.mxu1 %vm252_vm1, %v9801_v3  ;;  %12511 = vst [vmem:[#allocation96_spill] sm:$0xff] %v9836_v30  ;;  %12513 = vst [vmem:[#allocation98_spill] sm:$0xff] %v9855_v10  ;;  %v9858_v24 = vsel %vm1865_vm3, %v1972_v11, %v1974_v12  ;;  %v1981_v12 = vrot.slane %v12516_v34, 2  ;;  %v12522_v34 = vld [vmem:[#allocation8_spill] sm:$0xff] }
  0x92   :  { %8042 = vmatmul.mubr.msk.f32.gmra.mxu0 %vm252_vm1, %v9804_v16  ;;  %7946 = vmatprep.mubr.msk.f32.mxu1 %vm252_vm1, %v9809_v22  ;;  %v1106_v16 = vrot.slane %v9002_v37, 1  ;;  %12514 = vst [vmem:[#allocation99_spill] sm:$0xff] %v9858_v24  ;;  %v1115_v44 = vrot.slane %v12522_v34, 1 }
  0x93   :  { %8044 = vmatprep.mubr.msk.f32.mxu0 %vm252_vm1, %v9817_v7  ;;  %v1977_v7 = vrot.slane %v9002_v37, 2  ;;  %v1979_v37 = vrot.slane %v89_v36, 2  ;;  %v1113_v36 = vrot.slane %v92_v18, 1 }
  0x94   :  { %v9863_v32 = vsel %vm994_vm2, %v1105_v8, %v1106_v16  ;;  %v9882_v8 = vsel %vm994_vm2, %v1106_v16, %v1108_v0  ;;  %v95_v16 = vld [vmem:[%s12147_s0 + $0x280] sm:$0x3] }
  0x95   :  { %7947 = vmatmul.mubr.msk.f32.gmra.mxu1 %vm252_vm1, %v9828_v14  ;;  %12515 = vst [vmem:[#allocation100_spill] sm:$0xff] %v9863_v32  ;;  %v9871_v15 = vsel %vm1865_vm3, %v1976_v48, %v1977_v7  ;;  %v9887_v48 = vsel %vm1865_vm3, %v1977_v7, %v1979_v37  ;;  %v1118_v37 = vrot.slane %v95_v16, 1 }
  0x96   :  { %8045 = vmatmul.mubr.msk.f32.gmra.mxu0 %vm252_vm1, %v9833_v26  ;;  %7949 = vmatprep.mubr.msk.f32.mxu1 %vm252_vm1, %v9836_v30  ;;  %v12517_v26 = vld [vmem:[#allocation7_spill] sm:$0xff]  ;;  %12518 = vst [vmem:[#allocation6_spill] sm:$0xff] %v9871_v15  ;;  %12520 = vst [vmem:[#allocation101_spill] sm:$0xff] %v9887_v48 }
  0x97   :  { %8047 = vmatprep.mubr.msk.f32.mxu0 %vm252_vm1, %v9844_v57  ;;  %v1111_v27 = vrot.slane %v12517_v26, 1  ;;  %v1982_v11 = vrot.slane %v12517_v26, 2  ;;  %12519 = vst [vmem:[#allocation7_spill] sm:$0xff] %v9882_v8  ;;  %v1984_v57 = vrot.slane %v92_v18, 2  ;;  %v1986_v18 = vrot.slane %v12522_v34, 2  ;;  %v12528_v34 = vld [vmem:[#allocation10_spill] sm:$0xff] }
  0x98   :  { %v1120_v45 = vrot.slane %v12528_v34, 1 }
  0x99   :  { %7950 = vmatmul.mubr.msk.f32.gmra.mxu1 %vm252_vm1, %v9855_v10  ;;  %v9890_v26 = vsel %vm994_vm2, %v1110_v43, %v1111_v27  ;;  %v9898_v0 = vsel %vm1865_vm3, %v1981_v12, %v1982_v11  ;;  %v9909_v43 = vsel %vm994_vm2, %v1111_v27, %v1113_v36  ;;  %v9912_v7 = vsel %vm1865_vm3, %v1982_v11, %v1984_v57  ;;  %v98_v27 = vld [vmem:[%s12147_s0 + $0x298] sm:$0x3] }
  0x9a   :  { %8048 = vmatmul.mubr.msk.f32.gmra.mxu0 %vm252_vm1, %v9858_v24  ;;  %7952 = vmatprep.mubr.msk.f32.mxu1 %vm252_vm1, %v9863_v32  ;;  %12521 = vst [vmem:[#allocation102_spill] sm:$0xff] %v9890_v26  ;;  %v12523_v24 = vld [vmem:[#allocation9_spill] sm:$0xff]  ;;  %12524 = vst [vmem:[#allocation8_spill] sm:$0xff] %v9898_v0  ;;  %v1989_v12 = vrot.slane %v95_v16, 2  ;;  %v1991_v57 = vrot.slane %v12528_v34, 2  ;;  %v1123_v16 = vrot.slane %v98_v27, 1 }
  0x9b   :  { %8050 = vmatprep.mubr.msk.f32.mxu0 %vm252_vm1, %v9871_v15  ;;  %v1116_v60 = vrot.slane %v12523_v24, 1  ;;  %v1987_v15 = vrot.slane %v12523_v24, 2  ;;  %12525 = vst [vmem:[#allocation9_spill] sm:$0xff] %v9909_v43  ;;  %12526 = vst [vmem:[#allocation103_spill] sm:$0xff] %v9912_v7  ;;  %v12534_v34 = vld [vmem:[#allocation12_spill] sm:$0xff] }
  0x9d   :  { %7953 = vmatmul.mubr.msk.f32.gmra.mxu1 %vm252_vm1, %v9882_v8  ;;  %v9917_v24 = vsel %vm994_vm2, %v1115_v44, %v1116_v60  ;;  %v9925_v36 = vsel %vm1865_vm3, %v1986_v18, %v1987_v15  ;;  %v9936_v44 = vsel %vm994_vm2, %v1116_v60, %v1118_v37  ;;  %v9941_v18 = vsel %vm1865_vm3, %v1987_v15, %v1989_v12  ;;  %v101_v60 = vld [vmem:[%s12147_s0 + $0x2b0] sm:$0x3] }
  0x9e   :  { %8051 = vmatmul.mubr.msk.f32.gmra.mxu0 %vm252_vm1, %v9887_v48  ;;  %7955 = vmatprep.mubr.msk.f32.mxu1 %vm252_vm1, %v9890_v26  ;;  %12527 = vst [vmem:[#allocation104_spill] sm:$0xff] %v9917_v24  ;;  %v12529_v48 = vld [vmem:[#allocation11_spill] sm:$0xff]  ;;  %12530 = vst [vmem:[#allocation10_spill] sm:$0xff] %v9925_v36  ;;  %v1128_v12 = vrot.slane %v101_v60, 1 }
  0x9f   :  { %8053 = vmatprep.mubr.msk.f32.mxu0 %vm252_vm1, %v9898_v0  ;;  %v1121_v47 = vrot.slane %v12529_v48, 1  ;;  %v1992_v11 = vrot.slane %v12529_v48, 2  ;;  %12531 = vst [vmem:[#allocation11_spill] sm:$0xff] %v9936_v44  ;;  %v1994_v0 = vrot.slane %v98_v27, 2  ;;  %12532 = vst [vmem:[#allocation105_spill] sm:$0xff] %v9941_v18  ;;  %v1996_v27 = vrot.slane %v12534_v34, 2 }
  0xa1   :  { %7956 = vmatmul.mubr.msk.f32.gmra.mxu1 %vm252_vm1, %v9909_v43  ;;  %v9944_v48 = vsel %vm994_vm2, %v1120_v45, %v1121_v47  ;;  %v1125_v43 = vrot.slane %v12534_v34, 1  ;;  %v9952_v37 = vsel %vm1865_vm3, %v1991_v57, %v1992_v11  ;;  %v9963_v45 = vsel %vm994_vm2, %v1121_v47, %v1123_v16  ;;  %v12540_v34 = vld [vmem:[#allocation14_spill] sm:$0xff]  ;;  %v104_v47 = vld [vmem:[%s12147_s0 + $0x2c8] sm:$0x3] }
  0xa2   :  { %8054 = vmatmul.mubr.msk.f32.gmra.mxu0 %vm252_vm1, %v9912_v7  ;;  %7958 = vmatprep.mubr.msk.f32.mxu1 %vm252_vm1, %v9917_v24  ;;  %12533 = vst [vmem:[#allocation106_spill] sm:$0xff] %v9944_v48  ;;  %v12535_v7 = vld [vmem:[#allocation13_spill] sm:$0xff]  ;;  %12536 = vst [vmem:[#allocation12_spill] sm:$0xff] %v9952_v37  ;;  %v9966_v15 = vsel %vm1865_vm3, %v1992_v11, %v1994_v0  ;;  %v1999_v57 = vrot.slane %v101_v60, 2  ;;  %v2001_v0 = vrot.slane %v12540_v34, 2  ;;  %v1133_v60 = vrot.slane %v104_v47, 1 }
  0xa3   :  { %8056 = vmatprep.mubr.msk.f32.mxu0 %vm252_vm1, %v9925_v36  ;;  %v1126_v26 = vrot.slane %v12535_v7, 1  ;;  %v1997_v36 = vrot.slane %v12535_v7, 2  ;;  %12537 = vst [vmem:[#allocation13_spill] sm:$0xff] %v9963_v45  ;;  %12538 = vst [vmem:[#allocation107_spill] sm:$0xff] %v9966_v15 }
  0xa5   :  { %7959 = vmatmul.mubr.msk.f32.gmra.mxu1 %vm252_vm1, %v9936_v44  ;;  %v9971_v7 = vsel %vm994_vm2, %v1125_v43, %v1126_v26  ;;  %v1130_v44 = vrot.slane %v12540_v34, 1  ;;  %v9979_v16 = vsel %vm1865_vm3, %v1996_v27, %v1997_v36  ;;  %v9990_v43 = vsel %vm994_vm2, %v1126_v26, %v1128_v12  ;;  %v12546_v34 = vld [vmem:[#allocation16_spill] sm:$0xff]  ;;  %v107_v26 = vld [vmem:[%s12147_s0 + $0x2e0] sm:$0x3] }
  0xa6   :  { %8057 = vmatmul.mubr.msk.f32.gmra.mxu0 %vm252_vm1, %v9941_v18  ;;  %7961 = vmatprep.mubr.msk.f32.mxu1 %vm252_vm1, %v9944_v48  ;;  %12539 = vst [vmem:[#allocation108_spill] sm:$0xff] %v9971_v7  ;;  %v12541_v18 = vld [vmem:[#allocation15_spill] sm:$0xff]  ;;  %12542 = vst [vmem:[#allocation14_spill] sm:$0xff] %v9979_v16  ;;  %v9995_v27 = vsel %vm1865_vm3, %v1997_v36, %v1999_v57  ;;  %v1138_v57 = vrot.slane %v107_v26, 1 }
  0xa7   :  { %8059 = vmatprep.mubr.msk.f32.mxu0 %vm252_vm1, %v9952_v37  ;;  %v1131_v24 = vrot.slane %v12541_v18, 1  ;;  %v2002_v11 = vrot.slane %v12541_v18, 2  ;;  %12543 = vst [vmem:[#allocation15_spill] sm:$0xff] %v9990_v43  ;;  %v2004_v37 = vrot.slane %v104_v47, 2  ;;  %12544 = vst [vmem:[#allocation109_spill] sm:$0xff] %v9995_v27  ;;  %v2006_v47 = vrot.slane %v12546_v34, 2 }
  0xa9   :  { %7962 = vmatmul.mubr.msk.f32.gmra.mxu1 %vm252_vm1, %v9963_v45  ;;  %v9998_v18 = vsel %vm994_vm2, %v1130_v44, %v1131_v24  ;;  %v1135_v45 = vrot.slane %v12546_v34, 1  ;;  %v10006_v12 = vsel %vm1865_vm3, %v2001_v0, %v2002_v11  ;;  %v10017_v36 = vsel %vm994_vm2, %v1131_v24, %v1133_v60  ;;  %v12552_v34 = vld [vmem:[#allocation18_spill] sm:$0xff]  ;;  %v110_v24 = vld [vmem:[%s12147_s0 + $0x2f8] sm:$0x3] }
  0xaa   :  { %8060 = vmatmul.mubr.msk.f32.gmra.mxu0 %vm252_vm1, %v9966_v15  ;;  %7964 = vmatprep.mubr.msk.f32.mxu1 %vm252_vm1, %v9971_v7  ;;  %12545 = vst [vmem:[#allocation110_spill] sm:$0xff] %v9998_v18  ;;  %v12547_v15 = vld [vmem:[#allocation17_spill] sm:$0xff]  ;;  %12548 = vst [vmem:[#allocation16_spill] sm:$0xff] %v10006_v12  ;;  %v10020_v44 = vsel %vm1865_vm3, %v2002_v11, %v2004_v37  ;;  %v2009_v0 = vrot.slane %v107_v26, 2  ;;  %v2011_v37 = vrot.slane %v12552_v34, 2  ;;  %v1143_v26 = vrot.slane %v110_v24, 1 }
  0xab   :  { %8062 = vmatprep.mubr.msk.f32.mxu0 %vm252_vm1, %v9979_v16  ;;  %v1136_v48 = vrot.slane %v12547_v15, 1  ;;  %v2007_v16 = vrot.slane %v12547_v15, 2  ;;  %12549 = vst [vmem:[#allocation17_spill] sm:$0xff] %v10017_v36  ;;  %12550 = vst [vmem:[#allocation111_spill] sm:$0xff] %v10020_v44 }
  0xad   :  { %7965 = vmatmul.mubr.msk.f32.gmra.mxu1 %vm252_vm1, %v9990_v43  ;;  %v10025_v15 = vsel %vm994_vm2, %v1135_v45, %v1136_v48  ;;  %v1140_v43 = vrot.slane %v12552_v34, 1  ;;  %v10033_v60 = vsel %vm1865_vm3, %v2006_v47, %v2007_v16  ;;  %v10044_v45 = vsel %vm994_vm2, %v1136_v48, %v1138_v57  ;;  %v12558_v34 = vld [vmem:[#allocation20_spill] sm:$0xff] }
  0xae   :  { %8063 = vmatmul.mubr.msk.f32.gmra.mxu0 %vm252_vm1, %v9995_v27  ;;  %7967 = vmatprep.mubr.msk.f32.mxu1 %vm252_vm1, %v9998_v18  ;;  %12551 = vst [vmem:[#allocation112_spill] sm:$0xff] %v10025_v15  ;;  %v12553_v27 = vld [vmem:[#allocation19_spill] sm:$0xff]  ;;  %12554 = vst [vmem:[#allocation18_spill] sm:$0xff] %v10033_v60  ;;  %v10049_v47 = vsel %vm1865_vm3, %v2007_v16, %v2009_v0  ;;  %v113_v48 = vld [vmem:[%s12147_s0 + $0x310] sm:$0x3] }
  0xaf   :  { %8065 = vmatprep.mubr.msk.f32.mxu0 %vm252_vm1, %v10006_v12  ;;  %v1141_v7 = vrot.slane %v12553_v27, 1  ;;  %v2012_v11 = vrot.slane %v12553_v27, 2  ;;  %12555 = vst [vmem:[#allocation19_spill] sm:$0xff] %v10044_v45  ;;  %v2014_v12 = vrot.slane %v110_v24, 2  ;;  %12556 = vst [vmem:[#allocation113_spill] sm:$0xff] %v10049_v47  ;;  %v2016_v24 = vrot.slane %v12558_v34, 2 }
  0xb0   :  { %v1148_v0 = vrot.slane %v113_v48, 1 }
  0xb1   :  { %7968 = vmatmul.mubr.msk.f32.gmra.mxu1 %vm252_vm1, %v10017_v36  ;;  %v10052_v27 = vsel %vm994_vm2, %v1140_v43, %v1141_v7  ;;  %v1145_v36 = vrot.slane %v12558_v34, 1  ;;  %v10060_v57 = vsel %vm1865_vm3, %v2011_v37, %v2012_v11  ;;  %v10071_v16 = vsel %vm994_vm2, %v1141_v7, %v1143_v26  ;;  %v12564_v34 = vld [vmem:[#allocation22_spill] sm:$0xff]  ;;  %v116_v7 = vld [vmem:[%s12147_s0 + $0x328] sm:$0x3] }
  0xb2   :  { %8066 = vmatmul.mubr.msk.f32.gmra.mxu0 %vm252_vm1, %v10020_v44  ;;  %7970 = vmatprep.mubr.msk.f32.mxu1 %vm252_vm1, %v10025_v15  ;;  %12557 = vst [vmem:[#allocation114_spill] sm:$0xff] %v10052_v27  ;;  %v12559_v44 = vld [vmem:[#allocation21_spill] sm:$0xff]  ;;  %12560 = vst [vmem:[#allocation20_spill] sm:$0xff] %v10060_v57  ;;  %v10074_v43 = vsel %vm1865_vm3, %v2012_v11, %v2014_v12  ;;  %v2019_v37 = vrot.slane %v113_v48, 2  ;;  %v2021_v12 = vrot.slane %v12564_v34, 2  ;;  %v1153_v48 = vrot.slane %v116_v7, 1 }
  0xb3   :  { %8068 = vmatprep.mubr.msk.f32.mxu0 %vm252_vm1, %v10033_v60  ;;  %v1146_v18 = vrot.slane %v12559_v44, 1  ;;  %v2017_v60 = vrot.slane %v12559_v44, 2  ;;  %12561 = vst [vmem:[#allocation21_spill] sm:$0xff] %v10071_v16  ;;  %12562 = vst [vmem:[#allocation115_spill] sm:$0xff] %v10074_v43 }
  0xb5   :  { %7971 = vmatmul.mubr.msk.f32.gmra.mxu1 %vm252_vm1, %v10044_v45  ;;  %v10079_v44 = vsel %vm994_vm2, %v1145_v36, %v1146_v18  ;;  %v1150_v45 = vrot.slane %v12564_v34, 1  ;;  %v10087_v26 = vsel %vm1865_vm3, %v2016_v24, %v2017_v60  ;;  %v10098_v36 = vsel %vm994_vm2, %v1146_v18, %v1148_v0  ;;  %v8674_v0 = vld [vmem:[%s12147_s0 + $0x20] sm:$0xff] }
  0xb6   :  { %8069 = vmatmul.mubr.msk.f32.gmra.mxu0 %vm252_vm1, %v10049_v47  ;;  %7973 = vmatprep.mubr.msk.f32.mxu1 %vm252_vm1, %v10052_v27  ;;  %12563 = vst [vmem:[#allocation116_spill] sm:$0xff] %v10079_v44  ;;  %v12565_v47 = vld [vmem:[#allocation23_spill] sm:$0xff]  ;;  %12566 = vst [vmem:[#allocation22_spill] sm:$0xff] %v10087_v26  ;;  %v10103_v24 = vsel %vm1865_vm3, %v2017_v60, %v2019_v37  ;;  %v2024_v34 = vrot.slane %v116_v7, 2 }
  0xb7   :  { %8071 = vmatprep.mubr.msk.f32.mxu0 %vm252_vm1, %v10060_v57  ;;  %v1151_v15 = vrot.slane %v12565_v47, 1  ;;  %v2022_v11 = vrot.slane %v12565_v47, 2  ;;  %12567 = vst [vmem:[#allocation23_spill] sm:$0xff] %v10098_v36  ;;  %12568 = vst [vmem:[#allocation117_spill] sm:$0xff] %v10103_v24 }
  0xb9   :  { %7974 = vmatmul.mubr.msk.f32.gmra.mxu1 %vm252_vm1, %v10071_v16  ;;  %v10106_v47 = vsel %vm994_vm2, %v1150_v45, %v1151_v15  ;;  %v10109_v57 = vsel %vm1865_vm3, %v2021_v12, %v2022_v11  ;;  %v10118_v18 = vsel %vm994_vm2, %v1151_v15, %v1153_v48  ;;  %v10123_v60 = vsel %vm1865_vm3, %v2022_v11, %v2024_v34  ;;  %v8673_v45 = vld [vmem:[%s12147_s0 + $0x18] sm:$0xff]  ;;  %v10157_v12 = vld [vmem:[%s12147_s0 + $0x30] sm:$0xff]  ;;  %v10192_v34 = vld [vmem:[%s12147_s0 + $0x48] sm:$0xff] }
  0xba   :  { %8072 = vmatmul.mubr.msk.f32.gmra.mxu0 %vm252_vm1, %v10074_v43  ;;  %7976 = vmatprep.mubr.msk.f32.mxu1 %vm252_vm1, %v10079_v44  ;;  %12569 = vst [vmem:[#allocation118_spill] sm:$0xff] %v10106_v47  ;;  %12570 = vst [vmem:[#allocation119_spill] sm:$0xff] %v10109_v57  ;;  %v10179_v48 = vld [vmem:[%s12147_s0 + $0x38] sm:$0xff] }
  0xbb   :  { %8074 = vmatprep.mubr.msk.f32.mxu0 %vm252_vm1, %v10087_v26  ;;  %12571 = vst [vmem:[#allocation120_spill] sm:$0xff] %v10118_v18  ;;  %12572 = vst [vmem:[#allocation121_spill] sm:$0xff] %v10123_v60 }
  0xbc   :  { %12575 = vst [vmem:[#allocation124_spill] sm:$0xff] %v10192_v34 }
  0xbd   :  { %7977 = vmatmul.mubr.msk.f32.gmra.mxu1 %vm252_vm1, %v10098_v36 }
  0xbe   :  { %8075 = vmatmul.mubr.msk.f32.gmra.mxu0 %vm252_vm1, %v10103_v24  ;;  %7979 = vmatprep.mubr.msk.f32.mxu1 %vm252_vm1, %v10106_v47 }
  0xbf   :  { %8077 = vmatprep.mubr.msk.f32.mxu0 %vm252_vm1, %v10109_v57 }
  0xc1   :  { %7980 = vmatmul.mubr.msk.f32.gmra.mxu1 %vm252_vm1, %v10118_v18 }
  0xc2   :  { %8078 = vmatmul.mubr.msk.f32.gmra.mxu0 %vm252_vm1, %v10123_v60  ;;  %8082 = vmatprep.mubr.msk.f32.mxu1 %vm252_vm1, %v8673_v45 }
  0xc3   :  { %8180 = vmatprep.mubr.msk.f32.mxu0 %vm252_vm1, %v9297_v39  ;;  %v10150_v39 = vld [vmem:[%s12148_s1 + $0x1c] sm:$0xf] }
  0xc5   :  { %v10135_v15 = vpop.f32.mrf.mxu1  ;;  %8083 = vmatmul.mubr.msk.f32.vlgmr.msra.gmra.mxu1 %vm252_vm1, %v8674_v0 }
  0xc6   :  { %v10141_v37 = vpop.f32.mrf.mxu0  ;;  %8181 = vmatmul.mubr.msk.f32.vlgmr.msra.gmra.mxu0 %vm252_vm1, %v9314_v51  ;;  %8277 = vmatpush3.msk.msra.mxu1 %vm445_vm0, %v9308_v53  ;;  %v10172_v53 = vld [vmem:[%s12148_s1 + $0x20] sm:$0xf] }
  0xc7   :  { %v10152_v7 = vpop.f32.mrf.mxu1  ;;  %8085 = vmatprep.mubr.msk.f32.mxu1 %vm252_vm1, %v10157_v12  ;;  %8375 = vmatpush3.msk.msra.mxu0 %vm445_vm0, %v9334_v6 }
  0xc8   :  { %12573 = vst [vmem:[#allocation122_spill] sm:$0xff] %v10152_v7  ;;  %v10163_v51 = vpop.f32.mrf.mxu0  ;;  %8183 = vmatprep.mubr.msk.f32.mxu0 %vm252_vm1, %v9325_v41  ;;  %8472 = vmatprep.subr.msk.mxu1 %vm445_vm0, %v10150_v39  ;;  %v10540_v7 = vld [vmem:[%s12147_s0 + $0x170] sm:$0xff] }
  0xc9   :  { %v10174_v11 = vpop.f32.mrf.mxu1  ;;  %8086 = vmatmul.mubr.msk.f32.gmra.mxu1 %vm252_vm1, %v10179_v48  ;;  %8570 = vmatprep.subr.msk.mxu0 %vm445_vm0, %v10172_v53  ;;  %12629 = vst [vmem:[#allocation178_spill] sm:$0xff] %v10540_v7 }
  0xca   :  { %12574 = vst [vmem:[#allocation123_spill] sm:$0xff] %v10174_v11  ;;  %v10185_v6 = vpop.f32.mrf.mxu0  ;;  %8184 = vmatmul.mubr.msk.f32.gmra.mxu0 %vm252_vm1, %v9354_v5  ;;  %8088 = vmatprep.mubr.msk.f32.mxu1 %vm252_vm1, %v10192_v34  ;;  %v10207_v5 = vld [vmem:[%s12147_s0 + $0x50] sm:$0xff] }
  0xcb   :  { %v10196_v45 = vpop.f32.mrf.mxu1  ;;  %8186 = vmatprep.mubr.msk.f32.mxu0 %vm252_vm1, %v9363_v63  ;;  %12578 = vst [vmem:[#allocation127_spill] sm:$0xff] %v10207_v5  ;;  %v10218_v63 = vld [vmem:[%s12147_s0 + $0x60] sm:$0xff] }
  0xcc   :  { %12576 = vst [vmem:[#allocation125_spill] sm:$0xff] %v10196_v45  ;;  %v10200_v0 = vpop.f32.mrf.mxu0  ;;  %12579 = vst [vmem:[#allocation128_spill] sm:$0xff] %v10218_v63 }
  0xcd   :  { %v10202_v41 = vpop.f32.mrf.mxu1  ;;  %8089 = vmatmul.mubr.msk.f32.gmra.mxu1 %vm252_vm1, %v10207_v5 }
  0xce   :  { %12577 = vst [vmem:[#allocation126_spill] sm:$0xff] %v10202_v41  ;;  %v10211_v60 = vpop.f32.mrf.mxu0  ;;  %8187 = vmatmul.mubr.msk.f32.gmra.mxu0 %vm252_vm1, %v9381_v9  ;;  %8091 = vmatprep.mubr.msk.f32.mxu1 %vm252_vm1, %v10218_v63  ;;  %v10233_v9 = vld [vmem:[%s12147_s0 + $0x68] sm:$0xff] }
  0xcf   :  { %v10222_v57 = vpop.f32.mrf.mxu1  ;;  %8189 = vmatprep.mubr.msk.f32.mxu0 %vm252_vm1, %v9390_v25  ;;  %12582 = vst [vmem:[#allocation131_spill] sm:$0xff] %v10233_v9  ;;  %v10244_v25 = vld [vmem:[%s12147_s0 + $0x78] sm:$0xff] }
  0xd0   :  { %12580 = vst [vmem:[#allocation129_spill] sm:$0xff] %v10222_v57  ;;  %v10226_v24 = vpop.f32.mrf.mxu0  ;;  %12583 = vst [vmem:[#allocation132_spill] sm:$0xff] %v10244_v25 }
  0xd1   :  { %v10228_v26 = vpop.f32.mrf.mxu1  ;;  %8092 = vmatmul.mubr.msk.f32.gmra.mxu1 %vm252_vm1, %v10233_v9 }
  0xd2   :  { %12581 = vst [vmem:[#allocation130_spill] sm:$0xff] %v10228_v26  ;;  %v10237_v43 = vpop.f32.mrf.mxu0  ;;  %8190 = vmatmul.mubr.msk.f32.gmra.mxu0 %vm252_vm1, %v9408_v2  ;;  %8094 = vmatprep.mubr.msk.f32.mxu1 %vm252_vm1, %v10244_v25  ;;  %v10259_v2 = vld [vmem:[%s12147_s0 + $0x80] sm:$0xff] }
  0xd3   :  { %v10248_v26 = vpop.f32.mrf.mxu1  ;;  %8192 = vmatprep.mubr.msk.f32.mxu0 %vm252_vm1, %v9417_v31  ;;  %12586 = vst [vmem:[#allocation135_spill] sm:$0xff] %v10259_v2  ;;  %v10270_v31 = vld [vmem:[%s12147_s0 + $0x90] sm:$0xff] }
  0xd4   :  { %12584 = vst [vmem:[#allocation133_spill] sm:$0xff] %v10248_v26  ;;  %v10252_v57 = vpop.f32.mrf.mxu0  ;;  %12587 = vst [vmem:[#allocation136_spill] sm:$0xff] %v10270_v31 }
  0xd5   :  { %v10254_v9 = vpop.f32.mrf.mxu1  ;;  %8095 = vmatmul.mubr.msk.f32.gmra.mxu1 %vm252_vm1, %v10259_v2 }
  0xd6   :  { %12585 = vst [vmem:[#allocation134_spill] sm:$0xff] %v10254_v9  ;;  %v10263_v41 = vpop.f32.mrf.mxu0  ;;  %8193 = vmatmul.mubr.msk.f32.gmra.mxu0 %vm252_vm1, %v9435_v35  ;;  %8097 = vmatprep.mubr.msk.f32.mxu1 %vm252_vm1, %v10270_v31  ;;  %v10285_v35 = vld [vmem:[%s12147_s0 + $0x98] sm:$0xff] }
  0xd7   :  { %v10274_v9 = vpop.f32.mrf.mxu1  ;;  %8195 = vmatprep.mubr.msk.f32.mxu0 %vm252_vm1, %v9444_v38  ;;  %12590 = vst [vmem:[#allocation139_spill] sm:$0xff] %v10285_v35  ;;  %v10296_v38 = vld [vmem:[%s12147_s0 + $0xa8] sm:$0xff] }
  0xd8   :  { %12588 = vst [vmem:[#allocation137_spill] sm:$0xff] %v10274_v9  ;;  %v10278_v26 = vpop.f32.mrf.mxu0  ;;  %12591 = vst [vmem:[#allocation140_spill] sm:$0xff] %v10296_v38 }
  0xd9   :  { %v10280_v2 = vpop.f32.mrf.mxu1  ;;  %8098 = vmatmul.mubr.msk.f32.gmra.mxu1 %vm252_vm1, %v10285_v35 }
  0xda   :  { %12589 = vst [vmem:[#allocation138_spill] sm:$0xff] %v10280_v2  ;;  %v10289_v25 = vpop.f32.mrf.mxu0  ;;  %8196 = vmatmul.mubr.msk.f32.gmra.mxu0 %vm252_vm1, %v9462_v28  ;;  %8100 = vmatprep.mubr.msk.f32.mxu1 %vm252_vm1, %v10296_v38  ;;  %v10311_v28 = vld [vmem:[%s12147_s0 + $0xb0] sm:$0xff] }
  0xdb   :  { %v10300_v2 = vpop.f32.mrf.mxu1  ;;  %8198 = vmatprep.mubr.msk.f32.mxu0 %vm252_vm1, %v9471_v42  ;;  %12594 = vst [vmem:[#allocation143_spill] sm:$0xff] %v10311_v28  ;;  %v10322_v42 = vld [vmem:[%s12147_s0 + $0xc0] sm:$0xff] }
  0xdc   :  { %12592 = vst [vmem:[#allocation141_spill] sm:$0xff] %v10300_v2  ;;  %v10304_v9 = vpop.f32.mrf.mxu0  ;;  %12595 = vst [vmem:[#allocation144_spill] sm:$0xff] %v10322_v42 }
  0xdd   :  { %v10306_v35 = vpop.f32.mrf.mxu1  ;;  %8101 = vmatmul.mubr.msk.f32.gmra.mxu1 %vm252_vm1, %v10311_v28 }
  0xde   :  { %12593 = vst [vmem:[#allocation142_spill] sm:$0xff] %v10306_v35  ;;  %v10315_v31 = vpop.f32.mrf.mxu0  ;;  %8199 = vmatmul.mubr.msk.f32.gmra.mxu0 %vm252_vm1, %v9489_v19  ;;  %8103 = vmatprep.mubr.msk.f32.mxu1 %vm252_vm1, %v10322_v42  ;;  %v10337_v19 = vld [vmem:[%s12147_s0 + $0xc8] sm:$0xff] }
  0xdf   :  { %v10326_v35 = vpop.f32.mrf.mxu1  ;;  %8201 = vmatprep.mubr.msk.f32.mxu0 %vm252_vm1, %v9498_v46  ;;  %12598 = vst [vmem:[#allocation147_spill] sm:$0xff] %v10337_v19  ;;  %v10348_v46 = vld [vmem:[%s12147_s0 + $0xd8] sm:$0xff] }
  0xe0   :  { %12596 = vst [vmem:[#allocation145_spill] sm:$0xff] %v10326_v35  ;;  %v10330_v2 = vpop.f32.mrf.mxu0  ;;  %12599 = vst [vmem:[#allocation148_spill] sm:$0xff] %v10348_v46 }
  0xe1   :  { %v10332_v28 = vpop.f32.mrf.mxu1  ;;  %8104 = vmatmul.mubr.msk.f32.gmra.mxu1 %vm252_vm1, %v10337_v19 }
  0xe2   :  { %12597 = vst [vmem:[#allocation146_spill] sm:$0xff] %v10332_v28  ;;  %v10341_v38 = vpop.f32.mrf.mxu0  ;;  %8202 = vmatmul.mubr.msk.f32.gmra.mxu0 %vm252_vm1, %v9516_v17  ;;  %8106 = vmatprep.mubr.msk.f32.mxu1 %vm252_vm1, %v10348_v46  ;;  %v10363_v17 = vld [vmem:[%s12147_s0 + $0xe0] sm:$0xff] }
  0xe3   :  { %v10352_v28 = vpop.f32.mrf.mxu1  ;;  %8204 = vmatprep.mubr.msk.f32.mxu0 %vm252_vm1, %v9525_v50  ;;  %12602 = vst [vmem:[#allocation151_spill] sm:$0xff] %v10363_v17  ;;  %v10374_v50 = vld [vmem:[%s12147_s0 + $0xf0] sm:$0xff] }
  0xe4   :  { %12600 = vst [vmem:[#allocation149_spill] sm:$0xff] %v10352_v28  ;;  %v10356_v35 = vpop.f32.mrf.mxu0  ;;  %12603 = vst [vmem:[#allocation152_spill] sm:$0xff] %v10374_v50 }
  0xe5   :  { %v10358_v19 = vpop.f32.mrf.mxu1  ;;  %8107 = vmatmul.mubr.msk.f32.gmra.mxu1 %vm252_vm1, %v10363_v17 }
  0xe6   :  { %12601 = vst [vmem:[#allocation150_spill] sm:$0xff] %v10358_v19  ;;  %v10367_v42 = vpop.f32.mrf.mxu0  ;;  %8205 = vmatmul.mubr.msk.f32.gmra.mxu0 %vm252_vm1, %v9543_v21  ;;  %8109 = vmatprep.mubr.msk.f32.mxu1 %vm252_vm1, %v10374_v50  ;;  %v10389_v21 = vld [vmem:[%s12147_s0 + $0xf8] sm:$0xff] }
  0xe7   :  { %v10378_v19 = vpop.f32.mrf.mxu1  ;;  %8207 = vmatprep.mubr.msk.f32.mxu0 %vm252_vm1, %v9552_v54  ;;  %12606 = vst [vmem:[#allocation155_spill] sm:$0xff] %v10389_v21  ;;  %v10400_v54 = vld [vmem:[%s12147_s0 + $0x108] sm:$0xff] }
  0xe8   :  { %12604 = vst [vmem:[#allocation153_spill] sm:$0xff] %v10378_v19  ;;  %v10382_v28 = vpop.f32.mrf.mxu0  ;;  %12607 = vst [vmem:[#allocation156_spill] sm:$0xff] %v10400_v54 }
  0xe9   :  { %v10384_v17 = vpop.f32.mrf.mxu1  ;;  %8110 = vmatmul.mubr.msk.f32.gmra.mxu1 %vm252_vm1, %v10389_v21 }
  0xea   :  { %12605 = vst [vmem:[#allocation154_spill] sm:$0xff] %v10384_v17  ;;  %v10393_v46 = vpop.f32.mrf.mxu0  ;;  %8208 = vmatmul.mubr.msk.f32.gmra.mxu0 %vm252_vm1, %v9570_v59  ;;  %8112 = vmatprep.mubr.msk.f32.mxu1 %vm252_vm1, %v10400_v54  ;;  %v10415_v59 = vld [vmem:[%s12147_s0 + $0x110] sm:$0xff] }
  0xeb   :  { %v10404_v17 = vpop.f32.mrf.mxu1  ;;  %8210 = vmatprep.mubr.msk.f32.mxu0 %vm252_vm1, %v9579_v58  ;;  %12610 = vst [vmem:[#allocation159_spill] sm:$0xff] %v10415_v59  ;;  %v10426_v58 = vld [vmem:[%s12147_s0 + $0x120] sm:$0xff] }
  0xec   :  { %12608 = vst [vmem:[#allocation157_spill] sm:$0xff] %v10404_v17  ;;  %v10408_v19 = vpop.f32.mrf.mxu0  ;;  %12611 = vst [vmem:[#allocation160_spill] sm:$0xff] %v10426_v58 }
  0xed   :  { %v10410_v21 = vpop.f32.mrf.mxu1  ;;  %8113 = vmatmul.mubr.msk.f32.gmra.mxu1 %vm252_vm1, %v10415_v59 }
  0xee   :  { %12609 = vst [vmem:[#allocation158_spill] sm:$0xff] %v10410_v21  ;;  %v10419_v50 = vpop.f32.mrf.mxu0  ;;  %8211 = vmatmul.mubr.msk.f32.gmra.mxu0 %vm252_vm1, %v9597_v61  ;;  %8115 = vmatprep.mubr.msk.f32.mxu1 %vm252_vm1, %v10426_v58  ;;  %v10441_v61 = vld [vmem:[%s12147_s0 + $0x128] sm:$0xff] }
  0xef   :  { %v10430_v21 = vpop.f32.mrf.mxu1  ;;  %8213 = vmatprep.mubr.msk.f32.mxu0 %vm252_vm1, %v9606_v62  ;;  %12614 = vst [vmem:[#allocation163_spill] sm:$0xff] %v10441_v61  ;;  %v10452_v62 = vld [vmem:[%s12147_s0 + $0x138] sm:$0xff] }
  0xf0   :  { %12612 = vst [vmem:[#allocation161_spill] sm:$0xff] %v10430_v21  ;;  %v10434_v17 = vpop.f32.mrf.mxu0  ;;  %12615 = vst [vmem:[#allocation164_spill] sm:$0xff] %v10452_v62 }
  0xf1   :  { %v10436_v59 = vpop.f32.mrf.mxu1  ;;  %8116 = vmatmul.mubr.msk.f32.gmra.mxu1 %vm252_vm1, %v10441_v61 }
  0xf2   :  { %12613 = vst [vmem:[#allocation162_spill] sm:$0xff] %v10436_v59  ;;  %v10445_v54 = vpop.f32.mrf.mxu0  ;;  %8214 = vmatmul.mubr.msk.f32.gmra.mxu0 %vm252_vm1, %v9624_v29  ;;  %8118 = vmatprep.mubr.msk.f32.mxu1 %vm252_vm1, %v10452_v62  ;;  %v10467_v29 = vld [vmem:[%s12147_s0 + $0x140] sm:$0xff] }
  0xf3   :  { %v10456_v59 = vpop.f32.mrf.mxu1  ;;  %8216 = vmatprep.mubr.msk.f32.mxu0 %vm252_vm1, %v9632_v4  ;;  %12618 = vst [vmem:[#allocation167_spill] sm:$0xff] %v10467_v29  ;;  %v10474_v62 = vld [vmem:[%s12147_s0 + $0x180] sm:$0xff]  ;;  %v10479_v4 = vld [vmem:[%s12147_s0 + $0x188] sm:$0xff] }
  0xf4   :  { %12616 = vst [vmem:[#allocation165_spill] sm:$0xff] %v10456_v59  ;;  %v10460_v21 = vpop.f32.mrf.mxu0  ;;  %12619 = vst [vmem:[#allocation168_spill] sm:$0xff] %v10479_v4  ;;  %v3332_v45 = vrot.slane %v10474_v62, 1  ;;  %v3333_v63 = vrot.slane %v10479_v4, 1 }
  0xf5   :  { %v10462_v61 = vpop.f32.mrf.mxu1  ;;  %8119 = vmatmul.mubr.msk.f32.gmra.mxu1 %vm252_vm1, %v10467_v29 }
  0xf6   :  { %12617 = vst [vmem:[#allocation166_spill] sm:$0xff] %v10462_v61  ;;  %v10481_v59 = vpop.f32.mrf.mxu0  ;;  %8217 = vmatmul.mubr.msk.f32.gmra.mxu0 %vm252_vm1, %v9651_v23  ;;  %v10488_v61 = vld [vmem:[%s12147_s0 + $0x150] sm:$0xff]  ;;  %v10533_v34 = vsel %vm994_vm2, %v3332_v45, %v3333_v63 }
  0xf7   :  { %12620 = vst [vmem:[#allocation169_spill] sm:$0xff] %v10488_v61  ;;  %8121 = vmatprep.mubr.msk.f32.mxu1 %vm252_vm1, %v10488_v61  ;;  %v10492_v29 = vpop.f32.mrf.mxu1  ;;  %8219 = vmatprep.mubr.msk.f32.mxu0 %vm252_vm1, %v9659_v1  ;;  %v10503_v23 = vld [vmem:[%s12147_s0 + $0x190] sm:$0x3]  ;;  %v10521_v61 = vld [vmem:[%s12147_s0 + $0x168] sm:$0xff]  ;;  %12627 = vst [vmem:[#allocation176_spill] sm:$0xff] %v10533_v34 }
  0xf8   :  { %12621 = vst [vmem:[#allocation170_spill] sm:$0xff] %v10492_v29  ;;  %v10496_v58 = vpop.f32.mrf.mxu0  ;;  %12622 = vst [vmem:[#allocation171_spill] sm:$0xff] %v10503_v23  ;;  %v10510_v29 = vld [vmem:[%s12147_s0 + $0x158] sm:$0xff] }
  0xf9   :  { %v10505_v5 = vpop.f32.mrf.mxu1  ;;  %12624 = vst [vmem:[#allocation173_spill] sm:$0xff] %v10510_v29  ;;  %8122 = vmatmul.mubr.msk.f32.gmra.mxu1 %vm252_vm1, %v10510_v29  ;;  %12625 = vst [vmem:[#allocation174_spill] sm:$0xff] %v10521_v61  ;;  %v3335_v29 = vrot.slane %v10503_v23, 1 }
  0xfa   :  { %12623 = vst [vmem:[#allocation172_spill] sm:$0xff] %v10505_v5  ;;  %v10514_v1 = vpop.f32.mrf.mxu0  ;;  %8220 = vmatmul.mubr.msk.f32.gmra.mxu0 %vm252_vm1, %v9678_v52  ;;  %8124 = vmatprep.mubr.msk.f32.mxu1 %vm252_vm1, %v10521_v61 }
  0xfb   :  { %v10525_v5 = vpop.f32.mrf.mxu1  ;;  %8222 = vmatprep.mubr.msk.f32.mxu0 %vm252_vm1, %v9686_v55  ;;  %v10555_v55 = vsel %vm994_vm2, %v3333_v63, %v3335_v29 }
  0xfc   :  { %12626 = vst [vmem:[#allocation175_spill] sm:$0xff] %v10525_v5  ;;  %v10530_v11 = vpop.f32.mrf.mxu0  ;;  %12631 = vst [vmem:[#allocation180_spill] sm:$0xff] %v10555_v55 }
  0xfd   :  { %v10535_v52 = vpop.f32.mrf.mxu1  ;;  %8125 = vmatmul.mubr.msk.f32.gmra.mxu1 %vm252_vm1, %v10540_v7 }
  0xfe   :  { %12628 = vst [vmem:[#allocation177_spill] sm:$0xff] %v10535_v52  ;;  %v10544_v5 = vpop.f32.mrf.mxu0  ;;  %8223 = vmatmul.mubr.msk.f32.gmra.mxu0 %vm252_vm1, %v9701_v33  ;;  %8127 = vmatprep.mubr.msk.f32.mxu1 %vm252_vm1, %v10474_v62  ;;  %v8703_v33 = vld [vmem:[%s12147_s0 + $0x1c8] sm:$0xff] }
  0xff   :  { %v10550_v45 = vpop.f32.mrf.mxu1  ;;  %8225 = vmatprep.mubr.msk.f32.mxu0 %vm252_vm1, %v10533_v34 }
 0x100   :  { %12630 = vst [vmem:[#allocation179_spill] sm:$0xff] %v10550_v45  ;;  %v10557_v52 = vpop.f32.mrf.mxu0 }
 0x101   :  { %v10559_v23 = vpop.f32.mrf.mxu1  ;;  %8128 = vmatmul.mubr.msk.f32.gmra.mxu1 %vm252_vm1, %v10479_v4 }
 0x102   :  { %12632 = vst [vmem:[#allocation181_spill] sm:$0xff] %v10559_v23  ;;  %v10563_v7 = vpop.f32.mrf.mxu0  ;;  %8226 = vmatmul.mubr.msk.f32.gmra.mxu0 %vm252_vm1, %v10555_v55  ;;  %8130 = vmatprep.mubr.msk.f32.mxu1 %vm252_vm1, %v8703_v33  ;;  %v8704_v23 = vld [vmem:[%s12147_s0 + $0x1d0] sm:$0xff]  ;;  %v10587_v33 = vld [vmem:[%s12147_s0 + $0x1e0] sm:$0xff] }
 0x103   :  { %v10571_v63 = vpop.f32.mrf.mxu1  ;;  %8228 = vmatprep.mubr.msk.f32.mxu0 %vm252_vm1, %v9730_v40  ;;  %12634 = vst [vmem:[#allocation183_spill] sm:$0xff] %v10587_v33 }
 0x104   :  { %12633 = vst [vmem:[#allocation182_spill] sm:$0xff] %v10571_v63  ;;  %v10575_v29 = vpop.f32.mrf.mxu0 }
 0x105   :  { %v7888_v34 = vpop.f32.mrf.mxu1  ;;  %8131 = vmatmul.mubr.msk.f32.gmra.mxu1 %vm252_vm1, %v8704_v23 }
 0x106   :  { %v1738_v55 = vadd.f32 %v7888_v34, %v10141_v37  ;;  %v7986_v45 = vpop.f32.mrf.mxu0  ;;  %8229 = vmatmul.mubr.msk.f32.gmra.mxu0 %vm252_vm1, %v9747_v56  ;;  %8133 = vmatprep.mubr.msk.f32.mxu1 %vm252_vm1, %v10587_v33  ;;  %v10599_v56 = vld [vmem:[%s12147_s0 + $0x1e8] sm:$0xff] }
 0x107   :  { %v1418_v40 = vpop.f32.mrf.mxu1  ;;  %8231 = vmatprep.mubr.msk.f32.mxu0 %vm252_vm1, %v9755_v13 }
 0x108   :  { %v10593_v63 = vadd.f32 %v7986_v45, %v1738_v55  ;;  %v1737_v23 = vadd.f32 %v1418_v40, %v10163_v51  ;;  %v2289_v37 = vpop.f32.mrf.mxu0  ;;  %v10611_v55 = vld [vmem:[%s12147_s0 + $0x1f8] sm:$0xff] }
 0x109   :  { %v7891_v34 = vpop.f32.mrf.mxu1  ;;  %8134 = vmatmul.mubr.msk.f32.gmra.mxu1 %vm252_vm1, %v10599_v56 }
 0x10a   :  { %v10603_v4 = vadd.f32 %v2289_v37, %v1737_v23  ;;  %v1740_v33 = vadd.f32 %v7891_v34, %v10185_v6  ;;  %v7989_v61 = vpop.f32.mrf.mxu0  ;;  %8232 = vmatmul.mubr.msk.f32.gmra.mxu0 %vm252_vm1, %v9774_v49  ;;  %8136 = vmatprep.mubr.msk.f32.mxu1 %vm252_vm1, %v10611_v55  ;;  %v10623_v37 = vld [vmem:[%s12147_s0 + $0x200] sm:$0xff] }
 0x10b   :  { %v1428_v51 = vpop.f32.mrf.mxu1  ;;  %8234 = vmatprep.mubr.msk.f32.mxu0 %vm252_vm1, %v9782_v20 }
 0x10c   :  { %v10617_v45 = vadd.f32 %v7989_v61, %v1740_v33  ;;  %v1739_v6 = vadd.f32 %v1428_v51, %v10200_v0  ;;  %v2299_v40 = vpop.f32.mrf.mxu0  ;;  %v10635_v61 = vld [vmem:[%s12147_s0 + $0x210] sm:$0xff] }
 0x10d   :  { %v7894_v23 = vpop.f32.mrf.mxu1  ;;  %8137 = vmatmul.mubr.msk.f32.gmra.mxu1 %vm252_vm1, %v10623_v37 }
 0x10e   :  { %v10627_v34 = vadd.f32 %v2299_v40, %v1739_v6  ;;  %v1742_v49 = vadd.f32 %v7894_v23, %v10211_v60  ;;  %v7992_v13 = vpop.f32.mrf.mxu0  ;;  %8235 = vmatmul.mubr.msk.f32.gmra.mxu0 %vm252_vm1, %v9801_v3  ;;  %8139 = vmatprep.mubr.msk.f32.mxu1 %vm252_vm1, %v10635_v61  ;;  %v10647_v40 = vld [vmem:[%s12147_s0 + $0x218] sm:$0xff] }
 0x10f   :  { %v1438_v0 = vpop.f32.mrf.mxu1  ;;  %8237 = vmatprep.mubr.msk.f32.mxu0 %vm252_vm1, %v9809_v22 }
 0x110   :  { %v10641_v33 = vadd.f32 %v7992_v13, %v1742_v49  ;;  %v1741_v60 = vadd.f32 %v1438_v0, %v10226_v24  ;;  %v2309_v51 = vpop.f32.mrf.mxu0  ;;  %v10659_v13 = vld [vmem:[%s12147_s0 + $0x228] sm:$0xff] }
 0x111   :  { %v7897_v6 = vpop.f32.mrf.mxu1  ;;  %8140 = vmatmul.mubr.msk.f32.gmra.mxu1 %vm252_vm1, %v10647_v40 }
 0x112   :  { %v10651_v23 = vadd.f32 %v2309_v51, %v1741_v60  ;;  %v1744_v3 = vadd.f32 %v7897_v6, %v10237_v43  ;;  %v7995_v20 = vpop.f32.mrf.mxu0  ;;  %8238 = vmatmul.mubr.msk.f32.gmra.mxu0 %vm252_vm1, %v9828_v14  ;;  %8142 = vmatprep.mubr.msk.f32.mxu1 %vm252_vm1, %v10659_v13  ;;  %v10671_v51 = vld [vmem:[%s12147_s0 + $0x230] sm:$0xff] }
 0x113   :  { %v1448_v49 = vpop.f32.mrf.mxu1  ;;  %8240 = vmatprep.mubr.msk.f32.mxu0 %vm252_vm1, %v9836_v30 }
 0x114   :  { %v10665_v24 = vadd.f32 %v7995_v20, %v1744_v3  ;;  %v1743_v43 = vadd.f32 %v1448_v49, %v10252_v57  ;;  %v2319_v0 = vpop.f32.mrf.mxu0  ;;  %v10683_v20 = vld [vmem:[%s12147_s0 + $0x240] sm:$0xff] }
 0x115   :  { %v7900_v60 = vpop.f32.mrf.mxu1  ;;  %8143 = vmatmul.mubr.msk.f32.gmra.mxu1 %vm252_vm1, %v10671_v51 }
 0x116   :  { %v10675_v6 = vadd.f32 %v2319_v0, %v1743_v43  ;;  %v1746_v14 = vadd.f32 %v7900_v60, %v10263_v41  ;;  %v7998_v22 = vpop.f32.mrf.mxu0  ;;  %8241 = vmatmul.mubr.msk.f32.gmra.mxu0 %vm252_vm1, %v9855_v10  ;;  %8145 = vmatprep.mubr.msk.f32.mxu1 %vm252_vm1, %v10683_v20  ;;  %v10695_v0 = vld [vmem:[%s12147_s0 + $0x248] sm:$0xff] }
 0x117   :  { %v1458_v3 = vpop.f32.mrf.mxu1  ;;  %8243 = vmatprep.mubr.msk.f32.mxu0 %vm252_vm1, %v9863_v32 }
 0x118   :  { %v10689_v57 = vadd.f32 %v7998_v22, %v1746_v14  ;;  %v1745_v41 = vadd.f32 %v1458_v3, %v10278_v26  ;;  %v2329_v49 = vpop.f32.mrf.mxu0  ;;  %v10707_v22 = vld [vmem:[%s12147_s0 + $0x258] sm:$0xff]  ;;  %v12636_v26 = vld [vmem:[#allocation102_spill] sm:$0xff] }
 0x119   :  { %v7903_v43 = vpop.f32.mrf.mxu1  ;;  %8146 = vmatmul.mubr.msk.f32.gmra.mxu1 %vm252_vm1, %v10695_v0 }
 0x11a   :  { %v10699_v60 = vadd.f32 %v2329_v49, %v1745_v41  ;;  %v1748_v10 = vadd.f32 %v7903_v43, %v10289_v25  ;;  %v8001_v30 = vpop.f32.mrf.mxu0  ;;  %8244 = vmatmul.mubr.msk.f32.gmra.mxu0 %vm252_vm1, %v9882_v8  ;;  %8148 = vmatprep.mubr.msk.f32.mxu1 %vm252_vm1, %v10707_v22  ;;  %v10719_v43 = vld [vmem:[%s12147_s0 + $0x260] sm:$0xff] }
 0x11b   :  { %v1468_v14 = vpop.f32.mrf.mxu1  ;;  %8246 = vmatprep.mubr.msk.f32.mxu0 %vm252_vm1, %v12636_v26  ;;  %v12638_v26 = vld [vmem:[#allocation9_spill] sm:$0xff] }
 0x11c   :  { %12635 = vst [vmem:[#allocation184_spill] sm:$0xff] %v10699_v60  ;;  %v10713_v3 = vadd.f32 %v8001_v30, %v1748_v10  ;;  %v1747_v25 = vadd.f32 %v1468_v14, %v10304_v9  ;;  %v2339_v41 = vpop.f32.mrf.mxu0  ;;  %v10731_v9 = vld [vmem:[%s12147_s0 + $0x270] sm:$0xff] }
 0x11d   :  { %v7906_v49 = vpop.f32.mrf.mxu1  ;;  %8149 = vmatmul.mubr.msk.f32.gmra.mxu1 %vm252_vm1, %v10719_v43  ;;  %12639 = vst [vmem:[#allocation186_spill] sm:$0xff] %v10731_v9  ;;  %v12640_v10 = vld [vmem:[#allocation104_spill] sm:$0xff] }
 0x11e   :  { %v10723_v8 = vadd.f32 %v2339_v41, %v1747_v25  ;;  %v1750_v32 = vadd.f32 %v7906_v49, %v10315_v31  ;;  %v8004_v60 = vpop.f32.mrf.mxu0  ;;  %8247 = vmatmul.mubr.msk.f32.gmra.mxu0 %vm252_vm1, %v12638_v26  ;;  %8151 = vmatprep.mubr.msk.f32.mxu1 %vm252_vm1, %v10731_v9  ;;  %v10743_v49 = vld [vmem:[%s12147_s0 + $0x278] sm:$0xff] }
 0x11f   :  { %v1478_v30 = vpop.f32.mrf.mxu1  ;;  %8249 = vmatprep.mubr.msk.f32.mxu0 %vm252_vm1, %v12640_v10  ;;  %v12642_v10 = vld [vmem:[#allocation11_spill] sm:$0xff] }
 0x120   :  { %12637 = vst [vmem:[#allocation185_spill] sm:$0xff] %v10723_v8  ;;  %v10737_v14 = vadd.f32 %v8004_v60, %v1750_v32  ;;  %v1749_v31 = vadd.f32 %v1478_v30, %v10330_v2  ;;  %v2349_v25 = vpop.f32.mrf.mxu0  ;;  %v10755_v2 = vld [vmem:[%s12147_s0 + $0x288] sm:$0xff]  ;;  %v12644_v60 = vld [vmem:[#allocation106_spill] sm:$0xff] }
 0x121   :  { %v7909_v41 = vpop.f32.mrf.mxu1  ;;  %8152 = vmatmul.mubr.msk.f32.gmra.mxu1 %vm252_vm1, %v10743_v49  ;;  %12643 = vst [vmem:[#allocation188_spill] sm:$0xff] %v10755_v2 }
 0x122   :  { %v10747_v26 = vadd.f32 %v2349_v25, %v1749_v31  ;;  %v1752_v8 = vadd.f32 %v7909_v41, %v10341_v38  ;;  %v8007_v9 = vpop.f32.mrf.mxu0  ;;  %8250 = vmatmul.mubr.msk.f32.gmra.mxu0 %vm252_vm1, %v12642_v10  ;;  %8154 = vmatprep.mubr.msk.f32.mxu1 %vm252_vm1, %v10755_v2  ;;  %v10767_v41 = vld [vmem:[%s12147_s0 + $0x290] sm:$0xff] }
 0x123   :  { %v1488_v32 = vpop.f32.mrf.mxu1  ;;  %8252 = vmatprep.mubr.msk.f32.mxu0 %vm252_vm1, %v12644_v60  ;;  %v12646_v60 = vld [vmem:[#allocation13_spill] sm:$0xff] }
 0x124   :  { %12641 = vst [vmem:[#allocation187_spill] sm:$0xff] %v10747_v26  ;;  %v10761_v30 = vadd.f32 %v8007_v9, %v1752_v8  ;;  %v1751_v38 = vadd.f32 %v1488_v32, %v10356_v35  ;;  %v2359_v31 = vpop.f32.mrf.mxu0  ;;  %v10779_v35 = vld [vmem:[%s12147_s0 + $0x2a0] sm:$0xff]  ;;  %v12648_v9 = vld [vmem:[#allocation108_spill] sm:$0xff] }
 0x125   :  { %v7912_v25 = vpop.f32.mrf.mxu1  ;;  %8155 = vmatmul.mubr.msk.f32.gmra.mxu1 %vm252_vm1, %v10767_v41  ;;  %12647 = vst [vmem:[#allocation190_spill] sm:$0xff] %v10779_v35 }
 0x126   :  { %v10771_v10 = vadd.f32 %v2359_v31, %v1751_v38  ;;  %v1754_v26 = vadd.f32 %v7912_v25, %v10367_v42  ;;  %v8010_v2 = vpop.f32.mrf.mxu0  ;;  %8253 = vmatmul.mubr.msk.f32.gmra.mxu0 %vm252_vm1, %v12646_v60  ;;  %8157 = vmatprep.mubr.msk.f32.mxu1 %vm252_vm1, %v10779_v35  ;;  %v10791_v25 = vld [vmem:[%s12147_s0 + $0x2a8] sm:$0xff] }
 0x127   :  { %v1498_v8 = vpop.f32.mrf.mxu1  ;;  %8255 = vmatprep.mubr.msk.f32.mxu0 %vm252_vm1, %v12648_v9  ;;  %v12650_v9 = vld [vmem:[#allocation15_spill] sm:$0xff] }
 0x128   :  { %12645 = vst [vmem:[#allocation189_spill] sm:$0xff] %v10771_v10  ;;  %v10785_v32 = vadd.f32 %v8010_v2, %v1754_v26  ;;  %v1753_v42 = vadd.f32 %v1498_v8, %v10382_v28  ;;  %v2369_v38 = vpop.f32.mrf.mxu0  ;;  %v10803_v28 = vld [vmem:[%s12147_s0 + $0x2b8] sm:$0xff]  ;;  %v12652_v2 = vld [vmem:[#allocation110_spill] sm:$0xff] }
 0x129   :  { %v7915_v31 = vpop.f32.mrf.mxu1  ;;  %8158 = vmatmul.mubr.msk.f32.gmra.mxu1 %vm252_vm1, %v10791_v25  ;;  %12651 = vst [vmem:[#allocation192_spill] sm:$0xff] %v10803_v28 }
 0x12a   :  { %v10795_v60 = vadd.f32 %v2369_v38, %v1753_v42  ;;  %v1756_v10 = vadd.f32 %v7915_v31, %v10393_v46  ;;  %v8013_v35 = vpop.f32.mrf.mxu0  ;;  %8256 = vmatmul.mubr.msk.f32.gmra.mxu0 %vm252_vm1, %v12650_v9  ;;  %8160 = vmatprep.mubr.msk.f32.mxu1 %vm252_vm1, %v10803_v28  ;;  %v10815_v31 = vld [vmem:[%s12147_s0 + $0x2c0] sm:$0xff] }
 0x12b   :  { %v1508_v26 = vpop.f32.mrf.mxu1  ;;  %8258 = vmatprep.mubr.msk.f32.mxu0 %vm252_vm1, %v12652_v2  ;;  %v12654_v2 = vld [vmem:[#allocation17_spill] sm:$0xff] }
 0x12c   :  { %12649 = vst [vmem:[#allocation191_spill] sm:$0xff] %v10795_v60  ;;  %v10809_v8 = vadd.f32 %v8013_v35, %v1756_v10  ;;  %v1755_v46 = vadd.f32 %v1508_v26, %v10408_v19  ;;  %v2379_v42 = vpop.f32.mrf.mxu0  ;;  %v10827_v19 = vld [vmem:[%s12147_s0 + $0x2d0] sm:$0xff] }
 0x12d   :  { %v7918_v38 = vpop.f32.mrf.mxu1  ;;  %8161 = vmatmul.mubr.msk.f32.gmra.mxu1 %vm252_vm1, %v10815_v31  ;;  %12655 = vst [vmem:[#allocation194_spill] sm:$0xff] %v10827_v19  ;;  %v12656_v35 = vld [vmem:[#allocation112_spill] sm:$0xff] }
 0x12e   :  { %v10819_v9 = vadd.f32 %v2379_v42, %v1755_v46  ;;  %v1758_v60 = vadd.f32 %v7918_v38, %v10419_v50  ;;  %v8016_v28 = vpop.f32.mrf.mxu0  ;;  %8259 = vmatmul.mubr.msk.f32.gmra.mxu0 %vm252_vm1, %v12654_v2  ;;  %8163 = vmatprep.mubr.msk.f32.mxu1 %vm252_vm1, %v10827_v19  ;;  %v10839_v38 = vld [vmem:[%s12147_s0 + $0x2d8] sm:$0xff] }
 0x12f   :  { %v1518_v10 = vpop.f32.mrf.mxu1  ;;  %8261 = vmatprep.mubr.msk.f32.mxu0 %vm252_vm1, %v12656_v35  ;;  %v12657_v35 = vld [vmem:[#allocation19_spill] sm:$0xff] }
 0x130   :  { %12653 = vst [vmem:[#allocation193_spill] sm:$0xff] %v10819_v9  ;;  %v10833_v26 = vadd.f32 %v8016_v28, %v1758_v60  ;;  %v1757_v50 = vadd.f32 %v1518_v10, %v10434_v17  ;;  %v2389_v46 = vpop.f32.mrf.mxu0  ;;  %v10851_v17 = vld [vmem:[%s12147_s0 + $0x2e8] sm:$0xff] }
 0x131   :  { %v7921_v42 = vpop.f32.mrf.mxu1  ;;  %8164 = vmatmul.mubr.msk.f32.gmra.mxu1 %vm252_vm1, %v10839_v38 }
 0x132   :  { %v10843_v2 = vadd.f32 %v2389_v46, %v1757_v50  ;;  %v1760_v9 = vadd.f32 %v7921_v42, %v10445_v54  ;;  %v8019_v19 = vpop.f32.mrf.mxu0  ;;  %8262 = vmatmul.mubr.msk.f32.gmra.mxu0 %vm252_vm1, %v12657_v35  ;;  %8166 = vmatprep.mubr.msk.f32.mxu1 %vm252_vm1, %v10851_v17  ;;  %v10863_v46 = vld [vmem:[%s12147_s0 + $0x2f0] sm:$0xff] }
 0x133   :  { %v1528_v60 = vpop.f32.mrf.mxu1  ;;  %8264 = vmatprep.mubr.msk.f32.mxu0 %vm252_vm1, %v10052_v27  ;;  %12658 = vst [vmem:[#allocation195_spill] sm:$0xff] %v10863_v46  ;;  %v10870_v42 = vld [vmem:[%s12147_s0 + $0x330] sm:$0xff]  ;;  %v10885_v27 = vld [vmem:[%s12147_s0 + $0x300] sm:$0xff] }
 0x134   :  { %v10857_v28 = vadd.f32 %v8019_v19, %v1760_v9  ;;  %v1759_v54 = vadd.f32 %v1528_v60, %v10460_v21  ;;  %v2399_v10 = vpop.f32.mrf.mxu0  ;;  %v10875_v9 = vld [vmem:[%s12147_s0 + $0x338] sm:$0xff]  ;;  %12660 = vst [vmem:[#allocation197_spill] sm:$0xff] %v10885_v27 }
 0x135   :  { %v7924_v50 = vpop.f32.mrf.mxu1  ;;  %8167 = vmatmul.mubr.msk.f32.gmra.mxu1 %vm252_vm1, %v10863_v46 }
 0x136   :  { %v10877_v21 = vadd.f32 %v2399_v10, %v1759_v54  ;;  %v1762_v19 = vadd.f32 %v7924_v50, %v10481_v59  ;;  %v8022_v60 = vpop.f32.mrf.mxu0  ;;  %8265 = vmatmul.mubr.msk.f32.gmra.mxu0 %vm252_vm1, %v10071_v16  ;;  %8169 = vmatprep.mubr.msk.f32.mxu1 %vm252_vm1, %v10885_v27  ;;  %v3337_v50 = vrot.slane %v10870_v42, 1  ;;  %v3338_v16 = vrot.slane %v10875_v9, 1  ;;  %v10904_v27 = vld [vmem:[%s12147_s0 + $0x308] sm:$0xff] }
 0x137   :  { %v1538_v35 = vpop.f32.mrf.mxu1  ;;  %8267 = vmatprep.mubr.msk.f32.mxu0 %vm252_vm1, %v10079_v44  ;;  %12661 = vst [vmem:[#allocation198_spill] sm:$0xff] %v10904_v27 }
 0x138   :  { %12659 = vst [vmem:[#allocation196_spill] sm:$0xff] %v10877_v21  ;;  %v10891_v54 = vadd.f32 %v8022_v60, %v1762_v19  ;;  %v1761_v59 = vadd.f32 %v1538_v35, %v10496_v58  ;;  %v2409_v10 = vpop.f32.mrf.mxu0  ;;  %v10899_v21 = vld [vmem:[%s12147_s0 + $0x340] sm:$0x3]  ;;  %v10916_v60 = vld [vmem:[%s12147_s0 + $0x318] sm:$0xff] }
 0x139   :  { %v7927_v46 = vpop.f32.mrf.mxu1  ;;  %8170 = vmatmul.mubr.msk.f32.gmra.mxu1 %vm252_vm1, %v10904_v27  ;;  %v10932_v27 = vld [vmem:[%s12147_s0 + $0x320] sm:$0xff] }
 0x13a   :  { %v10908_v58 = vadd.f32 %v2409_v10, %v1761_v59  ;;  %v1764_v35 = vadd.f32 %v7927_v46, %v10514_v1  ;;  %v8025_v19 = vpop.f32.mrf.mxu0  ;;  %8268 = vmatmul.mubr.msk.f32.gmra.mxu0 %vm252_vm1, %v10098_v36  ;;  %8172 = vmatprep.mubr.msk.f32.mxu1 %vm252_vm1, %v10916_v60  ;;  %v3340_v59 = vrot.slane %v10899_v21, 1  ;;  %v10927_v36 = vsel %vm994_vm2, %v3337_v50, %v3338_v16 }
 0x13b   :  { %v1548_v44 = vpop.f32.mrf.mxu1  ;;  %8270 = vmatprep.mubr.msk.f32.mxu0 %vm252_vm1, %v10106_v47  ;;  %12663 = vst [vmem:[#allocation200_spill] sm:$0xff] %v10927_v36 }
 0x13c   :  { %12662 = vst [vmem:[#allocation199_spill] sm:$0xff] %v10908_v58  ;;  %v10923_v10 = vadd.f32 %v8025_v19, %v1764_v35  ;;  %v1763_v1 = vadd.f32 %v1548_v44, %v10530_v11  ;;  %v2419_v46 = vpop.f32.mrf.mxu0  ;;  %v10946_v11 = vsel %vm994_vm2, %v3338_v16, %v3340_v59 }
 0x13d   :  { %v7930_v58 = vpop.f32.mrf.mxu1  ;;  %8173 = vmatmul.mubr.msk.f32.gmra.mxu1 %vm252_vm1, %v10932_v27  ;;  %12665 = vst [vmem:[#allocation202_spill] sm:$0xff] %v10946_v11 }
 0x13e   :  { %v10936_v47 = vadd.f32 %v2419_v46, %v1763_v1  ;;  %v1766_v35 = vadd.f32 %v7930_v58, %v10544_v5  ;;  %v8028_v19 = vpop.f32.mrf.mxu0  ;;  %8271 = vmatmul.mubr.msk.f32.gmra.mxu0 %vm252_vm1, %v10118_v18  ;;  %8175 = vmatprep.mubr.msk.f32.mxu1 %vm252_vm1, %v10870_v42 }
 0x13f   :  { %v1558_v44 = vpop.f32.mrf.mxu1  ;;  %8273 = vmatprep.mubr.msk.f32.mxu0 %vm252_vm1, %v10927_v36  ;;  %v12666_v36 = vld [vmem:[#allocation24_spill] sm:$0xff] }
 0x140   :  { %12664 = vst [vmem:[#allocation201_spill] sm:$0xff] %v10936_v47  ;;  %v10948_v50 = vadd.f32 %v8028_v19, %v1766_v35  ;;  %v1765_v1 = vadd.f32 %v1558_v44, %v10557_v52  ;;  %v2429_v46 = vpop.f32.mrf.mxu0  ;;  %v12667_v44 = vld [vmem:[#allocation25_spill] sm:$0xff] }
 0x141   :  { %v7933_v5 = vpop.f32.mrf.mxu1  ;;  %8176 = vmatmul.mubr.msk.f32.gmra.mxu1 %vm252_vm1, %v10875_v9 }
 0x142   :  { %v10953_v58 = vadd.f32 %v2429_v46, %v1765_v1  ;;  %v1768_v18 = vadd.f32 %v7933_v5, %v10563_v7  ;;  %v8031_v47 = vpop.f32.mrf.mxu0  ;;  %8274 = vmatmul.mubr.msk.f32.gmra.mxu0 %vm252_vm1, %v10946_v11  ;;  %8278 = vmatprep.mubr.msk.f32.mxu1 %vm252_vm1, %v12666_v36 }
 0x143   :  { %v1568_v16 = vpop.f32.mrf.mxu1  ;;  %8376 = vmatprep.mubr.msk.f32.mxu0 %vm252_vm1, %v10157_v12  ;;  %v12671_v12 = vld [vmem:[#allocation122_spill] sm:$0xff] }
 0x144   :  { %v10962_v52 = vadd.f32 %v8031_v47, %v1768_v18  ;;  %v1767_v59 = vadd.f32 %v1568_v16, %v10575_v29  ;;  %v2439_v35 = vpop.f32.mrf.mxu0  ;;  %v12669_v47 = vld [vmem:[#allocation27_spill] sm:$0xff] }
 0x145   :  { %v7936_v19 = vpop.f32.mrf.mxu1  ;;  %8279 = vmatmul.mubr.msk.f32.vlgmr.msra.gmra.mxu1 %vm252_vm1, %v12667_v44  ;;  %v12676_v44 = vld [vmem:[#allocation127_spill] sm:$0xff] }
 0x146   :  { %v10967_v7 = vadd.f32 %v2439_v35, %v1767_v59  ;;  %v1770_v1 = vadd.f32 %v7936_v19, %v10135_v15  ;;  %v8034_v46 = vpop.f32.mrf.mxu0  ;;  %8377 = vmatmul.mubr.msk.f32.vlgmr.msra.gmra.mxu0 %vm252_vm1, %v10179_v48  ;;  %8473 = vmatpush3.msk.msra.mxu1 %vm445_vm0, %v10150_v39  ;;  %v12672_v15 = vld [vmem:[#allocation124_spill] sm:$0xff]  ;;  %v12673_v48 = vld [vmem:[#allocation29_spill] sm:$0xff]  ;;  %v12675_v59 = vld [vmem:[#allocation123_spill] sm:$0xff] }
 0x147   :  { %v1578_v36 = vpop.f32.mrf.mxu1  ;;  %8281 = vmatprep.mubr.msk.f32.mxu1 %vm252_vm1, %v12669_v47  ;;  %8571 = vmatpush3.msk.msra.mxu0 %vm445_vm0, %v10172_v53  ;;  %v12677_v53 = vld [vmem:[#allocation31_spill] sm:$0xff] }
 0x148   :  { %12668 = vst [vmem:[#allocation24_spill] sm:$0xff] %v10967_v7  ;;  %v10978_v18 = vadd.f32 %v8034_v46, %v1770_v1  ;;  %v1769_v29 = vadd.f32 %v1578_v36, %v12671_v12  ;;  %v2449_v5 = vpop.f32.mrf.mxu0  ;;  %8379 = vmatprep.mubr.msk.f32.mxu0 %vm252_vm1, %v12672_v15  ;;  %v12678_v46 = vld [vmem:[#allocation128_spill] sm:$0xff]  ;;  %v12680_v12 = vld [vmem:[#allocation125_spill] sm:$0xff]  ;;  %v12773_v7 = vld [vmem:[#allocation178_spill] sm:$0xff] }
 0x149   :  { %v7939_v16 = vpop.f32.mrf.mxu1  ;;  %8282 = vmatmul.mubr.msk.f32.gmra.mxu1 %vm252_vm1, %v12673_v48  ;;  %v12684_v48 = vld [vmem:[#allocation131_spill] sm:$0xff] }
 0x14a   :  { %12670 = vst [vmem:[#allocation25_spill] sm:$0xff] %v10978_v18  ;;  %v10985_v39 = vadd.f32 %v2449_v5, %v1769_v29  ;;  %v1772_v35 = vadd.f32 %v7939_v16, %v12675_v59  ;;  %v8037_v19 = vpop.f32.mrf.mxu0  ;;  %8380 = vmatmul.mubr.msk.f32.gmra.mxu0 %vm252_vm1, %v12676_v44  ;;  %8284 = vmatprep.mubr.msk.f32.mxu1 %vm252_vm1, %v12677_v53  ;;  %v12681_v5 = vld [vmem:[#allocation33_spill] sm:$0xff]  ;;  %v12683_v59 = vld [vmem:[#allocation126_spill] sm:$0xff]  ;;  %v12685_v53 = vld [vmem:[#allocation35_spill] sm:$0xff] }
 0x14b   :  { %v1588_v1 = vpop.f32.mrf.mxu1  ;;  %8382 = vmatprep.mubr.msk.f32.mxu0 %vm252_vm1, %v12678_v46  ;;  %v12688_v46 = vld [vmem:[#allocation129_spill] sm:$0xff] }
 0x14c   :  { %12674 = vst [vmem:[#allocation27_spill] sm:$0xff] %v10985_v39  ;;  %v10994_v36 = vadd.f32 %v8037_v19, %v1772_v35  ;;  %v1771_v15 = vadd.f32 %v1588_v1, %v12680_v12  ;;  %v2459_v11 = vpop.f32.mrf.mxu0  ;;  %v12686_v19 = vld [vmem:[#allocation132_spill] sm:$0xff] }
 0x14d   :  { %v7942_v29 = vpop.f32.mrf.mxu1  ;;  %8285 = vmatmul.mubr.msk.f32.gmra.mxu1 %vm252_vm1, %v12681_v5 }
 0x14e   :  { %12679 = vst [vmem:[#allocation122_spill] sm:$0xff] %v10994_v36  ;;  %v10999_v16 = vadd.f32 %v2459_v11, %v1771_v15  ;;  %v1774_v44 = vadd.f32 %v7942_v29, %v12683_v59  ;;  %v8040_v39 = vpop.f32.mrf.mxu0  ;;  %8383 = vmatmul.mubr.msk.f32.gmra.mxu0 %vm252_vm1, %v12684_v48  ;;  %8287 = vmatprep.mubr.msk.f32.mxu1 %vm252_vm1, %v12685_v53  ;;  %v12689_v15 = vld [vmem:[#allocation37_spill] sm:$0xff]  ;;  %v12691_v59 = vld [vmem:[#allocation130_spill] sm:$0xff]  ;;  %v12692_v36 = vld [vmem:[#allocation135_spill] sm:$0xff] }
 0x14f   :  { %v1598_v35 = vpop.f32.mrf.mxu1  ;;  %8385 = vmatprep.mubr.msk.f32.mxu0 %vm252_vm1, %v12686_v19  ;;  %v12693_v53 = vld [vmem:[#allocation39_spill] sm:$0xff]  ;;  %v12696_v19 = vld [vmem:[#allocation133_spill] sm:$0xff] }
 0x150   :  { %12682 = vst [vmem:[#allocation124_spill] sm:$0xff] %v10999_v16  ;;  %v11008_v1 = vadd.f32 %v8040_v39, %v1774_v44  ;;  %v1773_v12 = vadd.f32 %v1598_v35, %v12688_v46  ;;  %v2469_v5 = vpop.f32.mrf.mxu0  ;;  %v12694_v44 = vld [vmem:[#allocation136_spill] sm:$0xff] }
 0x151   :  { %v7945_v11 = vpop.f32.mrf.mxu1  ;;  %8288 = vmatmul.mubr.msk.f32.gmra.mxu1 %vm252_vm1, %v12689_v15 }
 0x152   :  { %12687 = vst [vmem:[#allocation123_spill] sm:$0xff] %v11008_v1  ;;  %v11013_v29 = vadd.f32 %v2469_v5, %v1773_v12  ;;  %v1776_v48 = vadd.f32 %v7945_v11, %v12691_v59  ;;  %v8043_v16 = vpop.f32.mrf.mxu0  ;;  %8386 = vmatmul.mubr.msk.f32.gmra.mxu0 %vm252_vm1, %v12692_v36  ;;  %8290 = vmatprep.mubr.msk.f32.mxu1 %vm252_vm1, %v12693_v53  ;;  %v12697_v12 = vld [vmem:[#allocation41_spill] sm:$0xff]  ;;  %v12699_v59 = vld [vmem:[#allocation134_spill] sm:$0xff]  ;;  %v12700_v1 = vld [vmem:[#allocation139_spill] sm:$0xff] }
 0x153   :  { %v1608_v39 = vpop.f32.mrf.mxu1  ;;  %8388 = vmatprep.mubr.msk.f32.mxu0 %vm252_vm1, %v12694_v44  ;;  %v12701_v53 = vld [vmem:[#allocation43_spill] sm:$0xff]  ;;  %v12704_v44 = vld [vmem:[#allocation137_spill] sm:$0xff] }
 0x154   :  { %12690 = vst [vmem:[#allocation127_spill] sm:$0xff] %v11013_v29  ;;  %v11022_v35 = vadd.f32 %v8043_v16, %v1776_v48  ;;  %v1775_v46 = vadd.f32 %v1608_v39, %v12696_v19  ;;  %v2479_v15 = vpop.f32.mrf.mxu0  ;;  %v12702_v48 = vld [vmem:[#allocation140_spill] sm:$0xff] }
 0x155   :  { %v7948_v5 = vpop.f32.mrf.mxu1  ;;  %8291 = vmatmul.mubr.msk.f32.gmra.mxu1 %vm252_vm1, %v12697_v12 }
 0x156   :  { %12695 = vst [vmem:[#allocation128_spill] sm:$0xff] %v11022_v35  ;;  %v11027_v11 = vadd.f32 %v2479_v15, %v1775_v46  ;;  %v1778_v36 = vadd.f32 %v7948_v5, %v12699_v59  ;;  %v8046_v29 = vpop.f32.mrf.mxu0  ;;  %8389 = vmatmul.mubr.msk.f32.gmra.mxu0 %vm252_vm1, %v12700_v1  ;;  %8293 = vmatprep.mubr.msk.f32.mxu1 %vm252_vm1, %v12701_v53  ;;  %v12705_v46 = vld [vmem:[#allocation45_spill] sm:$0xff]  ;;  %v12707_v59 = vld [vmem:[#allocation138_spill] sm:$0xff]  ;;  %v12708_v35 = vld [vmem:[#allocation143_spill] sm:$0xff] }
 0x157   :  { %v1618_v16 = vpop.f32.mrf.mxu1  ;;  %8391 = vmatprep.mubr.msk.f32.mxu0 %vm252_vm1, %v12702_v48  ;;  %v12709_v53 = vld [vmem:[#allocation47_spill] sm:$0xff]  ;;  %v12712_v48 = vld [vmem:[#allocation141_spill] sm:$0xff] }
 0x158   :  { %12698 = vst [vmem:[#allocation125_spill] sm:$0xff] %v11027_v11  ;;  %v11036_v39 = vadd.f32 %v8046_v29, %v1778_v36  ;;  %v1777_v19 = vadd.f32 %v1618_v16, %v12704_v44  ;;  %v2489_v12 = vpop.f32.mrf.mxu0  ;;  %v12710_v36 = vld [vmem:[#allocation144_spill] sm:$0xff] }
 0x159   :  { %v7951_v15 = vpop.f32.mrf.mxu1  ;;  %8294 = vmatmul.mubr.msk.f32.gmra.mxu1 %vm252_vm1, %v12705_v46 }
 0x15a   :  { %12703 = vst [vmem:[#allocation126_spill] sm:$0xff] %v11036_v39  ;;  %v11041_v5 = vadd.f32 %v2489_v12, %v1777_v19  ;;  %v1780_v1 = vadd.f32 %v7951_v15, %v12707_v59  ;;  %v8049_v11 = vpop.f32.mrf.mxu0  ;;  %8392 = vmatmul.mubr.msk.f32.gmra.mxu0 %vm252_vm1, %v12708_v35  ;;  %8296 = vmatprep.mubr.msk.f32.mxu1 %vm252_vm1, %v12709_v53  ;;  %v12713_v19 = vld [vmem:[#allocation49_spill] sm:$0xff]  ;;  %v12715_v59 = vld [vmem:[#allocation142_spill] sm:$0xff]  ;;  %v12716_v39 = vld [vmem:[#allocation147_spill] sm:$0xff] }
 0x15b   :  { %v1628_v29 = vpop.f32.mrf.mxu1  ;;  %8394 = vmatprep.mubr.msk.f32.mxu0 %vm252_vm1, %v12710_v36  ;;  %v12717_v53 = vld [vmem:[#allocation51_spill] sm:$0xff]  ;;  %v12720_v36 = vld [vmem:[#allocation145_spill] sm:$0xff] }
 0x15c   :  { %12706 = vst [vmem:[#allocation131_spill] sm:$0xff] %v11041_v5  ;;  %v11050_v16 = vadd.f32 %v8049_v11, %v1780_v1  ;;  %v1779_v44 = vadd.f32 %v1628_v29, %v12712_v48  ;;  %v2499_v46 = vpop.f32.mrf.mxu0  ;;  %v12718_v1 = vld [vmem:[#allocation148_spill] sm:$0xff] }
 0x15d   :  { %v7954_v12 = vpop.f32.mrf.mxu1  ;;  %8297 = vmatmul.mubr.msk.f32.gmra.mxu1 %vm252_vm1, %v12713_v19 }
 0x15e   :  { %12711 = vst [vmem:[#allocation132_spill] sm:$0xff] %v11050_v16  ;;  %v11055_v15 = vadd.f32 %v2499_v46, %v1779_v44  ;;  %v1782_v35 = vadd.f32 %v7954_v12, %v12715_v59  ;;  %v8052_v5 = vpop.f32.mrf.mxu0  ;;  %8395 = vmatmul.mubr.msk.f32.gmra.mxu0 %vm252_vm1, %v12716_v39  ;;  %8299 = vmatprep.mubr.msk.f32.mxu1 %vm252_vm1, %v12717_v53  ;;  %v12721_v44 = vld [vmem:[#allocation53_spill] sm:$0xff]  ;;  %v12723_v59 = vld [vmem:[#allocation146_spill] sm:$0xff]  ;;  %v12724_v16 = vld [vmem:[#allocation151_spill] sm:$0xff] }
 0x15f   :  { %v1638_v11 = vpop.f32.mrf.mxu1  ;;  %8397 = vmatprep.mubr.msk.f32.mxu0 %vm252_vm1, %v12718_v1  ;;  %v12725_v53 = vld [vmem:[#allocation55_spill] sm:$0xff]  ;;  %v12728_v1 = vld [vmem:[#allocation149_spill] sm:$0xff] }
 0x160   :  { %12714 = vst [vmem:[#allocation129_spill] sm:$0xff] %v11055_v15  ;;  %v11064_v29 = vadd.f32 %v8052_v5, %v1782_v35  ;;  %v1781_v48 = vadd.f32 %v1638_v11, %v12720_v36  ;;  %v2509_v19 = vpop.f32.mrf.mxu0  ;;  %v12726_v35 = vld [vmem:[#allocation152_spill] sm:$0xff] }
 0x161   :  { %v7957_v46 = vpop.f32.mrf.mxu1  ;;  %8300 = vmatmul.mubr.msk.f32.gmra.mxu1 %vm252_vm1, %v12721_v44 }
 0x162   :  { %12719 = vst [vmem:[#allocation130_spill] sm:$0xff] %v11064_v29  ;;  %v11069_v12 = vadd.f32 %v2509_v19, %v1781_v48  ;;  %v1784_v39 = vadd.f32 %v7957_v46, %v12723_v59  ;;  %v8055_v15 = vpop.f32.mrf.mxu0  ;;  %8398 = vmatmul.mubr.msk.f32.gmra.mxu0 %vm252_vm1, %v12724_v16  ;;  %8302 = vmatprep.mubr.msk.f32.mxu1 %vm252_vm1, %v12725_v53  ;;  %v12729_v48 = vld [vmem:[#allocation57_spill] sm:$0xff]  ;;  %v12731_v59 = vld [vmem:[#allocation150_spill] sm:$0xff]  ;;  %v12732_v29 = vld [vmem:[#allocation155_spill] sm:$0xff] }
 0x163   :  { %v1648_v5 = vpop.f32.mrf.mxu1  ;;  %8400 = vmatprep.mubr.msk.f32.mxu0 %vm252_vm1, %v12726_v35  ;;  %v12733_v53 = vld [vmem:[#allocation59_spill] sm:$0xff]  ;;  %v12736_v35 = vld [vmem:[#allocation153_spill] sm:$0xff] }
 0x164   :  { %12722 = vst [vmem:[#allocation135_spill] sm:$0xff] %v11069_v12  ;;  %v11078_v11 = vadd.f32 %v8055_v15, %v1784_v39  ;;  %v1783_v36 = vadd.f32 %v1648_v5, %v12728_v1  ;;  %v2519_v44 = vpop.f32.mrf.mxu0  ;;  %v12734_v39 = vld [vmem:[#allocation156_spill] sm:$0xff] }
 0x165   :  { %v7960_v19 = vpop.f32.mrf.mxu1  ;;  %8303 = vmatmul.mubr.msk.f32.gmra.mxu1 %vm252_vm1, %v12729_v48 }
 0x166   :  { %12727 = vst [vmem:[#allocation136_spill] sm:$0xff] %v11078_v11  ;;  %v11083_v46 = vadd.f32 %v2519_v44, %v1783_v36  ;;  %v1786_v16 = vadd.f32 %v7960_v19, %v12731_v59  ;;  %v8058_v12 = vpop.f32.mrf.mxu0  ;;  %8401 = vmatmul.mubr.msk.f32.gmra.mxu0 %vm252_vm1, %v12732_v29  ;;  %8305 = vmatprep.mubr.msk.f32.mxu1 %vm252_vm1, %v12733_v53  ;;  %v12737_v36 = vld [vmem:[#allocation61_spill] sm:$0xff]  ;;  %v12739_v59 = vld [vmem:[#allocation154_spill] sm:$0xff]  ;;  %v12740_v11 = vld [vmem:[#allocation159_spill] sm:$0xff] }
 0x167   :  { %v1658_v15 = vpop.f32.mrf.mxu1  ;;  %8403 = vmatprep.mubr.msk.f32.mxu0 %vm252_vm1, %v12734_v39  ;;  %v12741_v53 = vld [vmem:[#allocation63_spill] sm:$0xff]  ;;  %v12744_v39 = vld [vmem:[#allocation157_spill] sm:$0xff] }
 0x168   :  { %12730 = vst [vmem:[#allocation133_spill] sm:$0xff] %v11083_v46  ;;  %v11092_v5 = vadd.f32 %v8058_v12, %v1786_v16  ;;  %v1785_v1 = vadd.f32 %v1658_v15, %v12736_v35  ;;  %v2529_v48 = vpop.f32.mrf.mxu0  ;;  %v12742_v16 = vld [vmem:[#allocation160_spill] sm:$0xff] }
 0x169   :  { %v7963_v44 = vpop.f32.mrf.mxu1  ;;  %8306 = vmatmul.mubr.msk.f32.gmra.mxu1 %vm252_vm1, %v12737_v36 }
 0x16a   :  { %12735 = vst [vmem:[#allocation134_spill] sm:$0xff] %v11092_v5  ;;  %v11097_v19 = vadd.f32 %v2529_v48, %v1785_v1  ;;  %v1788_v29 = vadd.f32 %v7963_v44, %v12739_v59  ;;  %v8061_v46 = vpop.f32.mrf.mxu0  ;;  %8404 = vmatmul.mubr.msk.f32.gmra.mxu0 %vm252_vm1, %v12740_v11  ;;  %8308 = vmatprep.mubr.msk.f32.mxu1 %vm252_vm1, %v12741_v53  ;;  %v12745_v1 = vld [vmem:[#allocation65_spill] sm:$0xff]  ;;  %v12747_v59 = vld [vmem:[#allocation158_spill] sm:$0xff]  ;;  %v12748_v5 = vld [vmem:[#allocation163_spill] sm:$0xff] }
 0x16b   :  { %v1668_v12 = vpop.f32.mrf.mxu1  ;;  %8406 = vmatprep.mubr.msk.f32.mxu0 %vm252_vm1, %v12742_v16  ;;  %v12749_v53 = vld [vmem:[#allocation67_spill] sm:$0xff]  ;;  %v12752_v16 = vld [vmem:[#allocation161_spill] sm:$0xff] }
 0x16c   :  { %12738 = vst [vmem:[#allocation139_spill] sm:$0xff] %v11097_v19  ;;  %v11106_v15 = vadd.f32 %v8061_v46, %v1788_v29  ;;  %v1787_v35 = vadd.f32 %v1668_v12, %v12744_v39  ;;  %v2539_v36 = vpop.f32.mrf.mxu0  ;;  %v12750_v29 = vld [vmem:[#allocation164_spill] sm:$0xff] }
 0x16d   :  { %v7966_v48 = vpop.f32.mrf.mxu1  ;;  %8309 = vmatmul.mubr.msk.f32.gmra.mxu1 %vm252_vm1, %v12745_v1 }
 0x16e   :  { %12743 = vst [vmem:[#allocation140_spill] sm:$0xff] %v11106_v15  ;;  %v11111_v44 = vadd.f32 %v2539_v36, %v1787_v35  ;;  %v1790_v11 = vadd.f32 %v7966_v48, %v12747_v59  ;;  %v8064_v19 = vpop.f32.mrf.mxu0  ;;  %8407 = vmatmul.mubr.msk.f32.gmra.mxu0 %vm252_vm1, %v12748_v5  ;;  %8311 = vmatprep.mubr.msk.f32.mxu1 %vm252_vm1, %v12749_v53  ;;  %v12753_v35 = vld [vmem:[#allocation69_spill] sm:$0xff]  ;;  %v12755_v59 = vld [vmem:[#allocation162_spill] sm:$0xff]  ;;  %v12756_v15 = vld [vmem:[#allocation167_spill] sm:$0xff] }
 0x16f   :  { %v1678_v46 = vpop.f32.mrf.mxu1  ;;  %8409 = vmatprep.mubr.msk.f32.mxu0 %vm252_vm1, %v12750_v29  ;;  %v12757_v53 = vld [vmem:[#allocation71_spill] sm:$0xff]  ;;  %v12760_v29 = vld [vmem:[#allocation165_spill] sm:$0xff] }
 0x170   :  { %12746 = vst [vmem:[#allocation137_spill] sm:$0xff] %v11111_v44  ;;  %v11120_v12 = vadd.f32 %v8064_v19, %v1790_v11  ;;  %v1789_v39 = vadd.f32 %v1678_v46, %v12752_v16  ;;  %v2549_v1 = vpop.f32.mrf.mxu0  ;;  %v12758_v11 = vld [vmem:[#allocation169_spill] sm:$0xff] }
 0x171   :  { %v7969_v36 = vpop.f32.mrf.mxu1  ;;  %8312 = vmatmul.mubr.msk.f32.gmra.mxu1 %vm252_vm1, %v12753_v35 }
 0x172   :  { %12751 = vst [vmem:[#allocation138_spill] sm:$0xff] %v11120_v12  ;;  %v11125_v48 = vadd.f32 %v2549_v1, %v1789_v39  ;;  %v1792_v5 = vadd.f32 %v7969_v36, %v12755_v59  ;;  %v8067_v44 = vpop.f32.mrf.mxu0  ;;  %8410 = vmatmul.mubr.msk.f32.gmra.mxu0 %vm252_vm1, %v12756_v15  ;;  %8314 = vmatprep.mubr.msk.f32.mxu1 %vm252_vm1, %v12757_v53  ;;  %v12761_v39 = vld [vmem:[#allocation73_spill] sm:$0xff]  ;;  %v12763_v59 = vld [vmem:[#allocation166_spill] sm:$0xff]  ;;  %v12765_v53 = vld [vmem:[#allocation75_spill] sm:$0xff] }
 0x173   :  { %v1688_v19 = vpop.f32.mrf.mxu1  ;;  %8412 = vmatprep.mubr.msk.f32.mxu0 %vm252_vm1, %v12758_v11  ;;  %v12764_v12 = vld [vmem:[#allocation173_spill] sm:$0xff]  ;;  %v12767_v11 = vld [vmem:[#allocation168_spill] sm:$0xff] }
 0x174   :  { %12754 = vst [vmem:[#allocation143_spill] sm:$0xff] %v11125_v48  ;;  %v11134_v46 = vadd.f32 %v8067_v44, %v1792_v5  ;;  %v1791_v16 = vadd.f32 %v1688_v19, %v12760_v29  ;;  %v2559_v35 = vpop.f32.mrf.mxu0  ;;  %v3932_v44 = vrot.slane %v10474_v62, 2  ;;  %v12766_v19 = vld [vmem:[#allocation174_spill] sm:$0xff]  ;;  %v3933_v29 = vrot.slane %v12767_v11, 2 }
 0x175   :  { %v7972_v1 = vpop.f32.mrf.mxu1  ;;  %8315 = vmatmul.mubr.msk.f32.gmra.mxu1 %vm252_vm1, %v12761_v39 }
 0x176   :  { %12759 = vst [vmem:[#allocation144_spill] sm:$0xff] %v11134_v46  ;;  %v11139_v36 = vadd.f32 %v2559_v35, %v1791_v16  ;;  %v1794_v15 = vadd.f32 %v7972_v1, %v12763_v59  ;;  %v8070_v48 = vpop.f32.mrf.mxu0  ;;  %8413 = vmatmul.mubr.msk.f32.gmra.mxu0 %vm252_vm1, %v12764_v12  ;;  %8317 = vmatprep.mubr.msk.f32.mxu1 %vm252_vm1, %v12765_v53  ;;  %v12769_v35 = vld [vmem:[#allocation170_spill] sm:$0xff]  ;;  %v12772_v53 = vld [vmem:[#allocation172_spill] sm:$0xff] }
 0x177   :  { %v1698_v5 = vpop.f32.mrf.mxu1  ;;  %8415 = vmatprep.mubr.msk.f32.mxu0 %vm252_vm1, %v12766_v19  ;;  %v12774_v19 = vld [vmem:[#allocation79_spill] sm:$0xff] }
 0x178   :  { %12762 = vst [vmem:[#allocation141_spill] sm:$0xff] %v11139_v36  ;;  %v11150_v39 = vadd.f32 %v8070_v48, %v1794_v15  ;;  %v1793_v16 = vadd.f32 %v1698_v5, %v12769_v35  ;;  %v2569_v1 = vpop.f32.mrf.mxu0  ;;  %v12770_v36 = vld [vmem:[#allocation77_spill] sm:$0xff]  ;;  %v12775_v48 = vld [vmem:[#allocation171_spill] sm:$0xff]  ;;  %v11166_v5 = vsel %vm1865_vm3, %v3932_v44, %v3933_v29 }
 0x179   :  { %v7975_v59 = vpop.f32.mrf.mxu1  ;;  %8318 = vmatmul.mubr.msk.f32.gmra.mxu1 %vm252_vm1, %v12770_v36  ;;  %v3935_v15 = vrot.slane %v12775_v48, 2  ;;  %12776 = vst [vmem:[#allocation148_spill] sm:$0xff] %v11166_v5 }
 0x17a   :  { %12768 = vst [vmem:[#allocation142_spill] sm:$0xff] %v11150_v39  ;;  %v11155_v12 = vadd.f32 %v2569_v1, %v1793_v16  ;;  %v1796_v46 = vadd.f32 %v7975_v59, %v12772_v53  ;;  %v8073_v18 = vpop.f32.mrf.mxu0  ;;  %8416 = vmatmul.mubr.msk.f32.gmra.mxu0 %vm252_vm1, %v12773_v7  ;;  %8320 = vmatprep.mubr.msk.f32.mxu1 %vm252_vm1, %v12774_v19  ;;  %v12777_v16 = vld [vmem:[#allocation175_spill] sm:$0xff]  ;;  %v11174_v7 = vld [vmem:[%s12147_s0 + $0x198] sm:$0xff] }
 0x17b   :  { %v1708_v39 = vpop.f32.mrf.mxu1  ;;  %8418 = vmatprep.mubr.msk.f32.mxu0 %vm252_vm1, %v10474_v62  ;;  %v12780_v62 = vld [vmem:[#allocation177_spill] sm:$0xff] }
 0x17c   :  { %12771 = vst [vmem:[#allocation147_spill] sm:$0xff] %v11155_v12  ;;  %v11168_v35 = vadd.f32 %v8073_v18, %v1796_v46  ;;  %v1795_v53 = vadd.f32 %v1708_v39, %v12777_v16  ;;  %v2579_v1 = vpop.f32.mrf.mxu0  ;;  %v12778_v12 = vld [vmem:[#allocation81_spill] sm:$0xff]  ;;  %v11186_v18 = vsel %vm1865_vm3, %v3933_v29, %v3935_v15  ;;  %v11193_v39 = vld [vmem:[%s12147_s0 + $0x1a0] sm:$0xff] }
 0x17d   :  { %v7978_v59 = vpop.f32.mrf.mxu1  ;;  %8321 = vmatmul.mubr.msk.f32.gmra.mxu1 %vm252_vm1, %v12778_v12  ;;  %12781 = vst [vmem:[#allocation146_spill] sm:$0xff] %v11186_v18  ;;  %v12785_v15 = vld [vmem:[#allocation181_spill] sm:$0xff] }
 0x17e   :  { %v11178_v48 = vadd.f32 %v2579_v1, %v1795_v53  ;;  %v1798_v19 = vadd.f32 %v7978_v59, %v12780_v62  ;;  %v8076_v44 = vpop.f32.mrf.mxu0  ;;  %8419 = vmatmul.mubr.msk.f32.gmra.mxu0 %vm252_vm1, %v12767_v11  ;;  %8323 = vmatprep.mubr.msk.f32.mxu1 %vm252_vm1, %v11166_v5  ;;  %v12783_v53 = vld [vmem:[#allocation179_spill] sm:$0xff]  ;;  %v12786_v5 = vld [vmem:[#allocation82_spill] sm:$0xff] }
 0x17f   :  { %v1718_v46 = vpop.f32.mrf.mxu1  ;;  %8421 = vmatprep.mubr.msk.f32.mxu0 %vm252_vm1, %v11174_v7 }
 0x180   :  { %12779 = vst [vmem:[#allocation145_spill] sm:$0xff] %v11178_v48  ;;  %v11195_v16 = vadd.f32 %v8076_v44, %v1798_v19  ;;  %v1797_v1 = vadd.f32 %v1718_v46, %v12783_v53  ;;  %v2589_v11 = vpop.f32.mrf.mxu0  ;;  %v12787_v44 = vld [vmem:[#allocation183_spill] sm:$0xff]  ;;  %v12788_v53 = vld [vmem:[#allocation182_spill] sm:$0xff] }
 0x181   :  { %v7981_v59 = vpop.f32.mrf.mxu1  ;;  %8324 = vmatmul.mubr.msk.f32.gmra.mxu1 %vm252_vm1, %v11186_v18 }
 0x182   :  { %12782 = vst [vmem:[#allocation151_spill] sm:$0xff] %v11195_v16  ;;  %v11200_v29 = vadd.f32 %v2589_v11, %v1797_v1  ;;  %v1800_v62 = vadd.f32 %v7981_v59, %v12785_v15  ;;  %v8079_v48 = vpop.f32.mrf.mxu0  ;;  %8422 = vmatmul.mubr.msk.f32.gmra.mxu0 %vm252_vm1, %v11193_v39  ;;  %8326 = vmatprep.mubr.msk.f32.mxu1 %vm252_vm1, %v12786_v5  ;;  %v12789_v11 = vld [vmem:[#allocation83_spill] sm:$0xff]  ;;  %v12790_v5 = vld [vmem:[#allocation85_spill] sm:$0xff] }
 0x183   :  { %v1728_v19 = vpop.f32.mrf.mxu1  ;;  %8424 = vmatprep.mubr.msk.f32.mxu0 %vm252_vm1, %v12787_v44 }
 0x184   :  { %12784 = vst [vmem:[#allocation152_spill] sm:$0xff] %v11200_v29  ;;  %v11209_v46 = vadd.f32 %v8079_v48, %v1800_v62  ;;  %v1799_v16 = vadd.f32 %v1728_v19, %v12788_v53  ;;  %v2599_v18 = vpop.f32.mrf.mxu0 }
 0x185   :  { %v8084_v1 = vpop.f32.mrf.mxu1  ;;  %8327 = vmatmul.mubr.msk.f32.gmra.mxu1 %vm252_vm1, %v12789_v11 }
 0x186   :  { %v11214_v59 = vadd.f32 %v2599_v18, %v1799_v16  ;;  %v3203_v15 = vadd.f32 %v8084_v1, %v10593_v63  ;;  %v8182_v29 = vpop.f32.mrf.mxu0  ;;  %8425 = vmatmul.mubr.msk.f32.gmra.mxu0 %vm252_vm1, %v10599_v56  ;;  %8329 = vmatprep.mubr.msk.f32.mxu1 %vm252_vm1, %v12790_v5  ;;  %v12791_v16 = vld [vmem:[#allocation87_spill] sm:$0xff]  ;;  %v12792_v1 = vld [vmem:[#allocation89_spill] sm:$0xff] }
 0x187   :  { %v2883_v48 = vpop.f32.mrf.mxu1  ;;  %8427 = vmatprep.mubr.msk.f32.mxu0 %vm252_vm1, %v10611_v55 }
 0x188   :  { %v11223_v62 = vadd.f32 %v8182_v29, %v3203_v15  ;;  %v3202_v19 = vadd.f32 %v2883_v48, %v10603_v4  ;;  %v3485_v44 = vpop.f32.mrf.mxu0  ;;  %v12793_v48 = vld [vmem:[#allocation91_spill] sm:$0xff] }
 0x189   :  { %v8087_v18 = vpop.f32.mrf.mxu1  ;;  %8330 = vmatmul.mubr.msk.f32.gmra.mxu1 %vm252_vm1, %v12791_v16 }
 0x18a   :  { %v11228_v63 = vadd.f32 %v3485_v44, %v3202_v19  ;;  %v3205_v56 = vadd.f32 %v8087_v18, %v10617_v45  ;;  %v8185_v53 = vpop.f32.mrf.mxu0  ;;  %8428 = vmatmul.mubr.msk.f32.gmra.mxu0 %vm252_vm1, %v10623_v37  ;;  %8332 = vmatprep.mubr.msk.f32.mxu1 %vm252_vm1, %v12792_v1  ;;  %v12794_v44 = vld [vmem:[#allocation93_spill] sm:$0xff] }
 0x18b   :  { %v2893_v55 = vpop.f32.mrf.mxu1  ;;  %8430 = vmatprep.mubr.msk.f32.mxu0 %vm252_vm1, %v10635_v61 }
 0x18c   :  { %v11237_v4 = vadd.f32 %v8185_v53, %v3205_v56  ;;  %v3204_v29 = vadd.f32 %v2893_v55, %v10627_v34  ;;  %v3495_v11 = vpop.f32.mrf.mxu0  ;;  %v12795_v55 = vld [vmem:[#allocation95_spill] sm:$0xff] }
 0x18d   :  { %v8090_v15 = vpop.f32.mrf.mxu1  ;;  %8333 = vmatmul.mubr.msk.f32.gmra.mxu1 %vm252_vm1, %v12793_v48 }
 0x18e   :  { %v11242_v45 = vadd.f32 %v3495_v11, %v3204_v29  ;;  %v3207_v37 = vadd.f32 %v8090_v15, %v10641_v33  ;;  %v8188_v19 = vpop.f32.mrf.mxu0  ;;  %8431 = vmatmul.mubr.msk.f32.gmra.mxu0 %vm252_vm1, %v10647_v40  ;;  %8335 = vmatprep.mubr.msk.f32.mxu1 %vm252_vm1, %v12794_v44  ;;  %v12796_v11 = vld [vmem:[#allocation97_spill] sm:$0xff] }
 0x18f   :  { %v2903_v61 = vpop.f32.mrf.mxu1  ;;  %8433 = vmatprep.mubr.msk.f32.mxu0 %vm252_vm1, %v10659_v13 }
 0x190   :  { %v11251_v34 = vadd.f32 %v8188_v19, %v3207_v37  ;;  %v3206_v18 = vadd.f32 %v2903_v61, %v10651_v23  ;;  %v3505_v56 = vpop.f32.mrf.mxu0  ;;  %v12797_v61 = vld [vmem:[#allocation99_spill] sm:$0xff] }
 0x191   :  { %v8093_v53 = vpop.f32.mrf.mxu1  ;;  %8336 = vmatmul.mubr.msk.f32.gmra.mxu1 %vm252_vm1, %v12795_v55 }
 0x192   :  { %v11256_v33 = vadd.f32 %v3505_v56, %v3206_v18  ;;  %v3209_v40 = vadd.f32 %v8093_v53, %v10665_v24  ;;  %v8191_v29 = vpop.f32.mrf.mxu0  ;;  %8434 = vmatmul.mubr.msk.f32.gmra.mxu0 %vm252_vm1, %v10671_v51  ;;  %8338 = vmatprep.mubr.msk.f32.mxu1 %vm252_vm1, %v12796_v11  ;;  %v12798_v56 = vld [vmem:[#allocation6_spill] sm:$0xff]  ;;  %v12799_v53 = vld [vmem:[#allocation184_spill] sm:$0xff] }
 0x193   :  { %v2913_v13 = vpop.f32.mrf.mxu1  ;;  %8436 = vmatprep.mubr.msk.f32.mxu0 %vm252_vm1, %v10683_v20 }
 0x194   :  { %v11265_v23 = vadd.f32 %v8191_v29, %v3209_v40  ;;  %v3208_v15 = vadd.f32 %v2913_v13, %v10675_v6  ;;  %v3515_v37 = vpop.f32.mrf.mxu0 }
 0x195   :  { %v8096_v19 = vpop.f32.mrf.mxu1  ;;  %8339 = vmatmul.mubr.msk.f32.gmra.mxu1 %vm252_vm1, %v12797_v61 }
 0x196   :  { %v11270_v24 = vadd.f32 %v3515_v37, %v3208_v15  ;;  %v3211_v51 = vadd.f32 %v8096_v19, %v10689_v57  ;;  %v8194_v18 = vpop.f32.mrf.mxu0  ;;  %8437 = vmatmul.mubr.msk.f32.gmra.mxu0 %vm252_vm1, %v10695_v0  ;;  %8341 = vmatprep.mubr.msk.f32.mxu1 %vm252_vm1, %v12798_v56  ;;  %v12800_v15 = vld [vmem:[#allocation101_spill] sm:$0xff]  ;;  %v12802_v19 = vld [vmem:[#allocation8_spill] sm:$0xff] }
 0x197   :  { %v2923_v20 = vpop.f32.mrf.mxu1  ;;  %8439 = vmatprep.mubr.msk.f32.mxu0 %vm252_vm1, %v10707_v22 }
 0x198   :  { %v11279_v6 = vadd.f32 %v8194_v18, %v3211_v51  ;;  %v3210_v40 = vadd.f32 %v2923_v20, %v12799_v53  ;;  %v3525_v29 = vpop.f32.mrf.mxu0  ;;  %v12803_v51 = vld [vmem:[#allocation186_spill] sm:$0xff]  ;;  %v12804_v20 = vld [vmem:[#allocation185_spill] sm:$0xff] }
 0x199   :  { %v8099_v13 = vpop.f32.mrf.mxu1  ;;  %8342 = vmatmul.mubr.msk.f32.gmra.mxu1 %vm252_vm1, %v12800_v15 }
 0x19a   :  { %v11284_v57 = vadd.f32 %v3525_v29, %v3210_v40  ;;  %v3213_v0 = vadd.f32 %v8099_v13, %v10713_v3  ;;  %v8197_v37 = vpop.f32.mrf.mxu0  ;;  %8440 = vmatmul.mubr.msk.f32.gmra.mxu0 %vm252_vm1, %v10719_v43  ;;  %8344 = vmatprep.mubr.msk.f32.mxu1 %vm252_vm1, %v12802_v19  ;;  %v12805_v29 = vld [vmem:[#allocation103_spill] sm:$0xff] }
 0x19b   :  { %v2933_v22 = vpop.f32.mrf.mxu1  ;;  %8442 = vmatprep.mubr.msk.f32.mxu0 %vm252_vm1, %v12803_v51  ;;  %v12809_v51 = vld [vmem:[#allocation187_spill] sm:$0xff] }
 0x19c   :  { %12801 = vst [vmem:[#allocation149_spill] sm:$0xff] %v11284_v57  ;;  %v11293_v18 = vadd.f32 %v8197_v37, %v3213_v0  ;;  %v3212_v53 = vadd.f32 %v2933_v22, %v12804_v20  ;;  %v3535_v15 = vpop.f32.mrf.mxu0  ;;  %v12807_v57 = vld [vmem:[#allocation10_spill] sm:$0xff]  ;;  %v12808_v37 = vld [vmem:[#allocation188_spill] sm:$0xff] }
 0x19d   :  { %v8102_v40 = vpop.f32.mrf.mxu1  ;;  %8345 = vmatmul.mubr.msk.f32.gmra.mxu1 %vm252_vm1, %v12805_v29 }
 0x19e   :  { %v11298_v3 = vadd.f32 %v3535_v15, %v3212_v53  ;;  %v3215_v43 = vadd.f32 %v8102_v40, %v10737_v14  ;;  %v8200_v13 = vpop.f32.mrf.mxu0  ;;  %8443 = vmatmul.mubr.msk.f32.gmra.mxu0 %vm252_vm1, %v10743_v49  ;;  %8347 = vmatprep.mubr.msk.f32.mxu1 %vm252_vm1, %v12807_v57  ;;  %v12810_v53 = vld [vmem:[#allocation105_spill] sm:$0xff] }
 0x19f   :  { %v2943_v0 = vpop.f32.mrf.mxu1  ;;  %8445 = vmatprep.mubr.msk.f32.mxu0 %vm252_vm1, %v12808_v37  ;;  %v12814_v37 = vld [vmem:[#allocation189_spill] sm:$0xff] }
 0x1a0   :  { %12806 = vst [vmem:[#allocation150_spill] sm:$0xff] %v11298_v3  ;;  %v11307_v22 = vadd.f32 %v8200_v13, %v3215_v43  ;;  %v3214_v20 = vadd.f32 %v2943_v0, %v12809_v51  ;;  %v3545_v29 = vpop.f32.mrf.mxu0  ;;  %v12812_v3 = vld [vmem:[#allocation12_spill] sm:$0xff]  ;;  %v12813_v13 = vld [vmem:[#allocation190_spill] sm:$0xff] }
 0x1a1   :  { %v8105_v15 = vpop.f32.mrf.mxu1  ;;  %8348 = vmatmul.mubr.msk.f32.gmra.mxu1 %vm252_vm1, %v12810_v53 }
 0x1a2   :  { %v11312_v14 = vadd.f32 %v3545_v29, %v3214_v20  ;;  %v3217_v49 = vadd.f32 %v8105_v15, %v10761_v30  ;;  %v8203_v40 = vpop.f32.mrf.mxu0  ;;  %8446 = vmatmul.mubr.msk.f32.gmra.mxu0 %vm252_vm1, %v10767_v41  ;;  %8350 = vmatprep.mubr.msk.f32.mxu1 %vm252_vm1, %v12812_v3  ;;  %v12815_v20 = vld [vmem:[#allocation107_spill] sm:$0xff] }
 0x1a3   :  { %v2953_v43 = vpop.f32.mrf.mxu1  ;;  %8448 = vmatprep.mubr.msk.f32.mxu0 %vm252_vm1, %v12813_v13  ;;  %v12819_v13 = vld [vmem:[#allocation191_spill] sm:$0xff] }
 0x1a4   :  { %12811 = vst [vmem:[#allocation155_spill] sm:$0xff] %v11312_v14  ;;  %v11321_v0 = vadd.f32 %v8203_v40, %v3217_v49  ;;  %v3216_v51 = vadd.f32 %v2953_v43, %v12814_v37  ;;  %v3555_v53 = vpop.f32.mrf.mxu0  ;;  %v12817_v14 = vld [vmem:[#allocation14_spill] sm:$0xff]  ;;  %v12818_v40 = vld [vmem:[#allocation192_spill] sm:$0xff] }
 0x1a5   :  { %v8108_v29 = vpop.f32.mrf.mxu1  ;;  %8351 = vmatmul.mubr.msk.f32.gmra.mxu1 %vm252_vm1, %v12815_v20 }
 0x1a6   :  { %v11326_v30 = vadd.f32 %v3555_v53, %v3216_v51  ;;  %v3219_v41 = vadd.f32 %v8108_v29, %v10785_v32  ;;  %v8206_v15 = vpop.f32.mrf.mxu0  ;;  %8449 = vmatmul.mubr.msk.f32.gmra.mxu0 %vm252_vm1, %v10791_v25  ;;  %8353 = vmatprep.mubr.msk.f32.mxu1 %vm252_vm1, %v12817_v14  ;;  %v12820_v51 = vld [vmem:[#allocation109_spill] sm:$0xff] }
 0x1a7   :  { %v2963_v49 = vpop.f32.mrf.mxu1  ;;  %8451 = vmatprep.mubr.msk.f32.mxu0 %vm252_vm1, %v12818_v40  ;;  %v12824_v40 = vld [vmem:[#allocation193_spill] sm:$0xff] }
 0x1a8   :  { %12816 = vst [vmem:[#allocation156_spill] sm:$0xff] %v11326_v30  ;;  %v11335_v43 = vadd.f32 %v8206_v15, %v3219_v41  ;;  %v3218_v37 = vadd.f32 %v2963_v49, %v12819_v13  ;;  %v3565_v20 = vpop.f32.mrf.mxu0  ;;  %v12822_v30 = vld [vmem:[#allocation16_spill] sm:$0xff]  ;;  %v12823_v15 = vld [vmem:[#allocation194_spill] sm:$0xff] }
 0x1a9   :  { %v8111_v53 = vpop.f32.mrf.mxu1  ;;  %8354 = vmatmul.mubr.msk.f32.gmra.mxu1 %vm252_vm1, %v12820_v51 }
 0x1aa   :  { %v11340_v32 = vadd.f32 %v3565_v20, %v3218_v37  ;;  %v3221_v25 = vadd.f32 %v8111_v53, %v10809_v8  ;;  %v8209_v29 = vpop.f32.mrf.mxu0  ;;  %8452 = vmatmul.mubr.msk.f32.gmra.mxu0 %vm252_vm1, %v10815_v31  ;;  %8356 = vmatprep.mubr.msk.f32.mxu1 %vm252_vm1, %v12822_v30  ;;  %v12825_v37 = vld [vmem:[#allocation111_spill] sm:$0xff] }
 0x1ab   :  { %v2973_v41 = vpop.f32.mrf.mxu1  ;;  %8454 = vmatprep.mubr.msk.f32.mxu0 %vm252_vm1, %v12823_v15 }
 0x1ac   :  { %12821 = vst [vmem:[#allocation153_spill] sm:$0xff] %v11340_v32  ;;  %v11349_v49 = vadd.f32 %v8209_v29, %v3221_v25  ;;  %v3220_v13 = vadd.f32 %v2973_v41, %v12824_v40  ;;  %v3575_v51 = vpop.f32.mrf.mxu0  ;;  %v12827_v32 = vld [vmem:[#allocation18_spill] sm:$0xff]  ;;  %v12828_v40 = vld [vmem:[#allocation113_spill] sm:$0xff] }
 0x1ad   :  { %v8114_v20 = vpop.f32.mrf.mxu1  ;;  %8357 = vmatmul.mubr.msk.f32.gmra.mxu1 %vm252_vm1, %v12825_v37 }
 0x1ae   :  { %v11354_v8 = vadd.f32 %v3575_v51, %v3220_v13  ;;  %v3223_v31 = vadd.f32 %v8114_v20, %v10833_v26  ;;  %v8212_v53 = vpop.f32.mrf.mxu0  ;;  %8455 = vmatmul.mubr.msk.f32.gmra.mxu0 %vm252_vm1, %v10839_v38  ;;  %8359 = vmatprep.mubr.msk.f32.mxu1 %vm252_vm1, %v12827_v32  ;;  %v12830_v20 = vld [vmem:[#allocation195_spill] sm:$0xff] }
 0x1af   :  { %v2983_v25 = vpop.f32.mrf.mxu1  ;;  %8457 = vmatprep.mubr.msk.f32.mxu0 %vm252_vm1, %v10851_v17 }
 0x1b0   :  { %12826 = vst [vmem:[#allocation154_spill] sm:$0xff] %v11354_v8  ;;  %v11363_v29 = vadd.f32 %v8212_v53, %v3223_v31  ;;  %v3222_v41 = vadd.f32 %v2983_v25, %v10843_v2  ;;  %v3585_v15 = vpop.f32.mrf.mxu0  ;;  %v12831_v8 = vld [vmem:[#allocation20_spill] sm:$0xff]  ;;  %v12832_v31 = vld [vmem:[#allocation197_spill] sm:$0xff] }
 0x1b1   :  { %v8117_v51 = vpop.f32.mrf.mxu1  ;;  %8360 = vmatmul.mubr.msk.f32.gmra.mxu1 %vm252_vm1, %v12828_v40  ;;  %v12833_v53 = vld [vmem:[#allocation196_spill] sm:$0xff] }
 0x1b2   :  { %v11368_v26 = vadd.f32 %v3585_v15, %v3222_v41  ;;  %v3225_v38 = vadd.f32 %v8117_v51, %v10857_v28  ;;  %v8215_v13 = vpop.f32.mrf.mxu0  ;;  %8458 = vmatmul.mubr.msk.f32.gmra.mxu0 %vm252_vm1, %v12830_v20  ;;  %8362 = vmatprep.mubr.msk.f32.mxu1 %vm252_vm1, %v12831_v8  ;;  %v12834_v15 = vld [vmem:[#allocation115_spill] sm:$0xff]  ;;  %v12837_v8 = vld [vmem:[#allocation22_spill] sm:$0xff] }
 0x1b3   :  { %v2993_v17 = vpop.f32.mrf.mxu1  ;;  %8460 = vmatprep.mubr.msk.f32.mxu0 %vm252_vm1, %v12832_v31 }
 0x1b4   :  { %12829 = vst [vmem:[#allocation159_spill] sm:$0xff] %v11368_v26  ;;  %v11377_v2 = vadd.f32 %v8215_v13, %v3225_v38  ;;  %v3224_v25 = vadd.f32 %v2993_v17, %v12833_v53  ;;  %v3595_v40 = vpop.f32.mrf.mxu0  ;;  %v12836_v26 = vld [vmem:[#allocation198_spill] sm:$0xff]  ;;  %v3937_v38 = vrot.slane %v10870_v42, 2  ;;  %v3938_v17 = vrot.slane %v10875_v9, 2 }
 0x1b5   :  { %v8120_v41 = vpop.f32.mrf.mxu1  ;;  %8363 = vmatmul.mubr.msk.f32.gmra.mxu1 %vm252_vm1, %v12834_v15 }
 0x1b6   :  { %v11382_v28 = vadd.f32 %v3595_v40, %v3224_v25  ;;  %v3227_v51 = vadd.f32 %v8120_v41, %v10891_v54  ;;  %v8218_v20 = vpop.f32.mrf.mxu0  ;;  %8461 = vmatmul.mubr.msk.f32.gmra.mxu0 %vm252_vm1, %v12836_v26  ;;  %8365 = vmatprep.mubr.msk.f32.mxu1 %vm252_vm1, %v12837_v8  ;;  %v12838_v40 = vld [vmem:[#allocation199_spill] sm:$0xff]  ;;  %v12839_v41 = vld [vmem:[#allocation117_spill] sm:$0xff] }
 0x1b7   :  { %v3003_v13 = vpop.f32.mrf.mxu1  ;;  %8463 = vmatprep.mubr.msk.f32.mxu0 %vm252_vm1, %v10916_v60  ;;  %v12841_v60 = vld [vmem:[#allocation119_spill] sm:$0xff] }
 0x1b8   :  { %12835 = vst [vmem:[#allocation160_spill] sm:$0xff] %v11382_v28  ;;  %v11393_v31 = vadd.f32 %v8218_v20, %v3227_v51  ;;  %v3226_v53 = vadd.f32 %v3003_v13, %v12838_v40  ;;  %v3605_v54 = vpop.f32.mrf.mxu0  ;;  %v3940_v51 = vrot.slane %v10899_v21, 2  ;;  %v11409_v13 = vsel %vm1865_vm3, %v3937_v38, %v3938_v17 }
 0x1b9   :  { %v8123_v25 = vpop.f32.mrf.mxu1  ;;  %8366 = vmatmul.mubr.msk.f32.gmra.mxu1 %vm252_vm1, %v12839_v41  ;;  %12842 = vst [vmem:[#allocation158_spill] sm:$0xff] %v11409_v13 }
 0x1ba   :  { %v11398_v26 = vadd.f32 %v3605_v54, %v3226_v53  ;;  %v3229_v28 = vadd.f32 %v8123_v25, %v10923_v10  ;;  %v8221_v8 = vpop.f32.mrf.mxu0  ;;  %8464 = vmatmul.mubr.msk.f32.gmra.mxu0 %vm252_vm1, %v10932_v27  ;;  %8368 = vmatprep.mubr.msk.f32.mxu1 %vm252_vm1, %v12841_v60  ;;  %v12843_v53 = vld [vmem:[#allocation201_spill] sm:$0xff]  ;;  %v11417_v27 = vld [vmem:[%s12147_s0 + $0x348] sm:$0xff] }
 0x1bb   :  { %v3013_v20 = vpop.f32.mrf.mxu1  ;;  %8466 = vmatprep.mubr.msk.f32.mxu0 %vm252_vm1, %v10870_v42 }
 0x1bc   :  { %12840 = vst [vmem:[#allocation157_spill] sm:$0xff] %v11398_v26  ;;  %v11411_v40 = vadd.f32 %v8221_v8, %v3229_v28  ;;  %v3228_v10 = vadd.f32 %v3013_v20, %v12843_v53  ;;  %v3615_v54 = vpop.f32.mrf.mxu0  ;;  %v12844_v26 = vld [vmem:[#allocation121_spill] sm:$0xff]  ;;  %v11429_v8 = vsel %vm1865_vm3, %v3938_v17, %v3940_v51  ;;  %v11436_v20 = vld [vmem:[%s12147_s0 + $0x350] sm:$0xff] }
 0x1bd   :  { %v8126_v25 = vpop.f32.mrf.mxu1  ;;  %8369 = vmatmul.mubr.msk.f32.gmra.mxu1 %vm252_vm1, %v12844_v26  ;;  %12846 = vst [vmem:[#allocation164_spill] sm:$0xff] %v11429_v8 }
 0x1be   :  { %v11421_v21 = vadd.f32 %v3615_v54, %v3228_v10  ;;  %v3231_v42 = vadd.f32 %v8126_v25, %v10948_v50  ;;  %v8224_v38 = vpop.f32.mrf.mxu0  ;;  %8467 = vmatmul.mubr.msk.f32.gmra.mxu0 %vm252_vm1, %v10875_v9  ;;  %8371 = vmatprep.mubr.msk.f32.mxu1 %vm252_vm1, %v11409_v13  ;;  %v12849_v25 = vld [vmem:[#allocation26_spill] sm:$0xff] }
 0x1bf   :  { %v3023_v28 = vpop.f32.mrf.mxu1  ;;  %8469 = vmatprep.mubr.msk.f32.mxu0 %vm252_vm1, %v11417_v27 }
 0x1c0   :  { %12845 = vst [vmem:[#allocation163_spill] sm:$0xff] %v11421_v21  ;;  %v11438_v50 = vadd.f32 %v8224_v38, %v3231_v42  ;;  %v3230_v53 = vadd.f32 %v3023_v28, %v10953_v58  ;;  %v3625_v9 = vpop.f32.mrf.mxu0  ;;  %v12851_v38 = vld [vmem:[#allocation24_spill] sm:$0xff]  ;;  %v12855_v21 = vld [vmem:[#allocation29_spill] sm:$0xff] }
 0x1c1   :  { %v8129_v10 = vpop.f32.mrf.mxu1  ;;  %8372 = vmatmul.mubr.msk.f32.gmra.mxu1 %vm252_vm1, %v11429_v8 }
 0x1c2   :  { %12847 = vst [vmem:[#allocation161_spill] sm:$0xff] %v11438_v50  ;;  %v11443_v17 = vadd.f32 %v3625_v9, %v3230_v53  ;;  %v3233_v51 = vadd.f32 %v8129_v10, %v10962_v52  ;;  %v8227_v54 = vpop.f32.mrf.mxu0  ;;  %8470 = vmatmul.mubr.msk.f32.gmra.mxu0 %vm252_vm1, %v11436_v20  ;;  %8474 = vmatprep.mubr.msk.f32.mxu1 %vm252_vm1, %v12849_v25  ;;  %v12852_v9 = vld [vmem:[#allocation28_spill] sm:$0xff]  ;;  %v12854_v10 = vld [vmem:[#allocation25_spill] sm:$0xff]  ;;  %v12856_v25 = vld [vmem:[#allocation30_spill] sm:$0xff] }
 0x1c3   :  { %v3033_v42 = vpop.f32.mrf.mxu1  ;;  %8572 = vmatprep.mubr.msk.f32.mxu0 %vm252_vm1, %v12669_v47 }
 0x1c4   :  { %12848 = vst [vmem:[#allocation162_spill] sm:$0xff] %v11443_v17  ;;  %v11452_v58 = vadd.f32 %v8227_v54, %v3233_v51  ;;  %v3232_v28 = vadd.f32 %v3033_v42, %v12851_v38  ;;  %v3635_v8 = vpop.f32.mrf.mxu0  ;;  %v12857_v51 = vld [vmem:[#allocation31_spill] sm:$0xff] }
 0x1c5   :  { %v8132_v53 = vpop.f32.mrf.mxu1  ;;  %8475 = vmatmul.mubr.msk.f32.vlgmr.msra.gmra.mxu1 %vm252_vm1, %v12852_v9  ;;  %v12859_v42 = vld [vmem:[#allocation27_spill] sm:$0xff] }
 0x1c6   :  { %12850 = vst [vmem:[#allocation167_spill] sm:$0xff] %v11452_v58  ;;  %v11457_v52 = vadd.f32 %v3635_v8, %v3232_v28  ;;  %v3235_v17 = vadd.f32 %v8132_v53, %v12854_v10  ;;  %v8230_v50 = vpop.f32.mrf.mxu0  ;;  %8573 = vmatmul.mubr.msk.f32.vlgmr.msra.gmra.mxu0 %vm252_vm1, %v12855_v21  ;;  %8477 = vmatprep.mubr.msk.f32.mxu1 %vm252_vm1, %v12856_v25  ;;  %v12860_v28 = vld [vmem:[#allocation32_spill] sm:$0xff]  ;;  %v12862_v10 = vld [vmem:[#allocation122_spill] sm:$0xff]  ;;  %v12863_v58 = vld [vmem:[#allocation33_spill] sm:$0xff] }
 0x1c7   :  { %v3043_v47 = vpop.f32.mrf.mxu1  ;;  %8575 = vmatprep.mubr.msk.f32.mxu0 %vm252_vm1, %v12857_v51  ;;  %v12864_v25 = vld [vmem:[#allocation34_spill] sm:$0xff]  ;;  %v12867_v51 = vld [vmem:[#allocation124_spill] sm:$0xff] }
 0x1c8   :  { %12853 = vst [vmem:[#allocation169_spill] sm:$0xff] %v11457_v52  ;;  %v11466_v54 = vadd.f32 %v8230_v50, %v3235_v17  ;;  %v3234_v38 = vadd.f32 %v3043_v47, %v12859_v42  ;;  %v3645_v9 = vpop.f32.mrf.mxu0  ;;  %v12865_v17 = vld [vmem:[#allocation35_spill] sm:$0xff] }
 0x1c9   :  { %v8135_v8 = vpop.f32.mrf.mxu1  ;;  %8478 = vmatmul.mubr.msk.f32.gmra.mxu1 %vm252_vm1, %v12860_v28 }
 0x1ca   :  { %12858 = vst [vmem:[#allocation165_spill] sm:$0xff] %v11466_v54  ;;  %v11471_v53 = vadd.f32 %v3645_v9, %v3234_v38  ;;  %v3237_v21 = vadd.f32 %v8135_v8, %v12862_v10  ;;  %v8233_v52 = vpop.f32.mrf.mxu0  ;;  %8576 = vmatmul.mubr.msk.f32.gmra.mxu0 %vm252_vm1, %v12863_v58  ;;  %8480 = vmatprep.mubr.msk.f32.mxu1 %vm252_vm1, %v12864_v25  ;;  %v12868_v9 = vld [vmem:[#allocation36_spill] sm:$0xff]  ;;  %v12870_v10 = vld [vmem:[#allocation123_spill] sm:$0xff]  ;;  %v12871_v54 = vld [vmem:[#allocation37_spill] sm:$0xff] }
 0x1cb   :  { %v3053_v50 = vpop.f32.mrf.mxu1  ;;  %8578 = vmatprep.mubr.msk.f32.mxu0 %vm252_vm1, %v12865_v17  ;;  %v12872_v25 = vld [vmem:[#allocation38_spill] sm:$0xff]  ;;  %v12875_v17 = vld [vmem:[#allocation127_spill] sm:$0xff] }
 0x1cc   :  { %12861 = vst [vmem:[#allocation166_spill] sm:$0xff] %v11471_v53  ;;  %v11480_v47 = vadd.f32 %v8233_v52, %v3237_v21  ;;  %v3236_v42 = vadd.f32 %v3053_v50, %v12867_v51  ;;  %v3655_v28 = vpop.f32.mrf.mxu0  ;;  %v12873_v21 = vld [vmem:[#allocation39_spill] sm:$0xff] }
 0x1cd   :  { %v8138_v38 = vpop.f32.mrf.mxu1  ;;  %8481 = vmatmul.mubr.msk.f32.gmra.mxu1 %vm252_vm1, %v12868_v9 }
 0x1ce   :  { %12866 = vst [vmem:[#allocation173_spill] sm:$0xff] %v11480_v47  ;;  %v11485_v8 = vadd.f32 %v3655_v28, %v3236_v42  ;;  %v3239_v58 = vadd.f32 %v8138_v38, %v12870_v10  ;;  %v8236_v53 = vpop.f32.mrf.mxu0  ;;  %8579 = vmatmul.mubr.msk.f32.gmra.mxu0 %vm252_vm1, %v12871_v54  ;;  %8483 = vmatprep.mubr.msk.f32.mxu1 %vm252_vm1, %v12872_v25  ;;  %v12876_v28 = vld [vmem:[#allocation40_spill] sm:$0xff]  ;;  %v12879_v47 = vld [vmem:[#allocation41_spill] sm:$0xff]  ;;  %v12880_v25 = vld [vmem:[#allocation42_spill] sm:$0xff] }
 0x1cf   :  { %v3063_v52 = vpop.f32.mrf.mxu1  ;;  %8581 = vmatprep.mubr.msk.f32.mxu0 %vm252_vm1, %v12873_v21  ;;  %v12878_v10 = vld [vmem:[#allocation128_spill] sm:$0xff]  ;;  %v12883_v21 = vld [vmem:[#allocation125_spill] sm:$0xff] }
 0x1d0   :  { %12869 = vst [vmem:[#allocation174_spill] sm:$0xff] %v11485_v8  ;;  %v11494_v50 = vadd.f32 %v8236_v53, %v3239_v58  ;;  %v3238_v51 = vadd.f32 %v3063_v52, %v12875_v17  ;;  %v3665_v9 = vpop.f32.mrf.mxu0  ;;  %v12881_v58 = vld [vmem:[#allocation43_spill] sm:$0xff] }
 0x1d1   :  { %v8141_v42 = vpop.f32.mrf.mxu1  ;;  %8484 = vmatmul.mubr.msk.f32.gmra.mxu1 %vm252_vm1, %v12876_v28 }
 0x1d2   :  { %12874 = vst [vmem:[#allocation168_spill] sm:$0xff] %v11494_v50  ;;  %v11499_v38 = vadd.f32 %v3665_v9, %v3238_v51  ;;  %v3241_v54 = vadd.f32 %v8141_v42, %v12878_v10  ;;  %v8239_v8 = vpop.f32.mrf.mxu0  ;;  %8582 = vmatmul.mubr.msk.f32.gmra.mxu0 %vm252_vm1, %v12879_v47  ;;  %8486 = vmatprep.mubr.msk.f32.mxu1 %vm252_vm1, %v12880_v25  ;;  %v12884_v9 = vld [vmem:[#allocation44_spill] sm:$0xff]  ;;  %v12886_v10 = vld [vmem:[#allocation126_spill] sm:$0xff]  ;;  %v12887_v50 = vld [vmem:[#allocation45_spill] sm:$0xff] }
 0x1d3   :  { %v3073_v53 = vpop.f32.mrf.mxu1  ;;  %8584 = vmatprep.mubr.msk.f32.mxu0 %vm252_vm1, %v12881_v58  ;;  %v12888_v25 = vld [vmem:[#allocation46_spill] sm:$0xff]  ;;  %v12891_v58 = vld [vmem:[#allocation131_spill] sm:$0xff] }
 0x1d4   :  { %12877 = vst [vmem:[#allocation170_spill] sm:$0xff] %v11499_v38  ;;  %v11508_v52 = vadd.f32 %v8239_v8, %v3241_v54  ;;  %v3240_v17 = vadd.f32 %v3073_v53, %v12883_v21  ;;  %v3675_v28 = vpop.f32.mrf.mxu0  ;;  %v12889_v54 = vld [vmem:[#allocation47_spill] sm:$0xff] }
 0x1d5   :  { %v8144_v51 = vpop.f32.mrf.mxu1  ;;  %8487 = vmatmul.mubr.msk.f32.gmra.mxu1 %vm252_vm1, %v12884_v9 }
 0x1d6   :  { %12882 = vst [vmem:[#allocation77_spill] sm:$0xff] %v11508_v52  ;;  %v11513_v42 = vadd.f32 %v3675_v28, %v3240_v17  ;;  %v3243_v47 = vadd.f32 %v8144_v51, %v12886_v10  ;;  %v8242_v38 = vpop.f32.mrf.mxu0  ;;  %8585 = vmatmul.mubr.msk.f32.gmra.mxu0 %vm252_vm1, %v12887_v50  ;;  %8489 = vmatprep.mubr.msk.f32.mxu1 %vm252_vm1, %v12888_v25  ;;  %v12892_v28 = vld [vmem:[#allocation48_spill] sm:$0xff]  ;;  %v12895_v52 = vld [vmem:[#allocation49_spill] sm:$0xff]  ;;  %v12896_v25 = vld [vmem:[#allocation50_spill] sm:$0xff] }
 0x1d7   :  { %v3083_v8 = vpop.f32.mrf.mxu1  ;;  %8587 = vmatprep.mubr.msk.f32.mxu0 %vm252_vm1, %v12889_v54  ;;  %v12894_v10 = vld [vmem:[#allocation132_spill] sm:$0xff]  ;;  %v12899_v54 = vld [vmem:[#allocation129_spill] sm:$0xff] }
 0x1d8   :  { %12885 = vst [vmem:[#allocation172_spill] sm:$0xff] %v11513_v42  ;;  %v11522_v53 = vadd.f32 %v8242_v38, %v3243_v47  ;;  %v3242_v21 = vadd.f32 %v3083_v8, %v12891_v58  ;;  %v3685_v9 = vpop.f32.mrf.mxu0  ;;  %v12897_v47 = vld [vmem:[#allocation51_spill] sm:$0xff] }
 0x1d9   :  { %v8147_v17 = vpop.f32.mrf.mxu1  ;;  %8490 = vmatmul.mubr.msk.f32.gmra.mxu1 %vm252_vm1, %v12892_v28 }
 0x1da   :  { %12890 = vst [vmem:[#allocation178_spill] sm:$0xff] %v11522_v53  ;;  %v11527_v51 = vadd.f32 %v3685_v9, %v3242_v21  ;;  %v3245_v50 = vadd.f32 %v8147_v17, %v12894_v10  ;;  %v8245_v42 = vpop.f32.mrf.mxu0  ;;  %8588 = vmatmul.mubr.msk.f32.gmra.mxu0 %vm252_vm1, %v12895_v52  ;;  %8492 = vmatprep.mubr.msk.f32.mxu1 %vm252_vm1, %v12896_v25  ;;  %v12900_v9 = vld [vmem:[#allocation52_spill] sm:$0xff]  ;;  %v12902_v10 = vld [vmem:[#allocation130_spill] sm:$0xff]  ;;  %v12903_v53 = vld [vmem:[#allocation53_spill] sm:$0xff] }
 0x1db   :  { %v3093_v38 = vpop.f32.mrf.mxu1  ;;  %8590 = vmatprep.mubr.msk.f32.mxu0 %vm252_vm1, %v12897_v47  ;;  %v12904_v25 = vld [vmem:[#allocation54_spill] sm:$0xff]  ;;  %v12907_v47 = vld [vmem:[#allocation135_spill] sm:$0xff] }
 0x1dc   :  { %12893 = vst [vmem:[#allocation171_spill] sm:$0xff] %v11527_v51  ;;  %v11536_v8 = vadd.f32 %v8245_v42, %v3245_v50  ;;  %v3244_v58 = vadd.f32 %v3093_v38, %v12899_v54  ;;  %v3695_v28 = vpop.f32.mrf.mxu0  ;;  %v12905_v50 = vld [vmem:[#allocation55_spill] sm:$0xff] }
 0x1dd   :  { %v8150_v21 = vpop.f32.mrf.mxu1  ;;  %8493 = vmatmul.mubr.msk.f32.gmra.mxu1 %vm252_vm1, %v12900_v9 }
 0x1de   :  { %12898 = vst [vmem:[#allocation175_spill] sm:$0xff] %v11536_v8  ;;  %v11541_v17 = vadd.f32 %v3695_v28, %v3244_v58  ;;  %v3247_v52 = vadd.f32 %v8150_v21, %v12902_v10  ;;  %v8248_v51 = vpop.f32.mrf.mxu0  ;;  %8591 = vmatmul.mubr.msk.f32.gmra.mxu0 %vm252_vm1, %v12903_v53  ;;  %8495 = vmatprep.mubr.msk.f32.mxu1 %vm252_vm1, %v12904_v25  ;;  %v12908_v28 = vld [vmem:[#allocation56_spill] sm:$0xff]  ;;  %v12911_v8 = vld [vmem:[#allocation57_spill] sm:$0xff]  ;;  %v12912_v25 = vld [vmem:[#allocation58_spill] sm:$0xff] }
 0x1df   :  { %v3103_v42 = vpop.f32.mrf.mxu1  ;;  %8593 = vmatprep.mubr.msk.f32.mxu0 %vm252_vm1, %v12905_v50  ;;  %v12910_v10 = vld [vmem:[#allocation136_spill] sm:$0xff]  ;;  %v12915_v50 = vld [vmem:[#allocation133_spill] sm:$0xff] }
 0x1e0   :  { %12901 = vst [vmem:[#allocation81_spill] sm:$0xff] %v11541_v17  ;;  %v11550_v38 = vadd.f32 %v8248_v51, %v3247_v52  ;;  %v3246_v54 = vadd.f32 %v3103_v42, %v12907_v47  ;;  %v3705_v9 = vpop.f32.mrf.mxu0  ;;  %v12913_v52 = vld [vmem:[#allocation59_spill] sm:$0xff] }
 0x1e1   :  { %v8153_v58 = vpop.f32.mrf.mxu1  ;;  %8496 = vmatmul.mubr.msk.f32.gmra.mxu1 %vm252_vm1, %v12908_v28 }
 0x1e2   :  { %12906 = vst [vmem:[#allocation177_spill] sm:$0xff] %v11550_v38  ;;  %v11555_v21 = vadd.f32 %v3705_v9, %v3246_v54  ;;  %v3249_v53 = vadd.f32 %v8153_v58, %v12910_v10  ;;  %v8251_v17 = vpop.f32.mrf.mxu0  ;;  %8594 = vmatmul.mubr.msk.f32.gmra.mxu0 %vm252_vm1, %v12911_v8  ;;  %8498 = vmatprep.mubr.msk.f32.mxu1 %vm252_vm1, %v12912_v25  ;;  %v12916_v9 = vld [vmem:[#allocation60_spill] sm:$0xff]  ;;  %v12918_v10 = vld [vmem:[#allocation134_spill] sm:$0xff]  ;;  %v12919_v38 = vld [vmem:[#allocation61_spill] sm:$0xff] }
 0x1e3   :  { %v3113_v51 = vpop.f32.mrf.mxu1  ;;  %8596 = vmatprep.mubr.msk.f32.mxu0 %vm252_vm1, %v12913_v52  ;;  %v12920_v25 = vld [vmem:[#allocation62_spill] sm:$0xff]  ;;  %v12923_v52 = vld [vmem:[#allocation139_spill] sm:$0xff] }
 0x1e4   :  { %12909 = vst [vmem:[#allocation179_spill] sm:$0xff] %v11555_v21  ;;  %v11564_v42 = vadd.f32 %v8251_v17, %v3249_v53  ;;  %v3248_v47 = vadd.f32 %v3113_v51, %v12915_v50  ;;  %v3715_v28 = vpop.f32.mrf.mxu0  ;;  %v12921_v53 = vld [vmem:[#allocation63_spill] sm:$0xff] }
 0x1e5   :  { %v8156_v54 = vpop.f32.mrf.mxu1  ;;  %8499 = vmatmul.mubr.msk.f32.gmra.mxu1 %vm252_vm1, %v12916_v9 }
 0x1e6   :  { %12914 = vst [vmem:[#allocation181_spill] sm:$0xff] %v11564_v42  ;;  %v11569_v58 = vadd.f32 %v3715_v28, %v3248_v47  ;;  %v3251_v8 = vadd.f32 %v8156_v54, %v12918_v10  ;;  %v8254_v21 = vpop.f32.mrf.mxu0  ;;  %8597 = vmatmul.mubr.msk.f32.gmra.mxu0 %vm252_vm1, %v12919_v38  ;;  %8501 = vmatprep.mubr.msk.f32.mxu1 %vm252_vm1, %v12920_v25  ;;  %v12924_v28 = vld [vmem:[#allocation64_spill] sm:$0xff]  ;;  %v12927_v42 = vld [vmem:[#allocation65_spill] sm:$0xff]  ;;  %v12928_v25 = vld [vmem:[#allocation66_spill] sm:$0xff] }
 0x1e7   :  { %v3123_v17 = vpop.f32.mrf.mxu1  ;;  %8599 = vmatprep.mubr.msk.f32.mxu0 %vm252_vm1, %v12921_v53  ;;  %v12926_v10 = vld [vmem:[#allocation140_spill] sm:$0xff]  ;;  %v12931_v53 = vld [vmem:[#allocation137_spill] sm:$0xff] }
 0x1e8   :  { %12917 = vst [vmem:[#allocation82_spill] sm:$0xff] %v11569_v58  ;;  %v11578_v51 = vadd.f32 %v8254_v21, %v3251_v8  ;;  %v3250_v50 = vadd.f32 %v3123_v17, %v12923_v52  ;;  %v3725_v9 = vpop.f32.mrf.mxu0  ;;  %v12929_v8 = vld [vmem:[#allocation67_spill] sm:$0xff] }
 0x1e9   :  { %v8159_v47 = vpop.f32.mrf.mxu1  ;;  %8502 = vmatmul.mubr.msk.f32.gmra.mxu1 %vm252_vm1, %v12924_v28 }
 0x1ea   :  { %12922 = vst [vmem:[#allocation183_spill] sm:$0xff] %v11578_v51  ;;  %v11583_v54 = vadd.f32 %v3725_v9, %v3250_v50  ;;  %v3253_v38 = vadd.f32 %v8159_v47, %v12926_v10  ;;  %v8257_v58 = vpop.f32.mrf.mxu0  ;;  %8600 = vmatmul.mubr.msk.f32.gmra.mxu0 %vm252_vm1, %v12927_v42  ;;  %8504 = vmatprep.mubr.msk.f32.mxu1 %vm252_vm1, %v12928_v25  ;;  %v12932_v9 = vld [vmem:[#allocation68_spill] sm:$0xff]  ;;  %v12934_v10 = vld [vmem:[#allocation138_spill] sm:$0xff]  ;;  %v12935_v51 = vld [vmem:[#allocation69_spill] sm:$0xff] }
 0x1eb   :  { %v3133_v21 = vpop.f32.mrf.mxu1  ;;  %8602 = vmatprep.mubr.msk.f32.mxu0 %vm252_vm1, %v12929_v8  ;;  %v12936_v25 = vld [vmem:[#allocation70_spill] sm:$0xff]  ;;  %v12939_v8 = vld [vmem:[#allocation143_spill] sm:$0xff] }
 0x1ec   :  { %12925 = vst [vmem:[#allocation182_spill] sm:$0xff] %v11583_v54  ;;  %v11592_v17 = vadd.f32 %v8257_v58, %v3253_v38  ;;  %v3252_v52 = vadd.f32 %v3133_v21, %v12931_v53  ;;  %v3735_v28 = vpop.f32.mrf.mxu0  ;;  %v12937_v38 = vld [vmem:[#allocation71_spill] sm:$0xff] }
 0x1ed   :  { %v8162_v50 = vpop.f32.mrf.mxu1  ;;  %8505 = vmatmul.mubr.msk.f32.gmra.mxu1 %vm252_vm1, %v12932_v9 }
 0x1ee   :  { %12930 = vst [vmem:[#allocation83_spill] sm:$0xff] %v11592_v17  ;;  %v11597_v47 = vadd.f32 %v3735_v28, %v3252_v52  ;;  %v3255_v42 = vadd.f32 %v8162_v50, %v12934_v10  ;;  %v8260_v54 = vpop.f32.mrf.mxu0  ;;  %8603 = vmatmul.mubr.msk.f32.gmra.mxu0 %vm252_vm1, %v12935_v51  ;;  %8507 = vmatprep.mubr.msk.f32.mxu1 %vm252_vm1, %v12936_v25  ;;  %v12940_v28 = vld [vmem:[#allocation72_spill] sm:$0xff]  ;;  %v12943_v17 = vld [vmem:[#allocation73_spill] sm:$0xff]  ;;  %v12944_v25 = vld [vmem:[#allocation74_spill] sm:$0xff] }
 0x1ef   :  { %v3143_v58 = vpop.f32.mrf.mxu1  ;;  %8605 = vmatprep.mubr.msk.f32.mxu0 %vm252_vm1, %v12937_v38  ;;  %v12942_v10 = vld [vmem:[#allocation144_spill] sm:$0xff]  ;;  %v12947_v38 = vld [vmem:[#allocation141_spill] sm:$0xff] }
 0x1f0   :  { %12933 = vst [vmem:[#allocation85_spill] sm:$0xff] %v11597_v47  ;;  %v11606_v21 = vadd.f32 %v8260_v54, %v3255_v42  ;;  %v3254_v53 = vadd.f32 %v3143_v58, %v12939_v8  ;;  %v3745_v9 = vpop.f32.mrf.mxu0  ;;  %v12945_v42 = vld [vmem:[#allocation75_spill] sm:$0xff] }
 0x1f1   :  { %v8165_v52 = vpop.f32.mrf.mxu1  ;;  %8508 = vmatmul.mubr.msk.f32.gmra.mxu1 %vm252_vm1, %v12940_v28 }
 0x1f2   :  { %12938 = vst [vmem:[#allocation87_spill] sm:$0xff] %v11606_v21  ;;  %v11611_v50 = vadd.f32 %v3745_v9, %v3254_v53  ;;  %v3257_v51 = vadd.f32 %v8165_v52, %v12942_v10  ;;  %v8263_v47 = vpop.f32.mrf.mxu0  ;;  %8606 = vmatmul.mubr.msk.f32.gmra.mxu0 %vm252_vm1, %v12943_v17  ;;  %8510 = vmatprep.mubr.msk.f32.mxu1 %vm252_vm1, %v12944_v25  ;;  %v12948_v9 = vld [vmem:[#allocation76_spill] sm:$0xff]  ;;  %v12950_v10 = vld [vmem:[#allocation142_spill] sm:$0xff] }
 0x1f3   :  { %v3153_v54 = vpop.f32.mrf.mxu1  ;;  %8608 = vmatprep.mubr.msk.f32.mxu0 %vm252_vm1, %v12945_v42  ;;  %v12951_v25 = vld [vmem:[#allocation78_spill] sm:$0xff]  ;;  %v5129_v42 = vrot.slane %v11193_v39, 1 }
 0x1f4   :  { %12941 = vst [vmem:[#allocation89_spill] sm:$0xff] %v11611_v50  ;;  %v11620_v58 = vadd.f32 %v8263_v47, %v3257_v51  ;;  %v3256_v8 = vadd.f32 %v3153_v54, %v12947_v38  ;;  %v3755_v28 = vpop.f32.mrf.mxu0  ;;  %v5128_v47 = vrot.slane %v11174_v7, 1  ;;  %v12952_v54 = vld [vmem:[#allocation79_spill] sm:$0xff] }
 0x1f5   :  { %v8168_v53 = vpop.f32.mrf.mxu1  ;;  %8511 = vmatmul.mubr.msk.f32.gmra.mxu1 %vm252_vm1, %v12948_v9  ;;  %v68_v38 = vld [vmem:[%s12147_s0 + $0x1a8] sm:$0x3] }
 0x1f6   :  { %12946 = vst [vmem:[#allocation91_spill] sm:$0xff] %v11620_v58  ;;  %v11625_v52 = vadd.f32 %v3755_v28, %v3256_v8  ;;  %v3259_v17 = vadd.f32 %v8168_v53, %v12950_v10  ;;  %v8266_v50 = vpop.f32.mrf.mxu0  ;;  %8609 = vmatmul.mubr.msk.f32.gmra.mxu0 %vm252_vm1, %v12770_v36  ;;  %8513 = vmatprep.mubr.msk.f32.mxu1 %vm252_vm1, %v12951_v25  ;;  %v5728_v8 = vrot.slane %v11174_v7, 2  ;;  %v12954_v36 = vld [vmem:[#allocation147_spill] sm:$0xff]  ;;  %v5729_v10 = vrot.slane %v11193_v39, 2  ;;  %v12957_v7 = vld [vmem:[#allocation176_spill] sm:$0xff] }
 0x1f7   :  { %v3163_v51 = vpop.f32.mrf.mxu1  ;;  %8611 = vmatprep.mubr.msk.f32.mxu0 %vm252_vm1, %v12952_v54  ;;  %v5130_v39 = vsel %vm994_vm2, %v5128_v47, %v5129_v42 }
 0x1f8   :  { %12949 = vst [vmem:[#allocation93_spill] sm:$0xff] %v11625_v52  ;;  %v11640_v28 = vadd.f32 %v8266_v50, %v3259_v17  ;;  %v3258_v53 = vadd.f32 %v3163_v51, %v12954_v36  ;;  %v3765_v9 = vpop.f32.mrf.mxu0  ;;  %v12955_v52 = vld [vmem:[#allocation80_spill] sm:$0xff]  ;;  %v5131_v50 = vrot.slane %v68_v38, 1  ;;  %v5731_v36 = vrot.slane %v68_v38, 2 }
 0x1f9   :  { %v8171_v25 = vpop.f32.mrf.mxu1  ;;  %8514 = vmatmul.mubr.msk.f32.gmra.mxu1 %vm252_vm1, %v12955_v52  ;;  %v12958_v51 = vld [vmem:[#allocation148_spill] sm:$0xff] }
 0x1fa   :  { %12953 = vst [vmem:[#allocation95_spill] sm:$0xff] %v11640_v28  ;;  %v11646_v54 = vadd.f32 %v3765_v9, %v3258_v53  ;;  %v3261_v58 = vadd.f32 %v8171_v25, %v11168_v35  ;;  %v8269_v21 = vpop.f32.mrf.mxu0  ;;  %8612 = vmatmul.mubr.msk.f32.gmra.mxu0 %vm252_vm1, %v12778_v12  ;;  %8516 = vmatprep.mubr.msk.f32.mxu1 %vm252_vm1, %v12957_v7  ;;  %v12959_v53 = vld [vmem:[#allocation145_spill] sm:$0xff]  ;;  %v12960_v12 = vld [vmem:[#allocation180_spill] sm:$0xff]  ;;  %v12961_v28 = vld [vmem:[#allocation151_spill] sm:$0xff] }
 0x1fb   :  { %v3173_v17 = vpop.f32.mrf.mxu1  ;;  %8614 = vmatprep.mubr.msk.f32.mxu0 %vm252_vm1, %v12958_v51  ;;  %v5730_v25 = vsel %vm1865_vm3, %v5728_v8, %v5729_v10  ;;  %v12962_v51 = vld [vmem:[#allocation146_spill] sm:$0xff]  ;;  %v5732_v47 = vsel %vm1865_vm3, %v5729_v10, %v5731_v36  ;;  %v12963_v8 = vld [vmem:[#allocation152_spill] sm:$0xff] }
 0x1fc   :  { %12956 = vst [vmem:[#allocation97_spill] sm:$0xff] %v11646_v54  ;;  %v11656_v52 = vadd.f32 %v8269_v21, %v3261_v58  ;;  %v3260_v9 = vadd.f32 %v3173_v17, %v12959_v53  ;;  %v3775_v35 = vpop.f32.mrf.mxu0  ;;  %v5132_v21 = vsel %vm994_vm2, %v5129_v42, %v5131_v50  ;;  %v12964_v42 = vld [vmem:[#allocation84_spill] sm:$0xff] }
 0x1fd   :  { %v8174_v54 = vpop.f32.mrf.mxu1  ;;  %8517 = vmatmul.mubr.msk.f32.gmra.mxu1 %vm252_vm1, %v12960_v12 }
 0x1fe   :  { %v11662_v7 = vadd.f32 %v3775_v35, %v3260_v9  ;;  %v3263_v13 = vadd.f32 %v8174_v54, %v12961_v28  ;;  %v8272_v26 = vpop.f32.mrf.mxu0  ;;  %8615 = vmatmul.mubr.msk.f32.gmra.mxu0 %vm252_vm1, %v12962_v51  ;;  %8519 = vmatprep.mubr.msk.f32.mxu1 %vm252_vm1, %v5130_v39  ;;  %v12965_v35 = vld [vmem:[#allocation86_spill] sm:$0xff]  ;;  %v12966_v51 = vld [vmem:[#allocation88_spill] sm:$0xff] }
 0x1ff   :  { %v3183_v58 = vpop.f32.mrf.mxu1  ;;  %8617 = vmatprep.mubr.msk.f32.mxu0 %vm252_vm1, %v5730_v25 }
 0x200   :  { %v11671_v38 = vadd.f32 %v8272_v26, %v3263_v13  ;;  %v3262_v17 = vadd.f32 %v3183_v58, %v12963_v8  ;;  %v3785_v53 = vpop.f32.mrf.mxu0  ;;  %v12967_v8 = vld [vmem:[#allocation90_spill] sm:$0xff] }
 0x201   :  { %v8177_v9 = vpop.f32.mrf.mxu1  ;;  %8520 = vmatmul.mubr.msk.f32.gmra.mxu1 %vm252_vm1, %v5132_v21 }
 0x202   :  { %v11675_v28 = vadd.f32 %v3785_v53, %v3262_v17  ;;  %v3265_v54 = vadd.f32 %v8177_v9, %v11209_v46  ;;  %v8275_v39 = vpop.f32.mrf.mxu0  ;;  %8618 = vmatmul.mubr.msk.f32.gmra.mxu0 %vm252_vm1, %v5732_v47  ;;  %8522 = vmatprep.mubr.msk.f32.mxu1 %vm252_vm1, %v12964_v42  ;;  %v12968_v53 = vld [vmem:[#allocation92_spill] sm:$0xff]  ;;  %v12969_v42 = vld [vmem:[#allocation94_spill] sm:$0xff] }
 0x203   :  { %v3193_v50 = vpop.f32.mrf.mxu1  ;;  %8620 = vmatprep.mubr.msk.f32.mxu0 %vm252_vm1, %v12790_v5 }
 0x204   :  { %v11683_v26 = vadd.f32 %v8275_v39, %v3265_v54  ;;  %v3264_v13 = vadd.f32 %v3193_v50, %v11214_v59  ;;  %v3795_v10 = vpop.f32.mrf.mxu0 }
 0x205   :  { %v8280_v36 = vpop.f32.mrf.mxu1  ;;  %8523 = vmatmul.mubr.msk.f32.gmra.mxu1 %vm252_vm1, %v12965_v35 }
 0x206   :  { %v11688_v46 = vadd.f32 %v3795_v10, %v3264_v13  ;;  %v4405_v25 = vadd.f32 %v8280_v36, %v11223_v62  ;;  %v8378_v12 = vpop.f32.mrf.mxu0  ;;  %8621 = vmatmul.mubr.msk.f32.gmra.mxu0 %vm252_vm1, %v12791_v16  ;;  %8525 = vmatprep.mubr.msk.f32.mxu1 %vm252_vm1, %v12966_v51  ;;  %v12970_v13 = vld [vmem:[#allocation96_spill] sm:$0xff] }
 0x207   :  { %v4085_v5 = vpop.f32.mrf.mxu1  ;;  %8623 = vmatprep.mubr.msk.f32.mxu0 %vm252_vm1, %v12792_v1  ;;  %v12972_v51 = vld [vmem:[#allocation100_spill] sm:$0xff] }
 0x208   :  { %v11697_v59 = vadd.f32 %v8378_v12, %v4405_v25  ;;  %v4404_v21 = vadd.f32 %v4085_v5, %v11228_v63  ;;  %v4679_v58 = vpop.f32.mrf.mxu0  ;;  %v12971_v25 = vld [vmem:[#allocation98_spill] sm:$0xff] }
 0x209   :  { %v8283_v47 = vpop.f32.mrf.mxu1  ;;  %8526 = vmatmul.mubr.msk.f32.gmra.mxu1 %vm252_vm1, %v12967_v8 }
 0x20a   :  { %v11702_v62 = vadd.f32 %v4679_v58, %v4404_v21  ;;  %v4407_v16 = vadd.f32 %v8283_v47, %v11237_v4  ;;  %v8381_v17 = vpop.f32.mrf.mxu0  ;;  %8624 = vmatmul.mubr.msk.f32.gmra.mxu0 %vm252_vm1, %v12793_v48  ;;  %8528 = vmatprep.mubr.msk.f32.mxu1 %vm252_vm1, %v12968_v53  ;;  %v12973_v47 = vld [vmem:[#allocation7_spill] sm:$0xff]  ;;  %v12976_v53 = vld [vmem:[#allocation149_spill] sm:$0xff] }
 0x20b   :  { %v4095_v1 = vpop.f32.mrf.mxu1  ;;  %8626 = vmatprep.mubr.msk.f32.mxu0 %vm252_vm1, %v12794_v44 }
 0x20c   :  { %v11711_v63 = vadd.f32 %v8381_v17, %v4407_v16  ;;  %v4406_v9 = vadd.f32 %v4095_v1, %v11242_v45  ;;  %v4689_v54 = vpop.f32.mrf.mxu0  ;;  %v12974_v16 = vld [vmem:[#allocation101_spill] sm:$0xff]  ;;  %v12975_v17 = vld [vmem:[#allocation102_spill] sm:$0xff] }
 0x20d   :  { %v8286_v39 = vpop.f32.mrf.mxu1  ;;  %8529 = vmatmul.mubr.msk.f32.gmra.mxu1 %vm252_vm1, %v12969_v42 }
 0x20e   :  { %v11716_v4 = vadd.f32 %v4689_v54, %v4406_v9  ;;  %v4409_v48 = vadd.f32 %v8286_v39, %v11251_v34  ;;  %v8384_v50 = vpop.f32.mrf.mxu0  ;;  %8627 = vmatmul.mubr.msk.f32.gmra.mxu0 %vm252_vm1, %v12795_v55  ;;  %8531 = vmatprep.mubr.msk.f32.mxu1 %vm252_vm1, %v12970_v13  ;;  %v12977_v39 = vld [vmem:[#allocation9_spill] sm:$0xff]  ;;  %v12979_v13 = vld [vmem:[#allocation104_spill] sm:$0xff] }
 0x20f   :  { %v4105_v44 = vpop.f32.mrf.mxu1  ;;  %8629 = vmatprep.mubr.msk.f32.mxu0 %vm252_vm1, %v12796_v11 }
 0x210   :  { %v11725_v45 = vadd.f32 %v8384_v50, %v4409_v48  ;;  %v4408_v10 = vadd.f32 %v4105_v44, %v11256_v33  ;;  %v4699_v36 = vpop.f32.mrf.mxu0  ;;  %v12978_v50 = vld [vmem:[#allocation103_spill] sm:$0xff] }
 0x211   :  { %v8289_v35 = vpop.f32.mrf.mxu1  ;;  %8532 = vmatmul.mubr.msk.f32.gmra.mxu1 %vm252_vm1, %v12971_v25 }
 0x212   :  { %v11730_v34 = vadd.f32 %v4699_v36, %v4408_v10  ;;  %v4411_v55 = vadd.f32 %v8289_v35, %v11265_v23  ;;  %v8387_v12 = vpop.f32.mrf.mxu0  ;;  %8630 = vmatmul.mubr.msk.f32.gmra.mxu0 %vm252_vm1, %v12797_v61  ;;  %8534 = vmatprep.mubr.msk.f32.mxu1 %vm252_vm1, %v12972_v51  ;;  %v12980_v10 = vld [vmem:[#allocation150_spill] sm:$0xff] }
 0x213   :  { %v4115_v11 = vpop.f32.mrf.mxu1  ;;  %8632 = vmatprep.mubr.msk.f32.mxu0 %vm252_vm1, %v12798_v56 }
 0x214   :  { %v11739_v33 = vadd.f32 %v8387_v12, %v4411_v55  ;;  %v4410_v5 = vadd.f32 %v4115_v11, %v11270_v24  ;;  %v4709_v21 = vpop.f32.mrf.mxu0  ;;  %v12981_v55 = vld [vmem:[#allocation11_spill] sm:$0xff]  ;;  %v12982_v11 = vld [vmem:[#allocation105_spill] sm:$0xff] }
 0x215   :  { %v8292_v58 = vpop.f32.mrf.mxu1  ;;  %8535 = vmatmul.mubr.msk.f32.gmra.mxu1 %vm252_vm1, %v12973_v47 }
 0x216   :  { %v11744_v23 = vadd.f32 %v4709_v21, %v4410_v5  ;;  %v4413_v61 = vadd.f32 %v8292_v58, %v11279_v6  ;;  %v8390_v8 = vpop.f32.mrf.mxu0  ;;  %8633 = vmatmul.mubr.msk.f32.gmra.mxu0 %vm252_vm1, %v12974_v16  ;;  %8537 = vmatprep.mubr.msk.f32.mxu1 %vm252_vm1, %v12975_v17  ;;  %v12983_v5 = vld [vmem:[#allocation106_spill] sm:$0xff]  ;;  %v12984_v58 = vld [vmem:[#allocation155_spill] sm:$0xff]  ;;  %v12985_v16 = vld [vmem:[#allocation13_spill] sm:$0xff] }
 0x217   :  { %v4125_v56 = vpop.f32.mrf.mxu1  ;;  %8635 = vmatprep.mubr.msk.f32.mxu0 %vm252_vm1, %v12802_v19 }
 0x218   :  { %v11753_v24 = vadd.f32 %v8390_v8, %v4413_v61  ;;  %v4412_v1 = vadd.f32 %v4125_v56, %v12976_v53  ;;  %v4719_v9 = vpop.f32.mrf.mxu0  ;;  %v12986_v53 = vld [vmem:[#allocation107_spill] sm:$0xff] }
 0x219   :  { %v8295_v54 = vpop.f32.mrf.mxu1  ;;  %8538 = vmatmul.mubr.msk.f32.gmra.mxu1 %vm252_vm1, %v12977_v39 }
 0x21a   :  { %v11758_v6 = vadd.f32 %v4719_v9, %v4412_v1  ;;  %v4415_v42 = vadd.f32 %v8295_v54, %v11293_v18  ;;  %v8393_v48 = vpop.f32.mrf.mxu0  ;;  %8636 = vmatmul.mubr.msk.f32.gmra.mxu0 %vm252_vm1, %v12978_v50  ;;  %8540 = vmatprep.mubr.msk.f32.mxu1 %vm252_vm1, %v12979_v13  ;;  %v12987_v1 = vld [vmem:[#allocation108_spill] sm:$0xff]  ;;  %v12989_v50 = vld [vmem:[#allocation15_spill] sm:$0xff] }
 0x21b   :  { %v4135_v19 = vpop.f32.mrf.mxu1  ;;  %8638 = vmatprep.mubr.msk.f32.mxu0 %vm252_vm1, %v12807_v57  ;;  %v12988_v54 = vld [vmem:[#allocation156_spill] sm:$0xff] }
 0x21c   :  { %v11767_v44 = vadd.f32 %v8393_v48, %v4415_v42  ;;  %v4414_v36 = vadd.f32 %v4135_v19, %v12980_v10  ;;  %v4729_v35 = vpop.f32.mrf.mxu0  ;;  %v12990_v10 = vld [vmem:[#allocation109_spill] sm:$0xff] }
 0x21d   :  { %v8298_v25 = vpop.f32.mrf.mxu1  ;;  %8541 = vmatmul.mubr.msk.f32.gmra.mxu1 %vm252_vm1, %v12981_v55 }
 0x21e   :  { %v11772_v18 = vadd.f32 %v4729_v35, %v4414_v36  ;;  %v4417_v12 = vadd.f32 %v8298_v25, %v11307_v22  ;;  %v8396_v51 = vpop.f32.mrf.mxu0  ;;  %8639 = vmatmul.mubr.msk.f32.gmra.mxu0 %vm252_vm1, %v12982_v11  ;;  %8543 = vmatprep.mubr.msk.f32.mxu1 %vm252_vm1, %v12983_v5  ;;  %v12991_v36 = vld [vmem:[#allocation110_spill] sm:$0xff]  ;;  %v12992_v25 = vld [vmem:[#allocation153_spill] sm:$0xff] }
 0x21f   :  { %v4145_v57 = vpop.f32.mrf.mxu1  ;;  %8641 = vmatprep.mubr.msk.f32.mxu0 %vm252_vm1, %v12812_v3  ;;  %v12993_v11 = vld [vmem:[#allocation17_spill] sm:$0xff] }
 0x220   :  { %v11781_v21 = vadd.f32 %v8396_v51, %v4417_v12  ;;  %v4416_v47 = vadd.f32 %v4145_v57, %v12984_v58  ;;  %v4739_v61 = vpop.f32.mrf.mxu0  ;;  %v12994_v58 = vld [vmem:[#allocation112_spill] sm:$0xff] }
 0x221   :  { %v8301_v8 = vpop.f32.mrf.mxu1  ;;  %8544 = vmatmul.mubr.msk.f32.gmra.mxu1 %vm252_vm1, %v12985_v16 }
 0x222   :  { %v11786_v22 = vadd.f32 %v4739_v61, %v4416_v47  ;;  %v4419_v17 = vadd.f32 %v8301_v8, %v11321_v0  ;;  %v8399_v56 = vpop.f32.mrf.mxu0  ;;  %8642 = vmatmul.mubr.msk.f32.gmra.mxu0 %vm252_vm1, %v12986_v53  ;;  %8546 = vmatprep.mubr.msk.f32.mxu1 %vm252_vm1, %v12987_v1  ;;  %v12995_v61 = vld [vmem:[#allocation154_spill] sm:$0xff]  ;;  %v12997_v1 = vld [vmem:[#allocation113_spill] sm:$0xff] }
 0x223   :  { %v4155_v3 = vpop.f32.mrf.mxu1  ;;  %8644 = vmatprep.mubr.msk.f32.mxu0 %vm252_vm1, %v12817_v14 }
 0x224   :  { %v11795_v9 = vadd.f32 %v8399_v56, %v4419_v17  ;;  %v4418_v39 = vadd.f32 %v4155_v3, %v12988_v54  ;;  %v4749_v42 = vpop.f32.mrf.mxu0  ;;  %v12996_v56 = vld [vmem:[#allocation19_spill] sm:$0xff]  ;;  %v12998_v3 = vld [vmem:[#allocation114_spill] sm:$0xff]  ;;  %v12999_v54 = vld [vmem:[#allocation20_spill] sm:$0xff] }
 0x225   :  { %v8304_v48 = vpop.f32.mrf.mxu1  ;;  %8547 = vmatmul.mubr.msk.f32.gmra.mxu1 %vm252_vm1, %v12989_v50 }
 0x226   :  { %v11800_v0 = vadd.f32 %v4749_v42, %v4418_v39  ;;  %v4421_v13 = vadd.f32 %v8304_v48, %v11335_v43  ;;  %v8402_v19 = vpop.f32.mrf.mxu0  ;;  %8645 = vmatmul.mubr.msk.f32.gmra.mxu0 %vm252_vm1, %v12990_v10  ;;  %8549 = vmatprep.mubr.msk.f32.mxu1 %vm252_vm1, %v12991_v36  ;;  %v13000_v42 = vld [vmem:[#allocation159_spill] sm:$0xff] }
 0x227   :  { %v4165_v14 = vpop.f32.mrf.mxu1  ;;  %8647 = vmatprep.mubr.msk.f32.mxu0 %vm252_vm1, %v12822_v30 }
 0x228   :  { %v11809_v35 = vadd.f32 %v8402_v19, %v4421_v13  ;;  %v4420_v55 = vadd.f32 %v4165_v14, %v12992_v25  ;;  %v4759_v12 = vpop.f32.mrf.mxu0  ;;  %v13001_v19 = vld [vmem:[#allocation21_spill] sm:$0xff]  ;;  %v13002_v14 = vld [vmem:[#allocation116_spill] sm:$0xff] }
 0x229   :  { %v8307_v51 = vpop.f32.mrf.mxu1  ;;  %8550 = vmatmul.mubr.msk.f32.gmra.mxu1 %vm252_vm1, %v12993_v11 }
 0x22a   :  { %v11814_v43 = vadd.f32 %v4759_v12, %v4420_v55  ;;  %v4423_v5 = vadd.f32 %v8307_v51, %v11349_v49  ;;  %v8405_v57 = vpop.f32.mrf.mxu0  ;;  %8648 = vmatmul.mubr.msk.f32.gmra.mxu0 %vm252_vm1, %v12825_v37  ;;  %8552 = vmatprep.mubr.msk.f32.mxu1 %vm252_vm1, %v12994_v58  ;;  %v13003_v55 = vld [vmem:[#allocation22_spill] sm:$0xff]  ;;  %v13004_v51 = vld [vmem:[#allocation160_spill] sm:$0xff]  ;;  %v13005_v58 = vld [vmem:[#allocation23_spill] sm:$0xff] }
 0x22b   :  { %v4175_v30 = vpop.f32.mrf.mxu1  ;;  %8650 = vmatprep.mubr.msk.f32.mxu0 %vm252_vm1, %v12827_v32 }
 0x22c   :  { %v11823_v47 = vadd.f32 %v8405_v57, %v4423_v5  ;;  %v4422_v8 = vadd.f32 %v4175_v30, %v12995_v61  ;;  %v4769_v16 = vpop.f32.mrf.mxu0  ;;  %v13006_v61 = vld [vmem:[#allocation118_spill] sm:$0xff] }
 0x22d   :  { %v8310_v17 = vpop.f32.mrf.mxu1  ;;  %8553 = vmatmul.mubr.msk.f32.gmra.mxu1 %vm252_vm1, %v12996_v56  ;;  %v122_v56 = vld [vmem:[%s12147_s0 + $0x358] sm:$0x3] }
 0x22e   :  { %v11828_v49 = vadd.f32 %v4769_v16, %v4422_v8  ;;  %v4425_v37 = vadd.f32 %v8310_v17, %v11363_v29  ;;  %v8408_v53 = vpop.f32.mrf.mxu0  ;;  %8651 = vmatmul.mubr.msk.f32.gmra.mxu0 %vm252_vm1, %v12997_v1  ;;  %8555 = vmatprep.mubr.msk.f32.mxu1 %vm252_vm1, %v12998_v3  ;;  %v5133_v8 = vrot.slane %v11417_v27, 1  ;;  %v5134_v17 = vrot.slane %v11436_v20, 1 }
 0x22f   :  { %v4185_v32 = vpop.f32.mrf.mxu1  ;;  %8653 = vmatprep.mubr.msk.f32.mxu0 %vm252_vm1, %v12999_v54  ;;  %v5734_v3 = vrot.slane %v11436_v20, 2  ;;  %v13008_v54 = vld [vmem:[#allocation120_spill] sm:$0xff] }
 0x230   :  { %v11837_v39 = vadd.f32 %v8408_v53, %v4425_v37  ;;  %v4424_v48 = vadd.f32 %v4185_v32, %v13000_v42  ;;  %v4779_v50 = vpop.f32.mrf.mxu0  ;;  %v5135_v20 = vsel %vm994_vm2, %v5133_v8, %v5134_v17 }
 0x231   :  { %v8313_v13 = vpop.f32.mrf.mxu1  ;;  %8556 = vmatmul.mubr.msk.f32.gmra.mxu1 %vm252_vm1, %v13001_v19 }
 0x232   :  { %v11842_v29 = vadd.f32 %v4779_v50, %v4424_v48  ;;  %v4427_v10 = vadd.f32 %v8313_v13, %v11377_v2  ;;  %v8411_v36 = vpop.f32.mrf.mxu0  ;;  %8654 = vmatmul.mubr.msk.f32.gmra.mxu0 %vm252_vm1, %v12834_v15  ;;  %8558 = vmatprep.mubr.msk.f32.mxu1 %vm252_vm1, %v13002_v14  ;;  %v13009_v50 = vld [vmem:[#allocation121_spill] sm:$0xff]  ;;  %v5136_v13 = vrot.slane %v122_v56, 1 }
 0x233   :  { %v4195_v25 = vpop.f32.mrf.mxu1  ;;  %8656 = vmatprep.mubr.msk.f32.mxu0 %vm252_vm1, %v13003_v55 }
 0x234   :  { %v11851_v12 = vadd.f32 %v8411_v36, %v4427_v10  ;;  %v4426_v11 = vadd.f32 %v4195_v25, %v13004_v51  ;;  %v4789_v5 = vpop.f32.mrf.mxu0  ;;  %v13011_v10 = vld [vmem:[#allocation158_spill] sm:$0xff]  ;;  %v5736_v36 = vrot.slane %v122_v56, 2  ;;  %v13012_v25 = vld [vmem:[#allocation163_spill] sm:$0xff]  ;;  %v5137_v8 = vsel %vm994_vm2, %v5134_v17, %v5136_v13  ;;  %v13018_v13 = vld [vmem:[#allocation169_spill] sm:$0xff] }
 0x235   :  { %v8316_v57 = vpop.f32.mrf.mxu1  ;;  %8559 = vmatmul.mubr.msk.f32.gmra.mxu1 %vm252_vm1, %v13005_v58  ;;  %v13014_v58 = vld [vmem:[#allocation161_spill] sm:$0xff] }
 0x236   :  { %v11856_v2 = vadd.f32 %v4789_v5, %v4426_v11  ;;  %v4429_v15 = vadd.f32 %v8316_v57, %v11393_v31  ;;  %v8414_v30 = vpop.f32.mrf.mxu0  ;;  %8657 = vmatmul.mubr.msk.f32.gmra.mxu0 %vm252_vm1, %v12839_v41  ;;  %8561 = vmatprep.mubr.msk.f32.mxu1 %vm252_vm1, %v13006_v61  ;;  %v5733_v31 = vrot.slane %v11417_v27, 2  ;;  %v13007_v41 = vld [vmem:[#allocation157_spill] sm:$0xff]  ;;  %v13010_v27 = vld [vmem:[#allocation200_spill] sm:$0xff]  ;;  %v13013_v5 = vld [vmem:[#allocation202_spill] sm:$0xff]  ;;  %v5737_v56 = vsel %vm1865_vm3, %v5734_v3, %v5736_v36 }
 0x237   :  { %v4205_v16 = vpop.f32.mrf.mxu1  ;;  %8659 = vmatprep.mubr.msk.f32.mxu0 %vm252_vm1, %v12841_v60  ;;  %v13015_v61 = vld [vmem:[#allocation164_spill] sm:$0xff]  ;;  %v13019_v36 = vld [vmem:[#allocation165_spill] sm:$0xff] }
 0x238   :  { %v11871_v37 = vadd.f32 %v8414_v30, %v4429_v15  ;;  %v4428_v53 = vadd.f32 %v4205_v16, %v13007_v41  ;;  %v4799_v1 = vpop.f32.mrf.mxu0  ;;  %v5735_v51 = vsel %vm1865_vm3, %v5733_v31, %v5734_v3  ;;  %v13016_v41 = vld [vmem:[#allocation162_spill] sm:$0xff] }
 0x239   :  { %v8319_v32 = vpop.f32.mrf.mxu1  ;;  %8562 = vmatmul.mubr.msk.f32.gmra.mxu1 %vm252_vm1, %v13008_v54 }
 0x23a   :  { %v11877_v60 = vadd.f32 %v4799_v1, %v4428_v53  ;;  %v4431_v42 = vadd.f32 %v8319_v32, %v11411_v40  ;;  %v8417_v48 = vpop.f32.mrf.mxu0  ;;  %8660 = vmatmul.mubr.msk.f32.gmra.mxu0 %vm252_vm1, %v13009_v50  ;;  %8564 = vmatprep.mubr.msk.f32.mxu1 %vm252_vm1, %v13010_v27 }
 0x23b   :  { %v4215_v19 = vpop.f32.mrf.mxu1  ;;  %8662 = vmatprep.mubr.msk.f32.mxu0 %vm252_vm1, %v13011_v10 }
 0x23c   :  { %v11887_v14 = vadd.f32 %v8417_v48, %v4431_v42  ;;  %v4430_v55 = vadd.f32 %v4215_v19, %v13012_v25  ;;  %v4809_v40 = vpop.f32.mrf.mxu0  ;;  %v13017_v42 = vld [vmem:[#allocation167_spill] sm:$0xff] }
 0x23d   :  { %v8322_v11 = vpop.f32.mrf.mxu1  ;;  %8565 = vmatmul.mubr.msk.f32.gmra.mxu1 %vm252_vm1, %v13013_v5 }
 0x23e   :  { %v11893_v57 = vadd.f32 %v4809_v40, %v4430_v55  ;;  %v4433_v15 = vadd.f32 %v8322_v11, %v13014_v58  ;;  %v8420_v30 = vpop.f32.mrf.mxu0  ;;  %8663 = vmatmul.mubr.msk.f32.gmra.mxu0 %vm252_vm1, %v13015_v61  ;;  %8567 = vmatprep.mubr.msk.f32.mxu1 %vm252_vm1, %v5135_v20  ;;  %v13020_v11 = vld [vmem:[#allocation166_spill] sm:$0xff]  ;;  %v13021_v61 = vld [vmem:[#allocation173_spill] sm:$0xff] }
 0x23f   :  { %v4225_v16 = vpop.f32.mrf.mxu1  ;;  %8665 = vmatprep.mubr.msk.f32.mxu0 %vm252_vm1, %v5735_v51 }
 0x240   :  { %v11902_v31 = vadd.f32 %v8420_v30, %v4433_v15  ;;  %v4432_v53 = vadd.f32 %v4225_v16, %v13016_v41  ;;  %v4819_v1 = vpop.f32.mrf.mxu0 }
 0x241   :  { %v8325_v32 = vpop.f32.mrf.mxu1  ;;  %8568 = vmatmul.mubr.msk.f32.gmra.mxu1 %vm252_vm1, %v5137_v8 }
 0x242   :  { %v11906_v54 = vadd.f32 %v4819_v1, %v4432_v53  ;;  %v4435_v48 = vadd.f32 %v8325_v32, %v13017_v42  ;;  %v8423_v50 = vpop.f32.mrf.mxu0  ;;  %8666 = vmatmul.mubr.msk.f32.gmra.mxu0 %vm252_vm1, %v5737_v56  ;;  %v13022_v53 = vld [vmem:[#allocation174_spill] sm:$0xff] }
 0x243   :  { %v4235_v17 = vpop.f32.mrf.mxu1 }
 0x244   :  { %v11910_v27 = vadd.f32 %v8423_v50, %v4435_v48  ;;  %v4434_v3 = vadd.f32 %v4235_v17, %v13018_v13  ;;  %v4829_v19 = vpop.f32.mrf.mxu0  ;;  %v13023_v50 = vld [vmem:[#allocation168_spill] sm:$0xff] }
 0x245   :  { %v8328_v10 = vpop.f32.mrf.mxu1 }
 0x246   :  { %v11913_v20 = vadd.f32 %v4829_v19, %v4434_v3  ;;  %v4437_v25 = vadd.f32 %v8328_v10, %v13019_v36  ;;  %v8426_v55 = vpop.f32.mrf.mxu0  ;;  %v13024_v10 = vld [vmem:[#allocation170_spill] sm:$0xff] }
 0x247   :  { %v4245_v40 = vpop.f32.mrf.mxu1 }
 0x248   :  { %v11916_v51 = vadd.f32 %v8426_v55, %v4437_v25  ;;  %v4436_v5 = vadd.f32 %v4245_v40, %v13020_v11  ;;  %v4839_v58 = vpop.f32.mrf.mxu0  ;;  %v13025_v11 = vld [vmem:[#allocation77_spill] sm:$0xff] }
 0x249   :  { %v8331_v15 = vpop.f32.mrf.mxu1 }
 0x24a   :  { %v11919_v30 = vadd.f32 %v4839_v58, %v4436_v5  ;;  %v4439_v8 = vadd.f32 %v8331_v15, %v13021_v61  ;;  %v8429_v16 = vpop.f32.mrf.mxu0 }
 0x24b   :  { %v4255_v56 = vpop.f32.mrf.mxu1 }
 0x24c   :  { %v11922_v41 = vadd.f32 %v8429_v16, %v4439_v8  ;;  %v4438_v1 = vadd.f32 %v4255_v56, %v13022_v53  ;;  %v4849_v32 = vpop.f32.mrf.mxu0  ;;  %v13026_v8 = vld [vmem:[#allocation172_spill] sm:$0xff] }
 0x24d   :  { %v8334_v42 = vpop.f32.mrf.mxu1 }
 0x24e   :  { %v11925_v48 = vadd.f32 %v4849_v32, %v4438_v1  ;;  %v4441_v17 = vadd.f32 %v8334_v42, %v13023_v50  ;;  %v8432_v13 = vpop.f32.mrf.mxu0  ;;  %v13028_v32 = vld [vmem:[#allocation178_spill] sm:$0xff] }
 0x24f   :  { %v4265_v3 = vpop.f32.mrf.mxu1 }
 0x250   :  { %v11928_v19 = vadd.f32 %v8432_v13, %v4441_v17  ;;  %v4440_v36 = vadd.f32 %v4265_v3, %v13024_v10  ;;  %v4859_v25 = vpop.f32.mrf.mxu0  ;;  %v13030_v3 = vld [vmem:[#allocation171_spill] sm:$0xff] }
 0x251   :  { %v8337_v55 = vpop.f32.mrf.mxu1 }
 0x252   :  { %v11931_v40 = vadd.f32 %v4859_v25, %v4440_v36  ;;  %v4443_v5 = vadd.f32 %v8337_v55, %v13025_v11  ;;  %v8435_v58 = vpop.f32.mrf.mxu0  ;;  %v13032_v11 = vld [vmem:[#allocation175_spill] sm:$0xff] }
 0x253   :  { %v4275_v15 = vpop.f32.mrf.mxu1 }
 0x254   :  { %v11934_v61 = vadd.f32 %v8435_v58, %v4443_v5  ;;  %v4442_v16 = vadd.f32 %v4275_v15, %v13026_v8  ;;  %v4869_v56 = vpop.f32.mrf.mxu0 }
 0x255   :  { %v8340_v53 = vpop.f32.mrf.mxu1 }
 0x256   :  { %v11937_v1 = vadd.f32 %v4869_v56, %v4442_v16  ;;  %v4445_v42 = vadd.f32 %v8340_v53, %v13028_v32  ;;  %v8438_v50 = vpop.f32.mrf.mxu0  ;;  %v13034_v16 = vld [vmem:[#allocation81_spill] sm:$0xff] }
 0x257   :  { %v4285_v17 = vpop.f32.mrf.mxu1 }
 0x258   :  { %13027 = vst [vmem:[#allocation99_spill] sm:$0xff] %v11937_v1  ;;  %v11940_v13 = vadd.f32 %v8438_v50, %v4445_v42  ;;  %v4444_v10 = vadd.f32 %v4285_v17, %v13030_v3  ;;  %v4879_v36 = vpop.f32.mrf.mxu0  ;;  %v13036_v42 = vld [vmem:[#allocation177_spill] sm:$0xff] }
 0x259   :  { %v8343_v25 = vpop.f32.mrf.mxu1 }
 0x25a   :  { %13029 = vst [vmem:[#allocation6_spill] sm:$0xff] %v11940_v13  ;;  %v11943_v55 = vadd.f32 %v4879_v36, %v4444_v10  ;;  %v4447_v5 = vadd.f32 %v8343_v25, %v13032_v11  ;;  %v8441_v58 = vpop.f32.mrf.mxu0  ;;  %v13038_v10 = vld [vmem:[#allocation179_spill] sm:$0xff] }
 0x25b   :  { %v4295_v15 = vpop.f32.mrf.mxu1 }
 0x25c   :  { %13031 = vst [vmem:[#allocation184_spill] sm:$0xff] %v11943_v55  ;;  %v11946_v8 = vadd.f32 %v8441_v58, %v4447_v5  ;;  %v4446_v56 = vadd.f32 %v4295_v15, %v13034_v16  ;;  %v4889_v1 = vpop.f32.mrf.mxu0  ;;  %v13040_v5 = vld [vmem:[#allocation181_spill] sm:$0xff] }
 0x25d   :  { %v8346_v53 = vpop.f32.mrf.mxu1 }
 0x25e   :  { %13033 = vst [vmem:[#allocation8_spill] sm:$0xff] %v11946_v8  ;;  %v11949_v32 = vadd.f32 %v4889_v1, %v4446_v56  ;;  %v4449_v50 = vadd.f32 %v8346_v53, %v13036_v42  ;;  %v8444_v13 = vpop.f32.mrf.mxu0  ;;  %v13042_v1 = vld [vmem:[#allocation82_spill] sm:$0xff] }
 0x25f   :  { %v4305_v17 = vpop.f32.mrf.mxu1 }
 0x260   :  { %13035 = vst [vmem:[#allocation186_spill] sm:$0xff] %v11949_v32  ;;  %v11952_v3 = vadd.f32 %v8444_v13, %v4449_v50  ;;  %v4448_v36 = vadd.f32 %v4305_v17, %v13038_v10  ;;  %v4899_v55 = vpop.f32.mrf.mxu0  ;;  %v13044_v13 = vld [vmem:[#allocation183_spill] sm:$0xff] }
 0x261   :  { %v8349_v25 = vpop.f32.mrf.mxu1 }
 0x262   :  { %13037 = vst [vmem:[#allocation185_spill] sm:$0xff] %v11952_v3  ;;  %v11955_v11 = vadd.f32 %v4899_v55, %v4448_v36  ;;  %v4451_v58 = vadd.f32 %v8349_v25, %v13040_v5  ;;  %v8447_v8 = vpop.f32.mrf.mxu0  ;;  %v13046_v55 = vld [vmem:[#allocation182_spill] sm:$0xff] }
 0x263   :  { %v4315_v15 = vpop.f32.mrf.mxu1 }
 0x264   :  { %13039 = vst [vmem:[#allocation10_spill] sm:$0xff] %v11955_v11  ;;  %v11958_v16 = vadd.f32 %v8447_v8, %v4451_v58  ;;  %v4450_v56 = vadd.f32 %v4315_v15, %v13042_v1  ;;  %v4909_v32 = vpop.f32.mrf.mxu0  ;;  %v13048_v8 = vld [vmem:[#allocation83_spill] sm:$0xff] }
 0x265   :  { %v8352_v53 = vpop.f32.mrf.mxu1 }
 0x266   :  { %13041 = vst [vmem:[#allocation188_spill] sm:$0xff] %v11958_v16  ;;  %v11961_v42 = vadd.f32 %v4909_v32, %v4450_v56  ;;  %v4453_v50 = vadd.f32 %v8352_v53, %v13044_v13  ;;  %v8450_v3 = vpop.f32.mrf.mxu0  ;;  %v13050_v32 = vld [vmem:[#allocation85_spill] sm:$0xff] }
 0x267   :  { %v4325_v17 = vpop.f32.mrf.mxu1 }
 0x268   :  { %13043 = vst [vmem:[#allocation187_spill] sm:$0xff] %v11961_v42  ;;  %v11964_v10 = vadd.f32 %v8450_v3, %v4453_v50  ;;  %v4452_v36 = vadd.f32 %v4325_v17, %v13046_v55  ;;  %v4919_v11 = vpop.f32.mrf.mxu0  ;;  %v13052_v3 = vld [vmem:[#allocation87_spill] sm:$0xff] }
 0x269   :  { %v8355_v25 = vpop.f32.mrf.mxu1 }
 0x26a   :  { %13045 = vst [vmem:[#allocation12_spill] sm:$0xff] %v11964_v10  ;;  %v11967_v5 = vadd.f32 %v4919_v11, %v4452_v36  ;;  %v4455_v58 = vadd.f32 %v8355_v25, %v13048_v8  ;;  %v8453_v16 = vpop.f32.mrf.mxu0  ;;  %v13054_v11 = vld [vmem:[#allocation89_spill] sm:$0xff] }
 0x26b   :  { %v4335_v15 = vpop.f32.mrf.mxu1 }
 0x26c   :  { %13047 = vst [vmem:[#allocation190_spill] sm:$0xff] %v11967_v5  ;;  %v11970_v1 = vadd.f32 %v8453_v16, %v4455_v58  ;;  %v4454_v56 = vadd.f32 %v4335_v15, %v13050_v32  ;;  %v4929_v42 = vpop.f32.mrf.mxu0  ;;  %v13056_v16 = vld [vmem:[#allocation91_spill] sm:$0xff] }
 0x26d   :  { %v8358_v53 = vpop.f32.mrf.mxu1 }
 0x26e   :  { %13049 = vst [vmem:[#allocation189_spill] sm:$0xff] %v11970_v1  ;;  %v11973_v13 = vadd.f32 %v4929_v42, %v4454_v56  ;;  %v4457_v50 = vadd.f32 %v8358_v53, %v13052_v3  ;;  %v8456_v10 = vpop.f32.mrf.mxu0  ;;  %v13057_v42 = vld [vmem:[#allocation93_spill] sm:$0xff] }
 0x26f   :  { %v4345_v17 = vpop.f32.mrf.mxu1 }
 0x270   :  { %13051 = vst [vmem:[#allocation14_spill] sm:$0xff] %v11973_v13  ;;  %v11976_v55 = vadd.f32 %v8456_v10, %v4457_v50  ;;  %v4456_v36 = vadd.f32 %v4345_v17, %v13054_v11  ;;  %v4939_v5 = vpop.f32.mrf.mxu0  ;;  %v13058_v10 = vld [vmem:[#allocation95_spill] sm:$0xff] }
 0x271   :  { %v8361_v25 = vpop.f32.mrf.mxu1 }
 0x272   :  { %13053 = vst [vmem:[#allocation192_spill] sm:$0xff] %v11976_v55  ;;  %v11979_v8 = vadd.f32 %v4939_v5, %v4456_v36  ;;  %v4459_v58 = vadd.f32 %v8361_v25, %v13056_v16  ;;  %v8459_v1 = vpop.f32.mrf.mxu0  ;;  %v13059_v5 = vld [vmem:[#allocation97_spill] sm:$0xff] }
 0x273   :  { %v4355_v15 = vpop.f32.mrf.mxu1 }
 0x274   :  { %13055 = vst [vmem:[#allocation191_spill] sm:$0xff] %v11979_v8  ;;  %v11982_v32 = vadd.f32 %v8459_v1, %v4459_v58  ;;  %v4458_v56 = vadd.f32 %v4355_v15, %v13057_v42  ;;  %v4949_v13 = vpop.f32.mrf.mxu0 }
 0x275   :  { %v8364_v53 = vpop.f32.mrf.mxu1 }
 0x276   :  { %v11985_v3 = vadd.f32 %v4949_v13, %v4458_v56  ;;  %v4461_v50 = vadd.f32 %v8364_v53, %v13058_v10  ;;  %v8462_v55 = vpop.f32.mrf.mxu0 }
 0x277   :  { %v4365_v17 = vpop.f32.mrf.mxu1 }
 0x278   :  { %v11988_v11 = vadd.f32 %v8462_v55, %v4461_v50  ;;  %v4460_v36 = vadd.f32 %v4365_v17, %v13059_v5  ;;  %v4959_v8 = vpop.f32.mrf.mxu0 }
 0x279   :  { %v8367_v25 = vpop.f32.mrf.mxu1 }
 0x27a   :  { %v11991_v16 = vadd.f32 %v4959_v8, %v4460_v36  ;;  %v4463_v1 = vadd.f32 %v8367_v25, %v11656_v52  ;;  %v8465_v58 = vpop.f32.mrf.mxu0 }
 0x27b   :  { %v4375_v15 = vpop.f32.mrf.mxu1 }
 0x27c   :  { %v11994_v42 = vadd.f32 %v8465_v58, %v4463_v1  ;;  %v4462_v13 = vadd.f32 %v4375_v15, %v11662_v7  ;;  %v4969_v56 = vpop.f32.mrf.mxu0 }
 0x27d   :  { %v8370_v53 = vpop.f32.mrf.mxu1 }
 0x27e   :  { %v11997_v10 = vadd.f32 %v4969_v56, %v4462_v13  ;;  %v4465_v55 = vadd.f32 %v8370_v53, %v11671_v38  ;;  %v8468_v50 = vpop.f32.mrf.mxu0 }
 0x27f   :  { %v4385_v17 = vpop.f32.mrf.mxu1 }
 0x280   :  { %v12000_v5 = vadd.f32 %v8468_v50, %v4465_v55  ;;  %v4464_v8 = vadd.f32 %v4385_v17, %v11675_v28  ;;  %v4979_v36 = vpop.f32.mrf.mxu0  ;;  %v12015_v28 = vld [vmem:[%s12149_s2] ss:$0 sm:$0xff]  ;;  %s8755_s2 = smov [#allocation3]  }
 0x281   :  { %v8373_v52 = vpop.f32.mrf.mxu1  ;;  %s6596_s11 = sshll.u32 %s8755_s2, 4  ;;  %s6597_s11 = int_to_ptr.vmem [resolvable:$true] %s6596_s11 }
 0x282   :  { %v12003_v25 = vadd.f32 %v4979_v36, %v4464_v8  ;;  %v4467_v1 = vadd.f32 %v8373_v52, %v11683_v26  ;;  %v8471_v58 = vpop.f32.mrf.mxu0  ;;  %s8733_s12 = scalar_lea.vmem %s6597_s11, 8192  ;;  %p8738_p1 = scmp.lt.s32.totalorder %s6597_s11, %s6597_s11 }
 0x283   :  { %v4395_v7 = vpop.f32.mrf.mxu1  ;;  %p8734_p0 = scmp.ne.s32.totalorder %s6597_s11, %s8733_s12  ;;  %p8739_p2 = scmp.lt.s32.totalorder %s8733_s12, %s8733_s12 }
 0x284   :  { %13060 = vst [vmem:[#allocation16_spill] sm:$0xff] %v12003_v25  ;;  %v12006_v15 = vadd.f32 %v8471_v58, %v4467_v1  ;;  %v4466_v13 = vadd.f32 %v4395_v7, %v11688_v46  ;;  %v4989_v56 = vpop.f32.mrf.mxu0 }
 0x285   :  { %v8476_v38 = vpop.f32.mrf.mxu1  ;;  %p8740_p3 = por %p8739_p2, %p8738_p1 }
 0x286   :  { %13061 = vst [vmem:[#allocation194_spill] sm:$0xff] %v12006_v15  ;;  %v12009_v53 = vadd.f32 %v4989_v56, %v4466_v13  ;;  %v5601_v55 = vadd.f32 %v8476_v38, %v11697_v59  ;;  %v8574_v50 = vpop.f32.mrf.mxu0 }
 0x287   :  { %v5281_v17 = vpop.f32.mrf.mxu1  ;;  %p8741_p4 = pnand %p8740_p3, %p8734_p0 }
 0x288   :  { %13062 = vst [vmem:[#allocation193_spill] sm:$0xff] %v12009_v53  ;;  %v6201_v26 = vadd.f32 %v8574_v50, %v5601_v55  ;;  %v5600_v8 = vadd.f32 %v5281_v17, %v11702_v62  ;;  %v5881_v36 = vpop.f32.mrf.mxu0 }
 0x289   :  { %v8479_v52 = vpop.f32.mrf.mxu1 }
 0x28a   :  { %v6400_v46 = vadd.f32 %v12015_v28, %v6201_v26  ;;  %v6200_v1 = vadd.f32 %v5881_v36, %v5600_v8  ;;  %v5603_v58 = vadd.f32 %v8479_v52, %v11711_v63  ;;  %v8577_v7 = vpop.f32.mrf.mxu0 }
 0x28b   :  { %v5291_v13 = vpop.f32.mrf.mxu1 }
 0x28c   :  { %v6464_v59 = vmax.f32 %v6400_v46, 0.0  ;;  %v6399_v56 = vadd.f32 %v12015_v28, %v6200_v1  ;;  %v6203_v38 = vadd.f32 %v8577_v7, %v5603_v58  ;;  %v5602_v53 = vadd.f32 %v5291_v13, %v11716_v4  ;;  %v5891_v15 = vpop.f32.mrf.mxu0 }
 0x28d   :  { %v8482_v25 = vpop.f32.mrf.mxu1 }
 0x28e   :  { %6528 = vst [vmem:[#allocation3 + $0x8] sm:$0xff] %v6464_v59  ;;  %v6463_v55 = vmax.f32 %v6399_v56, 0.0  ;;  %v6402_v62 = vadd.f32 %v12015_v28, %v6203_v38  ;;  %v6202_v50 = vadd.f32 %v5891_v15, %v5602_v53  ;;  %v5605_v17 = vadd.f32 %v8482_v25, %v11725_v45  ;;  %v8580_v26 = vpop.f32.mrf.mxu0 }
 0x28f   :  { %v5301_v8 = vpop.f32.mrf.mxu1 }
 0x290   :  { %6527 = vst [vmem:[#allocation3] sm:$0xff] %v6463_v55  ;;  %v6466_v63 = vmax.f32 %v6402_v62, 0.0  ;;  %v6401_v36 = vadd.f32 %v12015_v28, %v6202_v50  ;;  %v6205_v52 = vadd.f32 %v8580_v26, %v5605_v17  ;;  %v5604_v46 = vadd.f32 %v5301_v8, %v11730_v34  ;;  %v5901_v1 = vpop.f32.mrf.mxu0 }
 0x291   :  { %v8485_v4 = vpop.f32.mrf.mxu1 }
 0x292   :  { %6530 = vst [vmem:[#allocation3 + $0x18] sm:$0xff] %v6466_v63  ;;  %v6465_v58 = vmax.f32 %v6401_v36, 0.0  ;;  %v6404_v7 = vadd.f32 %v12015_v28, %v6205_v52  ;;  %v6204_v13 = vadd.f32 %v5901_v1, %v5604_v46  ;;  %v5607_v15 = vadd.f32 %v8485_v4, %v11739_v33  ;;  %v8583_v53 = vpop.f32.mrf.mxu0 }
 0x293   :  { %v5311_v45 = vpop.f32.mrf.mxu1 }
 0x294   :  { %6529 = vst [vmem:[#allocation3 + $0x10] sm:$0xff] %v6465_v58  ;;  %v6468_v25 = vmax.f32 %v6404_v7, 0.0  ;;  %v6403_v59 = vadd.f32 %v12015_v28, %v6204_v13  ;;  %v6207_v56 = vadd.f32 %v8583_v53, %v5607_v15  ;;  %v5606_v38 = vadd.f32 %v5311_v45, %v11744_v23  ;;  %v5911_v55 = vpop.f32.mrf.mxu0 }
 0x295   :  { %v8488_v34 = vpop.f32.mrf.mxu1 }
 0x296   :  { %6532 = vst [vmem:[#allocation3 + $0x28] sm:$0xff] %v6468_v25  ;;  %v6467_v62 = vmax.f32 %v6403_v59, 0.0  ;;  %v6406_v50 = vadd.f32 %v12015_v28, %v6207_v56  ;;  %v6206_v17 = vadd.f32 %v5911_v55, %v5606_v38  ;;  %v5609_v26 = vadd.f32 %v8488_v34, %v11753_v24  ;;  %v8586_v8 = vpop.f32.mrf.mxu0 }
 0x297   :  { %v5321_v33 = vpop.f32.mrf.mxu1 }
 0x298   :  { %6531 = vst [vmem:[#allocation3 + $0x20] sm:$0xff] %v6467_v62  ;;  %v6470_v63 = vmax.f32 %v6406_v50, 0.0  ;;  %v6405_v36 = vadd.f32 %v12015_v28, %v6206_v17  ;;  %v6209_v52 = vadd.f32 %v8586_v8, %v5609_v26  ;;  %v5608_v46 = vadd.f32 %v5321_v33, %v11758_v6  ;;  %v5921_v1 = vpop.f32.mrf.mxu0 }
 0x299   :  { %v8491_v23 = vpop.f32.mrf.mxu1 }
 0x29a   :  { %6534 = vst [vmem:[#allocation3 + $0x38] sm:$0xff] %v6470_v63  ;;  %v6469_v4 = vmax.f32 %v6405_v36, 0.0  ;;  %v6408_v58 = vadd.f32 %v12015_v28, %v6209_v52  ;;  %v6208_v7 = vadd.f32 %v5921_v1, %v5608_v46  ;;  %v5611_v13 = vadd.f32 %v8491_v23, %v11767_v44  ;;  %v8589_v15 = vpop.f32.mrf.mxu0 }
 0x29b   :  { %v5331_v24 = vpop.f32.mrf.mxu1 }
 0x29c   :  { %6533 = vst [vmem:[#allocation3 + $0x30] sm:$0xff] %v6469_v4  ;;  %v6472_v53 = vmax.f32 %v6408_v58, 0.0  ;;  %v6407_v45 = vadd.f32 %v12015_v28, %v6208_v7  ;;  %v6211_v25 = vadd.f32 %v8589_v15, %v5611_v13  ;;  %v5610_v59 = vadd.f32 %v5331_v24, %v11772_v18  ;;  %v5931_v56 = vpop.f32.mrf.mxu0 }
 0x29d   :  { %v8494_v6 = vpop.f32.mrf.mxu1 }
 0x29e   :  { %6536 = vst [vmem:[#allocation3 + $0x48] sm:$0xff] %v6472_v53  ;;  %v6471_v38 = vmax.f32 %v6407_v45, 0.0  ;;  %v6410_v55 = vadd.f32 %v12015_v28, %v6211_v25  ;;  %v6210_v34 = vadd.f32 %v5931_v56, %v5610_v59  ;;  %v5613_v62 = vadd.f32 %v8494_v6, %v11781_v21  ;;  %v8592_v50 = vpop.f32.mrf.mxu0 }
 0x29f   :  { %v5341_v44 = vpop.f32.mrf.mxu1 }
 0x2a0   :  { %6535 = vst [vmem:[#allocation3 + $0x40] sm:$0xff] %v6471_v38  ;;  %v6474_v17 = vmax.f32 %v6410_v55, 0.0  ;;  %v6409_v26 = vadd.f32 %v12015_v28, %v6210_v34  ;;  %v6213_v8 = vadd.f32 %v8592_v50, %v5613_v62  ;;  %v5612_v33 = vadd.f32 %v5341_v44, %v11786_v22  ;;  %v5941_v63 = vpop.f32.mrf.mxu0 }
 0x2a1   :  { %v8497_v18 = vpop.f32.mrf.mxu1 }
 0x2a2   :  { %6538 = vst [vmem:[#allocation3 + $0x58] sm:$0xff] %v6474_v17  ;;  %v6473_v36 = vmax.f32 %v6409_v26, 0.0  ;;  %v6412_v52 = vadd.f32 %v12015_v28, %v6213_v8  ;;  %v6212_v46 = vadd.f32 %v5941_v63, %v5612_v33  ;;  %v5615_v1 = vadd.f32 %v8497_v18, %v11795_v9  ;;  %v8595_v23 = vpop.f32.mrf.mxu0 }
 0x2a3   :  { %v5351_v21 = vpop.f32.mrf.mxu1 }
 0x2a4   :  { %6537 = vst [vmem:[#allocation3 + $0x50] sm:$0xff] %v6473_v36  ;;  %v6476_v4 = vmax.f32 %v6412_v52, 0.0  ;;  %v6411_v58 = vadd.f32 %v12015_v28, %v6212_v46  ;;  %v6215_v7 = vadd.f32 %v8595_v23, %v5615_v1  ;;  %v5614_v13 = vadd.f32 %v5351_v21, %v11800_v0  ;;  %v5951_v15 = vpop.f32.mrf.mxu0 }
 0x2a5   :  { %v8500_v22 = vpop.f32.mrf.mxu1 }
 0x2a6   :  { %6540 = vst [vmem:[#allocation3 + $0x68] sm:$0xff] %v6476_v4  ;;  %v6475_v24 = vmax.f32 %v6411_v58, 0.0  ;;  %v6414_v53 = vadd.f32 %v12015_v28, %v6215_v7  ;;  %v6214_v45 = vadd.f32 %v5951_v15, %v5614_v13  ;;  %v5617_v25 = vadd.f32 %v8500_v22, %v11809_v35  ;;  %v8598_v59 = vpop.f32.mrf.mxu0 }
 0x2a7   :  { %v5361_v9 = vpop.f32.mrf.mxu1 }
 0x2a8   :  { %6539 = vst [vmem:[#allocation3 + $0x60] sm:$0xff] %v6475_v24  ;;  %v6478_v56 = vmax.f32 %v6414_v53, 0.0  ;;  %v6413_v6 = vadd.f32 %v12015_v28, %v6214_v45  ;;  %v6217_v38 = vadd.f32 %v8598_v59, %v5617_v25  ;;  %v5616_v55 = vadd.f32 %v5361_v9, %v11814_v43  ;;  %v5961_v34 = vpop.f32.mrf.mxu0 }
 0x2a9   :  { %v8503_v0 = vpop.f32.mrf.mxu1 }
 0x2aa   :  { %6542 = vst [vmem:[#allocation3 + $0x78] sm:$0xff] %v6478_v56  ;;  %v6477_v62 = vmax.f32 %v6413_v6, 0.0  ;;  %v6416_v50 = vadd.f32 %v12015_v28, %v6217_v38  ;;  %v6216_v44 = vadd.f32 %v5961_v34, %v5616_v55  ;;  %v5619_v17 = vadd.f32 %v8503_v0, %v11823_v47  ;;  %v8601_v26 = vpop.f32.mrf.mxu0 }
 0x2ab   :  { %v5371_v35 = vpop.f32.mrf.mxu1 }
 0x2ac   :  { %6541 = vst [vmem:[#allocation3 + $0x70] sm:$0xff] %v6477_v62  ;;  %v6480_v8 = vmax.f32 %v6416_v50, 0.0  ;;  %v6415_v33 = vadd.f32 %v12015_v28, %v6216_v44  ;;  %v6219_v63 = vadd.f32 %v8601_v26, %v5619_v17  ;;  %v5618_v18 = vadd.f32 %v5371_v35, %v11828_v49  ;;  %v5971_v36 = vpop.f32.mrf.mxu0 }
 0x2ad   :  { %v8506_v43 = vpop.f32.mrf.mxu1 }
 0x2ae   :  { %6544 = vst [vmem:[#allocation3 + $0x88] sm:$0xff] %v6480_v8  ;;  %v6479_v52 = vmax.f32 %v6415_v33, 0.0  ;;  %v6418_v46 = vadd.f32 %v12015_v28, %v6219_v63  ;;  %v6218_v1 = vadd.f32 %v5971_v36, %v5618_v18  ;;  %v5621_v23 = vadd.f32 %v8506_v43, %v11837_v39  ;;  %v8604_v21 = vpop.f32.mrf.mxu0 }
 0x2af   :  { %v5381_v47 = vpop.f32.mrf.mxu1 }
 0x2b0   :  { %6543 = vst [vmem:[#allocation3 + $0x80] sm:$0xff] %v6479_v52  ;;  %v6482_v4 = vmax.f32 %v6418_v46, 0.0  ;;  %v6417_v58 = vadd.f32 %v12015_v28, %v6218_v1  ;;  %v6221_v7 = vadd.f32 %v8604_v21, %v5621_v23  ;;  %v5620_v13 = vadd.f32 %v5381_v47, %v11842_v29  ;;  %v5981_v15 = vpop.f32.mrf.mxu0 }
 0x2b1   :  { %v8509_v49 = vpop.f32.mrf.mxu1 }
 0x2b2   :  { %6546 = vst [vmem:[#allocation3 + $0x98] sm:$0xff] %v6482_v4  ;;  %v6481_v22 = vmax.f32 %v6417_v58, 0.0  ;;  %v6420_v24 = vadd.f32 %v12015_v28, %v6221_v7  ;;  %v6220_v53 = vadd.f32 %v5981_v15, %v5620_v13  ;;  %v5623_v45 = vadd.f32 %v8509_v49, %v11851_v12  ;;  %v8607_v25 = vpop.f32.mrf.mxu0 }
 0x2b3   :  { %v5391_v39 = vpop.f32.mrf.mxu1 }
 0x2b4   :  { %6545 = vst [vmem:[#allocation3 + $0x90] sm:$0xff] %v6481_v22  ;;  %v6484_v59 = vmax.f32 %v6420_v24, 0.0  ;;  %v6419_v9 = vadd.f32 %v12015_v28, %v6220_v53  ;;  %v6223_v56 = vadd.f32 %v8607_v25, %v5623_v45  ;;  %v5622_v6 = vadd.f32 %v5391_v39, %v11856_v2  ;;  %v5991_v38 = vpop.f32.mrf.mxu0 }
 0x2b5   :  { %v8512_v29 = vpop.f32.mrf.mxu1 }
 0x2b6   :  { %6548 = vst [vmem:[#allocation3 + $0xa8] sm:$0xff] %v6484_v59  ;;  %v6483_v55 = vmax.f32 %v6419_v9, 0.0  ;;  %v6422_v34 = vadd.f32 %v12015_v28, %v6223_v56  ;;  %v6222_v0 = vadd.f32 %v5991_v38, %v5622_v6  ;;  %v5625_v62 = vadd.f32 %v8512_v29, %v11871_v37  ;;  %v8610_v50 = vpop.f32.mrf.mxu0 }
 0x2b7   :  { %v5401_v12 = vpop.f32.mrf.mxu1 }
 0x2b8   :  { %6547 = vst [vmem:[#allocation3 + $0xa0] sm:$0xff] %v6483_v55  ;;  %v6486_v44 = vmax.f32 %v6422_v34, 0.0  ;;  %v6421_v17 = vadd.f32 %v12015_v28, %v6222_v0  ;;  %v6225_v26 = vadd.f32 %v8610_v50, %v5625_v62  ;;  %v5624_v35 = vadd.f32 %v5401_v12, %v11877_v60  ;;  %v6001_v8 = vpop.f32.mrf.mxu0 }
 0x2b9   :  { %v8515_v2 = vpop.f32.mrf.mxu1 }
 0x2ba   :  { %6550 = vst [vmem:[#allocation3 + $0xb8] sm:$0xff] %v6486_v44  ;;  %v6485_v33 = vmax.f32 %v6421_v17, 0.0  ;;  %v6424_v63 = vadd.f32 %v12015_v28, %v6225_v26  ;;  %v6224_v18 = vadd.f32 %v6001_v8, %v5624_v35  ;;  %v5627_v36 = vadd.f32 %v8515_v2, %v11887_v14  ;;  %v8613_v43 = vpop.f32.mrf.mxu0 }
 0x2bb   :  { %v5411_v37 = vpop.f32.mrf.mxu1 }
 0x2bc   :  { %6549 = vst [vmem:[#allocation3 + $0xb0] sm:$0xff] %v6485_v33  ;;  %v6488_v52 = vmax.f32 %v6424_v63, 0.0  ;;  %v6423_v46 = vadd.f32 %v12015_v28, %v6224_v18  ;;  %v6227_v1 = vadd.f32 %v8613_v43, %v5627_v36  ;;  %v5626_v23 = vadd.f32 %v5411_v37, %v11893_v57  ;;  %v6011_v21 = vpop.f32.mrf.mxu0 }
 0x2bd   :  { %v8518_v60 = vpop.f32.mrf.mxu1 }
 0x2be   :  { %6552 = vst [vmem:[#allocation3 + $0xc8] sm:$0xff] %v6488_v52  ;;  %v6487_v47 = vmax.f32 %v6423_v46, 0.0  ;;  %v6426_v4 = vadd.f32 %v12015_v28, %v6227_v1  ;;  %v6226_v58 = vadd.f32 %v6011_v21, %v5626_v23  ;;  %v5629_v7 = vadd.f32 %v8518_v60, %v11902_v31  ;;  %v8616_v13 = vpop.f32.mrf.mxu0 }
 0x2bf   :  { %v5421_v14 = vpop.f32.mrf.mxu1 }
 0x2c0   :  { %6551 = vst [vmem:[#allocation3 + $0xc0] sm:$0xff] %v6487_v47  ;;  %v6490_v15 = vmax.f32 %v6426_v4, 0.0  ;;  %v6425_v49 = vadd.f32 %v12015_v28, %v6226_v58  ;;  %v6229_v22 = vadd.f32 %v8616_v13, %v5629_v7  ;;  %v5628_v24 = vadd.f32 %v5421_v14, %v11906_v54  ;;  %v6021_v53 = vpop.f32.mrf.mxu0 }
 0x2c1   :  { %v8521_v57 = vpop.f32.mrf.mxu1 }
 0x2c2   :  { %6554 = vst [vmem:[#allocation3 + $0xd8] sm:$0xff] %v6490_v15  ;;  %v6489_v45 = vmax.f32 %v6425_v49, 0.0  ;;  %v6428_v25 = vadd.f32 %v12015_v28, %v6229_v22  ;;  %v6228_v39 = vadd.f32 %v6021_v53, %v5628_v24  ;;  %v5631_v59 = vadd.f32 %v8521_v57, %v11910_v27  ;;  %v8619_v9 = vpop.f32.mrf.mxu0 }
 0x2c3   :  { %v5431_v31 = vpop.f32.mrf.mxu1 }
 0x2c4   :  { %6553 = vst [vmem:[#allocation3 + $0xd0] sm:$0xff] %v6489_v45  ;;  %v6492_v56 = vmax.f32 %v6428_v25, 0.0  ;;  %v6427_v6 = vadd.f32 %v12015_v28, %v6228_v39  ;;  %v6231_v38 = vadd.f32 %v8619_v9, %v5631_v59  ;;  %v5630_v29 = vadd.f32 %v5431_v31, %v11913_v20  ;;  %v6031_v55 = vpop.f32.mrf.mxu0  ;;  %v13063_v59 = vld [vmem:[#allocation99_spill] sm:$0xff] }
 0x2c5   :  { %v8524_v54 = vpop.f32.mrf.mxu1 }
 0x2c6   :  { %6556 = vst [vmem:[#allocation3 + $0xe8] sm:$0xff] %v6492_v56  ;;  %v6491_v34 = vmax.f32 %v6427_v6, 0.0  ;;  %v6430_v0 = vadd.f32 %v12015_v28, %v6231_v38  ;;  %v6230_v62 = vadd.f32 %v6031_v55, %v5630_v29  ;;  %v5633_v50 = vadd.f32 %v8524_v54, %v11916_v51  ;;  %v8622_v12 = vpop.f32.mrf.mxu0  ;;  %v13064_v29 = vld [vmem:[#allocation6_spill] sm:$0xff] }
 0x2c7   :  { %v5441_v27 = vpop.f32.mrf.mxu1 }
 0x2c8   :  { %6555 = vst [vmem:[#allocation3 + $0xe0] sm:$0xff] %v6491_v34  ;;  %v6494_v44 = vmax.f32 %v6430_v0, 0.0  ;;  %v6429_v17 = vadd.f32 %v12015_v28, %v6230_v62  ;;  %v6233_v26 = vadd.f32 %v8622_v12, %v5633_v50  ;;  %v5632_v35 = vadd.f32 %v5441_v27, %v11919_v30  ;;  %v6041_v8 = vpop.f32.mrf.mxu0  ;;  %v13065_v50 = vld [vmem:[#allocation184_spill] sm:$0xff] }
 0x2c9   :  { %v8527_v20 = vpop.f32.mrf.mxu1 }
 0x2ca   :  { %6558 = vst [vmem:[#allocation3 + $0xf8] sm:$0xff] %v6494_v44  ;;  %v6493_v2 = vmax.f32 %v6429_v17, 0.0  ;;  %v6432_v33 = vadd.f32 %v12015_v28, %v6233_v26  ;;  %v6232_v63 = vadd.f32 %v6041_v8, %v5632_v35  ;;  %v5635_v18 = vadd.f32 %v8527_v20, %v11922_v41  ;;  %v8625_v36 = vpop.f32.mrf.mxu0  ;;  %v13066_v8 = vld [vmem:[#allocation8_spill] sm:$0xff] }
 0x2cb   :  { %v5451_v51 = vpop.f32.mrf.mxu1 }
 0x2cc   :  { %6557 = vst [vmem:[#allocation3 + $0xf0] sm:$0xff] %v6493_v2  ;;  %v6496_v43 = vmax.f32 %v6432_v33, 0.0  ;;  %v6431_v37 = vadd.f32 %v12015_v28, %v6232_v63  ;;  %v6235_v52 = vadd.f32 %v8625_v36, %v5635_v18  ;;  %v5634_v46 = vadd.f32 %v5451_v51, %v11925_v48  ;;  %v6051_v1 = vpop.f32.mrf.mxu0  ;;  %v13067_v51 = vld [vmem:[#allocation186_spill] sm:$0xff] }
 0x2cd   :  { %v8530_v30 = vpop.f32.mrf.mxu1 }
 0x2ce   :  { %6560 = vst [vmem:[#allocation3 + $0x108] sm:$0xff] %v6496_v43  ;;  %v6495_v23 = vmax.f32 %v6431_v37, 0.0  ;;  %v6434_v21 = vadd.f32 %v12015_v28, %v6235_v52  ;;  %v6234_v60 = vadd.f32 %v6051_v1, %v5634_v46  ;;  %v5637_v47 = vadd.f32 %v8530_v30, %v11928_v19  ;;  %v8628_v4 = vpop.f32.mrf.mxu0 }
 0x2cf   :  { %v5461_v41 = vpop.f32.mrf.mxu1 }
 0x2d0   :  { %6559 = vst [vmem:[#allocation3 + $0x100] sm:$0xff] %v6495_v23  ;;  %v6498_v58 = vmax.f32 %v6434_v21, 0.0  ;;  %v6433_v7 = vadd.f32 %v12015_v28, %v6234_v60  ;;  %v6237_v13 = vadd.f32 %v8628_v4, %v5637_v47  ;;  %v5636_v14 = vadd.f32 %v5461_v41, %v11931_v40  ;;  %v6061_v15 = vpop.f32.mrf.mxu0  ;;  %v13068_v23 = vld [vmem:[#allocation185_spill] sm:$0xff] }
 0x2d1   :  { %v8533_v48 = vpop.f32.mrf.mxu1 }
 0x2d2   :  { %6562 = vst [vmem:[#allocation3 + $0x118] sm:$0xff] %v6498_v58  ;;  %v6497_v49 = vmax.f32 %v6433_v7, 0.0  ;;  %v6436_v22 = vadd.f32 %v12015_v28, %v6237_v13  ;;  %v6236_v24 = vadd.f32 %v6061_v15, %v5636_v14  ;;  %v5639_v53 = vadd.f32 %v8533_v48, %v11934_v61  ;;  %v8631_v57 = vpop.f32.mrf.mxu0  ;;  %v13069_v7 = vld [vmem:[#allocation10_spill] sm:$0xff] }
 0x2d3   :  { %v5471_v19 = vpop.f32.mrf.mxu1 }
 0x2d4   :  { %6561 = vst [vmem:[#allocation3 + $0x110] sm:$0xff] %v6497_v49  ;;  %v6500_v45 = vmax.f32 %v6436_v22, 0.0  ;;  %v6435_v25 = vadd.f32 %v12015_v28, %v6236_v24  ;;  %v6239_v39 = vadd.f32 %v8631_v57, %v5639_v53  ;;  %v5638_v9 = vadd.f32 %v5471_v19, %v13063_v59  ;;  %v6071_v31 = vpop.f32.mrf.mxu0  ;;  %v13070_v24 = vld [vmem:[#allocation188_spill] sm:$0xff]  ;;  %v13071_v59 = vld [vmem:[#allocation187_spill] sm:$0xff] }
 0x2d5   :  { %v8536_v40 = vpop.f32.mrf.mxu1 }
 0x2d6   :  { %6564 = vst [vmem:[#allocation3 + $0x128] sm:$0xff] %v6500_v45  ;;  %v6499_v56 = vmax.f32 %v6435_v25, 0.0  ;;  %v6438_v6 = vadd.f32 %v12015_v28, %v6239_v39  ;;  %v6238_v38 = vadd.f32 %v6071_v31, %v5638_v9  ;;  %v5641_v55 = vadd.f32 %v8536_v40, %v13064_v29  ;;  %v8634_v54 = vpop.f32.mrf.mxu0  ;;  %v13072_v29 = vld [vmem:[#allocation12_spill] sm:$0xff] }
 0x2d7   :  { %v5481_v61 = vpop.f32.mrf.mxu1 }
 0x2d8   :  { %6563 = vst [vmem:[#allocation3 + $0x120] sm:$0xff] %v6499_v56  ;;  %v6502_v34 = vmax.f32 %v6438_v6, 0.0  ;;  %v6437_v0 = vadd.f32 %v12015_v28, %v6238_v38  ;;  %v6241_v62 = vadd.f32 %v8634_v54, %v5641_v55  ;;  %v5640_v12 = vadd.f32 %v5481_v61, %v13065_v50  ;;  %v6081_v27 = vpop.f32.mrf.mxu0  ;;  %v13073_v50 = vld [vmem:[#allocation190_spill] sm:$0xff] }
 0x2d9   :  { %v8539_v44 = vpop.f32.mrf.mxu1 }
 0x2da   :  { %6566 = vst [vmem:[#allocation3 + $0x138] sm:$0xff] %v6502_v34  ;;  %v6501_v17 = vmax.f32 %v6437_v0, 0.0  ;;  %v6440_v26 = vadd.f32 %v12015_v28, %v6241_v62  ;;  %v6240_v35 = vadd.f32 %v6081_v27, %v5640_v12  ;;  %v5643_v20 = vadd.f32 %v8539_v44, %v13066_v8  ;;  %v8637_v2 = vpop.f32.mrf.mxu0  ;;  %v13074_v8 = vld [vmem:[#allocation189_spill] sm:$0xff] }
 0x2db   :  { %v5491_v33 = vpop.f32.mrf.mxu1 }
 0x2dc   :  { %6565 = vst [vmem:[#allocation3 + $0x130] sm:$0xff] %v6501_v17  ;;  %v6504_v63 = vmax.f32 %v6440_v26, 0.0  ;;  %v6439_v18 = vadd.f32 %v12015_v28, %v6240_v35  ;;  %v6243_v36 = vadd.f32 %v8637_v2, %v5643_v20  ;;  %v5642_v43 = vadd.f32 %v5491_v33, %v13067_v51  ;;  %v6091_v37 = vpop.f32.mrf.mxu0  ;;  %v13075_v51 = vld [vmem:[#allocation14_spill] sm:$0xff] }
 0x2dd   :  { %v8542_v52 = vpop.f32.mrf.mxu1 }
 0x2de   :  { %6568 = vst [vmem:[#allocation3 + $0x148] sm:$0xff] %v6504_v63  ;;  %v6503_v46 = vmax.f32 %v6439_v18, 0.0  ;;  %v6442_v1 = vadd.f32 %v12015_v28, %v6243_v36  ;;  %v6242_v30 = vadd.f32 %v6091_v37, %v5642_v43  ;;  %v5645_v21 = vadd.f32 %v8542_v52, %v13068_v23  ;;  %v8640_v60 = vpop.f32.mrf.mxu0  ;;  %v13076_v23 = vld [vmem:[#allocation192_spill] sm:$0xff] }
 0x2df   :  { %v5501_v47 = vpop.f32.mrf.mxu1 }
 0x2e0   :  { %6567 = vst [vmem:[#allocation3 + $0x140] sm:$0xff] %v6503_v46  ;;  %v6506_v4 = vmax.f32 %v6442_v1, 0.0  ;;  %v6441_v41 = vadd.f32 %v12015_v28, %v6242_v30  ;;  %v6245_v58 = vadd.f32 %v8640_v60, %v5645_v21  ;;  %v5644_v13 = vadd.f32 %v5501_v47, %v13069_v7  ;;  %v6101_v14 = vpop.f32.mrf.mxu0  ;;  %v13077_v7 = vld [vmem:[#allocation191_spill] sm:$0xff] }
 0x2e1   :  { %v8545_v15 = vpop.f32.mrf.mxu1 }
 0x2e2   :  { %6570 = vst [vmem:[#allocation3 + $0x158] sm:$0xff] %v6506_v4  ;;  %v6505_v48 = vmax.f32 %v6441_v41, 0.0  ;;  %v6444_v49 = vadd.f32 %v12015_v28, %v6245_v58  ;;  %v6244_v22 = vadd.f32 %v6101_v14, %v5644_v13  ;;  %v5647_v53 = vadd.f32 %v8545_v15, %v13070_v24  ;;  %v8643_v57 = vpop.f32.mrf.mxu0 }
 0x2e3   :  { %v5511_v19 = vpop.f32.mrf.mxu1 }
 0x2e4   :  { %6569 = vst [vmem:[#allocation3 + $0x150] sm:$0xff] %v6505_v48  ;;  %v6508_v45 = vmax.f32 %v6444_v49, 0.0  ;;  %v6443_v25 = vadd.f32 %v12015_v28, %v6244_v22  ;;  %v6247_v39 = vadd.f32 %v8643_v57, %v5647_v53  ;;  %v5646_v9 = vadd.f32 %v5511_v19, %v13071_v59  ;;  %v6111_v31 = vpop.f32.mrf.mxu0 }
 0x2e5   :  { %v8548_v40 = vpop.f32.mrf.mxu1 }
 0x2e6   :  { %6572 = vst [vmem:[#allocation3 + $0x168] sm:$0xff] %v6508_v45  ;;  %v6507_v56 = vmax.f32 %v6443_v25, 0.0  ;;  %v6446_v6 = vadd.f32 %v12015_v28, %v6247_v39  ;;  %v6246_v38 = vadd.f32 %v6111_v31, %v5646_v9  ;;  %v5649_v55 = vadd.f32 %v8548_v40, %v13072_v29  ;;  %v8646_v54 = vpop.f32.mrf.mxu0 }
 0x2e7   :  { %v5521_v61 = vpop.f32.mrf.mxu1 }
 0x2e8   :  { %6571 = vst [vmem:[#allocation3 + $0x160] sm:$0xff] %v6507_v56  ;;  %v6510_v34 = vmax.f32 %v6446_v6, 0.0  ;;  %v6445_v0 = vadd.f32 %v12015_v28, %v6246_v38  ;;  %v6249_v62 = vadd.f32 %v8646_v54, %v5649_v55  ;;  %v5648_v12 = vadd.f32 %v5521_v61, %v13073_v50  ;;  %v6121_v27 = vpop.f32.mrf.mxu0 }
 0x2e9   :  { %v8551_v44 = vpop.f32.mrf.mxu1 }
 0x2ea   :  { %6574 = vst [vmem:[#allocation3 + $0x178] sm:$0xff] %v6510_v34  ;;  %v6509_v17 = vmax.f32 %v6445_v0, 0.0  ;;  %v6448_v26 = vadd.f32 %v12015_v28, %v6249_v62  ;;  %v6248_v35 = vadd.f32 %v6121_v27, %v5648_v12  ;;  %v5651_v20 = vadd.f32 %v8551_v44, %v13074_v8  ;;  %v8649_v2 = vpop.f32.mrf.mxu0 }
 0x2eb   :  { %v5531_v33 = vpop.f32.mrf.mxu1 }
 0x2ec   :  { %6573 = vst [vmem:[#allocation3 + $0x170] sm:$0xff] %v6509_v17  ;;  %v6512_v63 = vmax.f32 %v6448_v26, 0.0  ;;  %v6447_v18 = vadd.f32 %v12015_v28, %v6248_v35  ;;  %v6251_v36 = vadd.f32 %v8649_v2, %v5651_v20  ;;  %v5650_v43 = vadd.f32 %v5531_v33, %v13075_v51  ;;  %v6131_v37 = vpop.f32.mrf.mxu0 }
 0x2ed   :  { %v8554_v52 = vpop.f32.mrf.mxu1 }
 0x2ee   :  { %6576 = vst [vmem:[#allocation3 + $0x188] sm:$0xff] %v6512_v63  ;;  %v6511_v46 = vmax.f32 %v6447_v18, 0.0  ;;  %v6450_v1 = vadd.f32 %v12015_v28, %v6251_v36  ;;  %v6250_v30 = vadd.f32 %v6131_v37, %v5650_v43  ;;  %v5653_v21 = vadd.f32 %v8554_v52, %v13076_v23  ;;  %v8652_v60 = vpop.f32.mrf.mxu0  ;;  %v13078_v37 = vld [vmem:[#allocation16_spill] sm:$0xff] }
 0x2ef   :  { %v5541_v47 = vpop.f32.mrf.mxu1 }
 0x2f0   :  { %6575 = vst [vmem:[#allocation3 + $0x180] sm:$0xff] %v6511_v46  ;;  %v6514_v4 = vmax.f32 %v6450_v1, 0.0  ;;  %v6449_v41 = vadd.f32 %v12015_v28, %v6250_v30  ;;  %v6253_v58 = vadd.f32 %v8652_v60, %v5653_v21  ;;  %v5652_v13 = vadd.f32 %v5541_v47, %v13077_v7  ;;  %v6141_v14 = vpop.f32.mrf.mxu0  ;;  %v13079_v21 = vld [vmem:[#allocation194_spill] sm:$0xff]  ;;  %v13080_v7 = vld [vmem:[#allocation193_spill] sm:$0xff] }
 0x2f1   :  { %v8557_v15 = vpop.f32.mrf.mxu1 }
 0x2f2   :  { %6578 = vst [vmem:[#allocation3 + $0x198] sm:$0xff] %v6514_v4  ;;  %v6513_v48 = vmax.f32 %v6449_v41, 0.0  ;;  %v6452_v49 = vadd.f32 %v12015_v28, %v6253_v58  ;;  %v6252_v22 = vadd.f32 %v6141_v14, %v5652_v13  ;;  %v5655_v24 = vadd.f32 %v8557_v15, %v11982_v32  ;;  %v8655_v53 = vpop.f32.mrf.mxu0 }
 0x2f3   :  { %v5551_v57 = vpop.f32.mrf.mxu1 }
 0x2f4   :  { %6577 = vst [vmem:[#allocation3 + $0x190] sm:$0xff] %v6513_v48  ;;  %v6516_v19 = vmax.f32 %v6452_v49, 0.0  ;;  %v6451_v45 = vadd.f32 %v12015_v28, %v6252_v22  ;;  %v6255_v25 = vadd.f32 %v8655_v53, %v5655_v24  ;;  %v5654_v39 = vadd.f32 %v5551_v57, %v11985_v3  ;;  %v6151_v59 = vpop.f32.mrf.mxu0 }
 0x2f5   :  { %v8560_v9 = vpop.f32.mrf.mxu1 }
 0x2f6   :  { %6580 = vst [vmem:[#allocation3 + $0x1a8] sm:$0xff] %v6516_v19  ;;  %v6515_v31 = vmax.f32 %v6451_v45, 0.0  ;;  %v6454_v40 = vadd.f32 %v12015_v28, %v6255_v25  ;;  %v6254_v56 = vadd.f32 %v6151_v59, %v5654_v39  ;;  %v5657_v6 = vadd.f32 %v8560_v9, %v11988_v11  ;;  %v8658_v38 = vpop.f32.mrf.mxu0 }
 0x2f7   :  { %v5561_v32 = vpop.f32.mrf.mxu1 }
 0x2f8   :  { %6579 = vst [vmem:[#allocation3 + $0x1a0] sm:$0xff] %v6515_v31  ;;  %v6518_v29 = vmax.f32 %v6454_v40, 0.0  ;;  %v6453_v55 = vadd.f32 %v12015_v28, %v6254_v56  ;;  %v6257_v54 = vadd.f32 %v8658_v38, %v5657_v6  ;;  %v5656_v61 = vadd.f32 %v5561_v32, %v11991_v16  ;;  %v6161_v34 = vpop.f32.mrf.mxu0 }
 0x2f9   :  { %v8563_v3 = vpop.f32.mrf.mxu1 }
 0x2fa   :  { %6582 = vst [vmem:[#allocation3 + $0x1b8] sm:$0xff] %v6518_v29  ;;  %v6517_v0 = vmax.f32 %v6453_v55, 0.0  ;;  %v6456_v62 = vadd.f32 %v12015_v28, %v6257_v54  ;;  %v6256_v50 = vadd.f32 %v6161_v34, %v5656_v61  ;;  %v5659_v12 = vadd.f32 %v8563_v3, %v11994_v42  ;;  %v8661_v27 = vpop.f32.mrf.mxu0 }
 0x2fb   :  { %v5571_v11 = vpop.f32.mrf.mxu1 }
 0x2fc   :  { %6581 = vst [vmem:[#allocation3 + $0x1b0] sm:$0xff] %v6517_v0  ;;  %v6520_v44 = vmax.f32 %v6456_v62, 0.0  ;;  %v6455_v17 = vadd.f32 %v12015_v28, %v6256_v50  ;;  %v6259_v26 = vadd.f32 %v8661_v27, %v5659_v12  ;;  %v5658_v35 = vadd.f32 %v5571_v11, %v11997_v10  ;;  %v6171_v8 = vpop.f32.mrf.mxu0 }
 0x2fd   :  { %v8566_v16 = vpop.f32.mrf.mxu1 }
 0x2fe   :  { %6584 = vst [vmem:[#allocation3 + $0x1c8] sm:$0xff] %v6520_v44  ;;  %v6519_v20 = vmax.f32 %v6455_v17, 0.0  ;;  %v6458_v2 = vadd.f32 %v12015_v28, %v6259_v26  ;;  %v6258_v33 = vadd.f32 %v6171_v8, %v5658_v35  ;;  %v5661_v63 = vadd.f32 %v8566_v16, %v12000_v5  ;;  %v8664_v18 = vpop.f32.mrf.mxu0 }
 0x2ff   :  { %v5581_v42 = vpop.f32.mrf.mxu1 }
 0x300   :  { %6583 = vst [vmem:[#allocation3 + $0x1c0] sm:$0xff] %v6519_v20  ;;  %v6522_v36 = vmax.f32 %v6458_v2, 0.0  ;;  %v6457_v51 = vadd.f32 %v12015_v28, %v6258_v33  ;;  %v6261_v43 = vadd.f32 %v8664_v18, %v5661_v63  ;;  %v5660_v52 = vadd.f32 %v5581_v42, %v13078_v37  ;;  %v6181_v46 = vpop.f32.mrf.mxu0 }
 0x301   :  { %v8569_v10 = vpop.f32.mrf.mxu1 }
 0x302   :  { %6586 = vst [vmem:[#allocation3 + $0x1d8] sm:$0xff] %v6522_v36  ;;  %v6521_v1 = vmax.f32 %v6457_v51, 0.0  ;;  %v6460_v30 = vadd.f32 %v12015_v28, %v6261_v43  ;;  %v6260_v23 = vadd.f32 %v6181_v46, %v5660_v52  ;;  %v5663_v60 = vadd.f32 %v8569_v10, %v13079_v21  ;;  %v8667_v47 = vpop.f32.mrf.mxu0 }
 0x303   :  { %v5591_v5 = vpop.f32.mrf.mxu1 }
 0x304   :  { %6585 = vst [vmem:[#allocation3 + $0x1d0] sm:$0xff] %v6521_v1  ;;  %v6524_v4 = vmax.f32 %v6460_v30, 0.0  ;;  %v6459_v41 = vadd.f32 %v12015_v28, %v6260_v23  ;;  %v6263_v58 = vadd.f32 %v8667_v47, %v5663_v60  ;;  %v5662_v13 = vadd.f32 %v5591_v5, %v13080_v7  ;;  %v6191_v14 = vpop.f32.mrf.mxu0 }
 0x306   :  { %6588 = vst [vmem:[#allocation3 + $0x1e8] sm:$0xff] %v6524_v4  ;;  %v6523_v15 = vmax.f32 %v6459_v41, 0.0  ;;  %v6462_v48 = vadd.f32 %v12015_v28, %v6263_v58  ;;  %v6262_v49 = vadd.f32 %v6191_v14, %v5662_v13 }
 0x308   :  { %6587 = vst [vmem:[#allocation3 + $0x1e0] sm:$0xff] %v6523_v15  ;;  %v6526_v22 = vmax.f32 %v6462_v48, 0.0  ;;  %v6461_v24 = vadd.f32 %v12015_v28, %v6262_v49 }
 0x30a   :  { %6590 = vst [vmem:[#allocation3 + $0x1f8] sm:$0xff] %v6526_v22  ;;  %v6525_v53 = vmax.f32 %v6461_v24, 0.0 }
 0x30c   :  { %6589 = vst [vmem:[#allocation3 + $0x1f0] sm:$0xff] %v6525_v53 }
 0x30d   :  { %8744 = shalt.err (!%p8741_p4)
}
 0x30e   :  { %s8756_s13 = smov 128   ;;  %s8757_s1 = smov 8  }
 0x30f   :  { %6602 = dma.vmem_to_hbm [thread:$0]  %s6597_s11, 8192, %s12150_s3, [#allocation4], %s8756_s13, %s8756_s13, %s8757_s1  }
 0x310   :  { %8753 = dma.done.wait [#allocation4], 8192  }
 0x311   :  { %8754 = vsyncadd [#allocation4], 4294959104 }
 0x312   :  { %6606 = vsyncpa [#allocation4], 1 }

</bundles_post_ra>
